<compile_context>
chip_gen: v5e
topology: v5e:2x2
jax: 0.10.0
libtpu: 0.0.40
codegen_flags: <defaults>
</compile_context>

<pallas_src>
import jax
import jax.numpy as jnp
from jax import lax
from jax.experimental import pallas as pl
from jax.experimental.pallas import tpu as pltpu

EPS = 1e-5


def _stack_kx(a):
    """Channel-stack the three kx-shifted views of a (rows, W, C) window.

    result[r, x, kx*C + ci] == a[r, x + kx - 1, ci]  (zero outside [0, W)),
    matching weights reshaped HWIO (3, 3, C, Co) -> (3, 3*C, Co).
    """
    rows, width, c = a.shape
    zc = jnp.zeros((rows, 1, c), a.dtype)
    left = jnp.concatenate([zc, a[:, : width - 1, :]], axis=1)   # value at x: a[x-1]
    right = jnp.concatenate([a[:, 1:, :], zc], axis=1)           # value at x: a[x+1]
    return jnp.concatenate([left, a, right], axis=-1)            # (rows, W, 3C)


def _make_wide_basic_kernel(th, h, w, co_tile, identity_shortcut):
    """Build a _WideBasic kernel for row-block size `th` on an HxW image."""
    r_in = th + 4    # BN1/ReLU rows (halo for conv1 *and* conv2)
    r_mid = th + 2   # conv1-output rows (halo for conv2)

    def kernel(x_ref, s1_ref, t1_ref, w1_ref, s2_ref, t2_ref, w2_ref,
               b_ref, *rest):
        if identity_shortcut:
            (o_ref,) = rest
        else:
            ws_ref, o_ref = rest
        c_in = x_ref.shape[-1]
        c_out = o_ref.shape[-1]
        cot = [(c0, min(co_tile, c_out - c0)) for c0 in range(0, c_out, co_tile)]

        j = pl.program_id(1)
        r0 = pl.multiple_of(j * th, th)          # first output row of this block

        # x_ref holds the whole (H+4)-row padded image (block index constant
        # along j -> DMA'd once per image); take this block's row window.
        xw = x_ref[pl.ds(r0, r_in), :, :]        # (r_in, W, Cin) bf16

        # ---- BN1 + ReLU (f32), zero conv-padding rows, cast to bf16 --------
        xf = xw.astype(jnp.float32).reshape(r_in * w, c_in)
        y = jnp.maximum(xf * s1_ref[0] + t1_ref[0], 0.0)
        ri = lax.broadcasted_iota(jnp.int32, (r_in * w, 1), 0)     # per-row mask
        y = y * ((ri >= (2 - r0) * w) & (ri < (h + 2 - r0) * w)).astype(jnp.float32)
        yb = y.astype(jnp.bfloat16).reshape(r_in, w, c_in)

        # ---- conv1 (3x3): kx folded into K -> 3 matmuls, Cout tiled --------
        a1 = _stack_kx(yb)                       # (r_in, W, 3*Cin) bf16
        a1_2d = [a1[ky:ky + r_mid].reshape(r_mid * w, 3 * c_in) for ky in range(3)]
        mi = lax.broadcasted_iota(jnp.int32, (r_mid * w, 1), 0)
        mid_mask = ((mi >= (1 - r0) * w)
                    & (mi < (h + 1 - r0) * w)).astype(jnp.float32)

        # dropout: eval mode -> identity
        # TODO(synk): training-mode dropout (pltpu.prng_* mask/scale) not implemented.

        zb_tiles = []
        for c0, ct in cot:
            acc = jnp.zeros((r_mid * w, ct), jnp.float32)
            for ky in range(3):
                acc = acc + jnp.dot(a1_2d[ky], w1_ref[ky, :, c0:c0 + ct],
                                    preferred_element_type=jnp.float32)
            # BN2 + ReLU (conv1 bias folded into t2), zero conv-padding rows.
            zt = jnp.maximum(acc * s2_ref[0, c0:c0 + ct] + t2_ref[0, c0:c0 + ct], 0.0)
            zb_tiles.append((zt * mid_mask).astype(jnp.bfloat16))
        zb = zb_tiles[0] if len(zb_tiles) == 1 else jnp.concatenate(zb_tiles, axis=-1)
        zb = zb.reshape(r_mid, w, c_out)

        # ---- conv2 (3x3) + bias + shortcut, Cout tiled ----------------------
        a2 = _stack_kx(zb)                       # (r_mid, W, 3*Cout) bf16
        a2_2d = [a2[ky:ky + th].reshape(th * w, 3 * c_out) for ky in range(3)]
        xc = xw[2:2 + th]                        # rows r0..r0+TH-1, bf16
        if not identity_shortcut:
            xc_2d = xc.reshape(th * w, c_in)

        for c0, ct in cot:
            acc = jnp.zeros((th * w, ct), jnp.float32)
            for ky in range(3):
                acc = acc + jnp.dot(a2_2d[ky], w2_ref[ky, :, c0:c0 + ct],
                                    preferred_element_type=jnp.float32)
            acc = acc + b_ref[0, c0:c0 + ct]     # b2 (+ bs) folded here
            if identity_shortcut:
                acc = acc + xc[:, :, c0:c0 + ct].reshape(th * w, ct).astype(jnp.float32)
            else:
                acc = acc + jnp.dot(xc_2d, ws_ref[:, c0:c0 + ct],
                                    preferred_element_type=jnp.float32)
            o_ref[:, :, c0:c0 + ct] = acc.reshape(th, w, ct).astype(o_ref.dtype)

    return kernel


def _vmem_limit_bytes():
    """Per-core VMEM request: <= 96 MiB, always leaving ~16 MiB headroom
    (so the same code is safe on v7x's 64 MiB as well as v5e/v6e's 128 MiB)."""
    cap = 64 * 1024 * 1024
    try:
        cap = int(getattr(pltpu.get_tpu_info(), "vmem_capacity_bytes", cap))
    except Exception:
        pass
    return max(32 * 1024 * 1024, min(cap - 16 * 1024 * 1024, 96 * 1024 * 1024))


def wide_basic_forward_nhwc(x_nhwc, params, stride=1, row_block=16, co_tile=128):
    """Pallas _WideBasic forward: NHWC in / NHWC out, bf16 activations."""
    # TODO(synk): stride != 1 (strided conv2 + strided 1x1 shortcut) not implemented.
    assert stride == 1, "only stride=1 supported in this kernel"

    x = x_nhwc.astype(jnp.bfloat16)              # activations carried in bf16
    N, H, W, Cin = x.shape
    Cout = params["w1"].shape[-1]
    # Largest divisor of H that is <= row_block.
    th = max(d for d in range(1, min(row_block, H) + 1) if H % d == 0)

    # Two zero rows above/below: every row block reads its 2-row conv halo
    # without bounds handling inside the kernel.
    xp = jnp.pad(x, ((0, 0), (2, 2), (0, 0), (0, 0)))

    # Fold BN (eval mode, running stats) into per-channel scale/shift; fold
    # conv1's bias into the BN2 shift and conv2 (+ shortcut) biases into one
    # final bias.
    f32 = jnp.float32
    s1 = (params["gamma1"] / jnp.sqrt(params["var1"] + EPS)).astype(f32)
    t1 = (params["beta1"] - params["mean1"] * s1).astype(f32)
    s2 = (params["gamma2"] / jnp.sqrt(params["var2"] + EPS)).astype(f32)
    t2 = (params["beta2"] - params["mean2"] * s2 + s2 * params["b1"]).astype(f32)

    identity = params["ws"] is None
    bias = params["b2"] if identity else params["b2"] + params["bs"]

    # HWIO (3,3,Ci,Co) -> (ky, kx*Ci+ci, co): matches the kx-stacked operand.
    w1 = params["w1"].reshape(3, 3 * Cin, Cout).astype(jnp.bfloat16)
    w2 = params["w2"].reshape(3, 3 * Cout, Cout).astype(jnp.bfloat16)

    def vec(v):
        return v.reshape(1, -1).astype(f32)

    inputs = [xp, vec(s1), vec(t1), w1, vec(s2), vec(t2), w2, vec(bias)]
    if not identity:
        inputs.append(params["ws"].reshape(Cin, Cout).astype(jnp.bfloat16))

    kernel = _make_wide_basic_kernel(th, H, W, co_tile, identity)

    def run(use_buffered):
        def cspec(shape):
            # Block index never changes over the grid -> single buffering is
            # enough (avoids double-buffering multi-MB weights in VMEM).
            idx = lambda n, j: (0,) * len(shape)
            if use_buffered:
                return pl.BlockSpec(shape, idx, pipeline_mode=pl.Buffered(1))
            return pl.BlockSpec(shape, idx)

        in_specs = [
            pl.BlockSpec((None, H + 4, W, Cin), lambda n, j: (n, 0, 0, 0)),  # x (per image)
            cspec((1, Cin)), cspec((1, Cin)),            # s1, t1
            cspec((3, 3 * Cin, Cout)),                   # w1 (bf16)
            cspec((1, Cout)), cspec((1, Cout)),          # s2, t2 (b1 folded)
            cspec((3, 3 * Cout, Cout)),                  # w2 (bf16)
            cspec((1, Cout)),                            # bias (b2 [+ bs])
        ]
        if not identity:
            in_specs.append(cspec((Cin, Cout)))          # 1x1 shortcut weight

        out = pl.pallas_call(
            kernel,
            grid_spec=pltpu.PrefetchScalarGridSpec(
                num_scalar_prefetch=0,
                grid=(N, H // th),
                in_specs=in_specs,
                out_specs=pl.BlockSpec((None, th, W, Cout),
                                       lambda n, j: (n, j, 0, 0))),
            out_shape=jax.ShapeDtypeStruct((N, H, W, Cout), jnp.bfloat16),
            compiler_params=pltpu.CompilerParams(
                dimension_semantics=("parallel", "parallel"),
                vmem_limit_bytes=_vmem_limit_bytes()),
        )(*inputs)
        return jax.block_until_ready(out)

    try:
        return run(True)
    except Exception:
        # pipeline_mode / pl.Buffered(1) not supported by this JAX build:
        # fall back to default (double-buffered) specs.
        return run(False)


def wide_basic_forward(x_nchw, params, stride=1, row_block=16, co_tile=128):
    """Drop-in NCHW/f32 wrapper.  In a full WideResNet, do the NCHW<->NHWC and
    f32<->bf16 conversions once at the network boundary and chain blocks with
    `wide_basic_forward_nhwc` instead."""
    x = jnp.transpose(x_nchw, (0, 2, 3, 1))
    out = wide_basic_forward_nhwc(x, params, stride=stride,
                                  row_block=row_block, co_tile=co_tile)
    return jnp.transpose(out.astype(jnp.float32), (0, 3, 1, 2))


def wide_basic_reference_nhwc(x_nhwc, params, conv_dtype=jnp.bfloat16):
    """Pure-JAX reference (lax.conv), NHWC in / NHWC out.  conv_dtype=bfloat16
    matches the kernel's bf16-operand / f32-accumulate matmuls."""
    x = x_nhwc.astype(jnp.float32)
    dn = ("NHWC", "HWIO", "NHWC")

    def bn_relu(v, g, b, m, var):
        return jnp.maximum((v - m) / jnp.sqrt(var + EPS) * g + b, 0.0)

    def conv(v, wgt, pad):
        return lax.conv_general_dilated(
            v.astype(conv_dtype), wgt.astype(conv_dtype), (1, 1), pad,
            dimension_numbers=dn, preferred_element_type=jnp.float32)

    y = bn_relu(x, params["gamma1"], params["beta1"],
                params["mean1"], params["var1"])
    y = conv(y, params["w1"], [(1, 1), (1, 1)]) + params["b1"]
    y = bn_relu(y, params["gamma2"], params["beta2"],
                params["mean2"], params["var2"])
    y = conv(y, params["w2"], [(1, 1), (1, 1)]) + params["b2"]
    if params["ws"] is None:
        sc = x
    else:
        sc = conv(x, params["ws"], [(0, 0), (0, 0)]) + params["bs"]
    return y + sc


def make_params(key, in_planes, planes, stride=1):
    ks = jax.random.split(key, 8)
    p = {
        "gamma1": jax.random.uniform(ks[0], (in_planes,), jnp.float32, 0.5, 1.5),
        "beta1": jax.random.normal(ks[1], (in_planes,), jnp.float32) * 0.1,
        "mean1": jax.random.normal(ks[2], (in_planes,), jnp.float32) * 0.1,
        "var1": jax.random.uniform(ks[3], (in_planes,), jnp.float32, 0.5, 1.5),
        "w1": jax.random.normal(ks[4], (3, 3, in_planes, planes), jnp.float32) * 0.1,
        "b1": jax.random.normal(ks[5], (planes,), jnp.float32) * 0.1,
        "gamma2": jax.random.uniform(ks[6], (planes,), jnp.float32, 0.5, 1.5),
        "beta2": jax.random.normal(ks[7], (planes,), jnp.float32) * 0.1,
        "mean2": jax.random.normal(jax.random.fold_in(key, 10), (planes,), jnp.float32) * 0.1,
        "var2": jax.random.uniform(jax.random.fold_in(key, 11), (planes,), jnp.float32, 0.5, 1.5),
        "w2": jax.random.normal(jax.random.fold_in(key, 12), (3, 3, planes, planes), jnp.float32) * 0.1,
        "b2": jax.random.normal(jax.random.fold_in(key, 13), (planes,), jnp.float32) * 0.1,
    }
    if stride != 1 or in_planes != planes:
        p["ws"] = jax.random.normal(jax.random.fold_in(key, 14),
                                    (1, 1, in_planes, planes), jnp.float32) * 0.1
        p["bs"] = jax.random.normal(jax.random.fold_in(key, 15),
                                    (planes,), jnp.float32) * 0.1
    else:
        p["ws"] = None
        p["bs"] = None
    return p


if __name__ == "__main__":
    key = jax.random.PRNGKey(0)
    N, HW = 2, 16
    # (in_planes, planes): conv-shortcut block and identity-shortcut block.
    configs = [(4, 8), (8, 8)]

    for idx, (cin, cout) in enumerate(configs):
        kx, kp = jax.random.split(jax.random.fold_in(key, idx))
        # NCHW -> NHWC and f32 -> bf16 done ONCE here (i.e. once per network),
        # not inside every block.
        x_nchw = jax.random.normal(kx, (N, cin, HW, HW), jnp.float32)
        x = jnp.transpose(x_nchw, (0, 2, 3, 1)).astype(jnp.bfloat16)
        params = make_params(kp, cin, cout, stride=1)

        out = jax.block_until_ready(wide_basic_forward_nhwc(x, params))
        ref = wide_basic_reference_nhwc(x, params)

        assert out.shape == (N, HW, HW, cout), out.shape
        assert jnp.allclose(out.astype(jnp.float32), ref, rtol=5e-2, atol=5e-2), \
            float(jnp.max(jnp.abs(out.astype(jnp.float32) - ref)))

    print("KERNEL_OK")
</pallas_src>

<mosaic_0001>
module attributes {stable_mosaic.version = 11 : i64} {
  func.func @kernel(%arg0: i32, %arg1: i32, %arg2: memref<1x20x16x4xbf16, #tpu.memory_space<vmem>>, %arg3: memref<1x4xf32, #tpu.memory_space<vmem>>, %arg4: memref<1x4xf32, #tpu.memory_space<vmem>>, %arg5: memref<3x12x8xbf16, #tpu.memory_space<vmem>>, %arg6: memref<1x8xf32, #tpu.memory_space<vmem>>, %arg7: memref<1x8xf32, #tpu.memory_space<vmem>>, %arg8: memref<3x24x8xbf16, #tpu.memory_space<vmem>>, %arg9: memref<1x8xf32, #tpu.memory_space<vmem>>, %arg10: memref<4x8xbf16, #tpu.memory_space<vmem>>, %arg11: memref<1x16x16x8xbf16, #tpu.memory_space<vmem>>) attributes {dimension_semantics = [#tpu.dimension_semantics<parallel>, #tpu.dimension_semantics<parallel>], iteration_bounds = array<i64: 2, 1>, scalar_prefetch = 0 : i64, scratch_operands = 0 : i64, tpu.core_type = #tpu.core_type<tc>, window_params = [{transform_indices = @transform_0, window_bounds = array<i64: 1, 20, 16, 4>}, {pipeline_mode = #tpu.pipeline_mode<synchronous>, transform_indices = @transform_1, window_bounds = array<i64: 1, 4>}, {pipeline_mode = #tpu.pipeline_mode<synchronous>, transform_indices = @transform_2, window_bounds = array<i64: 1, 4>}, {pipeline_mode = #tpu.pipeline_mode<synchronous>, transform_indices = @transform_3, window_bounds = array<i64: 3, 12, 8>}, {pipeline_mode = #tpu.pipeline_mode<synchronous>, transform_indices = @transform_4, window_bounds = array<i64: 1, 8>}, {pipeline_mode = #tpu.pipeline_mode<synchronous>, transform_indices = @transform_5, window_bounds = array<i64: 1, 8>}, {pipeline_mode = #tpu.pipeline_mode<synchronous>, transform_indices = @transform_6, window_bounds = array<i64: 3, 24, 8>}, {pipeline_mode = #tpu.pipeline_mode<synchronous>, transform_indices = @transform_7, window_bounds = array<i64: 1, 8>}, {pipeline_mode = #tpu.pipeline_mode<synchronous>, transform_indices = @transform_8, window_bounds = array<i64: 4, 8>}, {transform_indices = @transform_9, window_bounds = array<i64: 1, 16, 16, 8>}]} {
    %c16_i32 = arith.constant 16 : i32
    %0 = arith.muli %arg1, %c16_i32 : i32
    %1 = tpu.assume_multiple %0, 16 : i32
    %c0 = arith.constant 0 : index
    %2 = arith.index_cast %1 : i32 to index
    %c0_0 = arith.constant 0 : index
    %c0_1 = arith.constant 0 : index
    %3 = vector.load %arg2[%c0, %2, %c0_0, %c0_1] : memref<1x20x16x4xbf16, #tpu.memory_space<vmem>>, vector<1x20x16x4xbf16>
    %4 = vector.shape_cast %3 : vector<1x20x16x4xbf16> to vector<20x16x4xbf16>
    %5 = arith.extf %4 : vector<20x16x4xbf16> to vector<20x16x4xf32>
    %6 = vector.shape_cast %5 : vector<20x16x4xf32> to vector<320x4xf32>
    %c0_2 = arith.constant 0 : index
    %c0_3 = arith.constant 0 : index
    %7 = vector.load %arg3[%c0_2, %c0_3] : memref<1x4xf32, #tpu.memory_space<vmem>>, vector<1x4xf32>
    %8 = vector.shape_cast %7 : vector<1x4xf32> to vector<4xf32>
    %9 = vector.shape_cast %8 : vector<4xf32> to vector<1x4xf32>
    %10 = vector.broadcast %9 : vector<1x4xf32> to vector<320x4xf32>
    %11 = arith.mulf %6, %10 : vector<320x4xf32>
    %c0_4 = arith.constant 0 : index
    %c0_5 = arith.constant 0 : index
    %12 = vector.load %arg4[%c0_4, %c0_5] : memref<1x4xf32, #tpu.memory_space<vmem>>, vector<1x4xf32>
    %13 = vector.shape_cast %12 : vector<1x4xf32> to vector<4xf32>
    %14 = vector.shape_cast %13 : vector<4xf32> to vector<1x4xf32>
    %15 = vector.broadcast %14 : vector<1x4xf32> to vector<320x4xf32>
    %16 = arith.addf %11, %15 : vector<320x4xf32>
    %cst = arith.constant 0.000000e+00 : f32
    %17 = vector.broadcast %cst : f32 to vector<320x4xf32>
    %18 = arith.maximumf %16, %17 : vector<320x4xf32>
    %19 = tpu.iota {dimensions = array<i32: 0>} : vector<320x1xi32>
    %c2_i32 = arith.constant 2 : i32
    %20 = arith.subi %c2_i32, %1 : i32
    %c16_i32_6 = arith.constant 16 : i32
    %21 = arith.muli %20, %c16_i32_6 : i32
    %22 = vector.broadcast %21 : i32 to vector<320x1xi32>
    %23 = arith.cmpi sge, %19, %22 : vector<320x1xi32>
    %c18_i32 = arith.constant 18 : i32
    %24 = arith.subi %c18_i32, %1 : i32
    %c16_i32_7 = arith.constant 16 : i32
    %25 = arith.muli %24, %c16_i32_7 : i32
    %26 = vector.broadcast %25 : i32 to vector<320x1xi32>
    %27 = arith.cmpi slt, %19, %26 : vector<320x1xi32>
    %28 = arith.andi %23, %27 : vector<320x1xi1>
    %29 = arith.extui %28 : vector<320x1xi1> to vector<320x1xi32>
    %30 = arith.sitofp %29 : vector<320x1xi32> to vector<320x1xf32>
    %31 = vector.broadcast %30 : vector<320x1xf32> to vector<320x4xf32>
    %32 = arith.mulf %18, %31 : vector<320x4xf32>
    %33 = arith.truncf %32 : vector<320x4xf32> to vector<320x4xbf16>
    %34 = vector.shape_cast %33 : vector<320x4xbf16> to vector<20x16x4xbf16>
    %cst_8 = arith.constant 0.000000e+00 : bf16
    %35 = vector.broadcast %cst_8 : bf16 to vector<20x1x4xbf16>
    %36 = vector.extract_strided_slice %34 {offsets = [0, 0, 0], sizes = [20, 15, 4], strides = [1, 1, 1]} : vector<20x16x4xbf16> to vector<20x15x4xbf16>
    %37 = tpu.concatenate %35, %36 in 1 : vector<20x1x4xbf16>, vector<20x15x4xbf16> -> vector<20x16x4xbf16>
    %38 = vector.extract_strided_slice %34 {offsets = [0, 1, 0], sizes = [20, 15, 4], strides = [1, 1, 1]} : vector<20x16x4xbf16> to vector<20x15x4xbf16>
    %39 = tpu.concatenate %38, %35 in 1 : vector<20x15x4xbf16>, vector<20x1x4xbf16> -> vector<20x16x4xbf16>
    %40 = tpu.concatenate %37, %34, %39 in 2 : vector<20x16x4xbf16>, vector<20x16x4xbf16>, vector<20x16x4xbf16> -> vector<20x16x12xbf16>
    %41 = vector.extract_strided_slice %40 {offsets = [0, 0, 0], sizes = [18, 16, 12], strides = [1, 1, 1]} : vector<20x16x12xbf16> to vector<18x16x12xbf16>
    %42 = vector.shape_cast %41 : vector<18x16x12xbf16> to vector<288x12xbf16>
    %43 = vector.extract_strided_slice %40 {offsets = [1, 0, 0], sizes = [18, 16, 12], strides = [1, 1, 1]} : vector<20x16x12xbf16> to vector<18x16x12xbf16>
    %44 = vector.shape_cast %43 : vector<18x16x12xbf16> to vector<288x12xbf16>
    %45 = vector.extract_strided_slice %40 {offsets = [2, 0, 0], sizes = [18, 16, 12], strides = [1, 1, 1]} : vector<20x16x12xbf16> to vector<18x16x12xbf16>
    %46 = vector.shape_cast %45 : vector<18x16x12xbf16> to vector<288x12xbf16>
    %47 = tpu.iota {dimensions = array<i32: 0>} : vector<288x1xi32>
    %c1_i32 = arith.constant 1 : i32
    %48 = arith.subi %c1_i32, %1 : i32
    %c16_i32_9 = arith.constant 16 : i32
    %49 = arith.muli %48, %c16_i32_9 : i32
    %50 = vector.broadcast %49 : i32 to vector<288x1xi32>
    %51 = arith.cmpi sge, %47, %50 : vector<288x1xi32>
    %c17_i32 = arith.constant 17 : i32
    %52 = arith.subi %c17_i32, %1 : i32
    %c16_i32_10 = arith.constant 16 : i32
    %53 = arith.muli %52, %c16_i32_10 : i32
    %54 = vector.broadcast %53 : i32 to vector<288x1xi32>
    %55 = arith.cmpi slt, %47, %54 : vector<288x1xi32>
    %56 = arith.andi %51, %55 : vector<288x1xi1>
    %57 = arith.extui %56 : vector<288x1xi1> to vector<288x1xi32>
    %58 = arith.sitofp %57 : vector<288x1xi32> to vector<288x1xf32>
    %cst_11 = arith.constant 0.000000e+00 : f32
    %59 = vector.broadcast %cst_11 : f32 to vector<288x8xf32>
    %c0_12 = arith.constant 0 : index
    %c0_13 = arith.constant 0 : index
    %c0_14 = arith.constant 0 : index
    %60 = vector.load %arg5[%c0_12, %c0_13, %c0_14] : memref<3x12x8xbf16, #tpu.memory_space<vmem>>, vector<1x12x8xbf16>
    %61 = vector.shape_cast %60 : vector<1x12x8xbf16> to vector<12x8xbf16>
    %cst_15 = arith.constant dense<0.000000e+00> : vector<288x8xf32>
    %62 = tpu.matmul %42, %61, %cst_15 {dimension_numbers = #tpu.dot_dimension_numbers<[1], [0], [0], [1], [0, 0, 1, 1], [], []>} : vector<288x12xbf16>, vector<12x8xbf16>, vector<288x8xf32> -> vector<288x8xf32>
    %63 = arith.addf %59, %62 : vector<288x8xf32>
    %c1 = arith.constant 1 : index
    %c0_16 = arith.constant 0 : index
    %c0_17 = arith.constant 0 : index
    %64 = vector.load %arg5[%c1, %c0_16, %c0_17] : memref<3x12x8xbf16, #tpu.memory_space<vmem>>, vector<1x12x8xbf16>
    %65 = vector.shape_cast %64 : vector<1x12x8xbf16> to vector<12x8xbf16>
    %cst_18 = arith.constant dense<0.000000e+00> : vector<288x8xf32>
    %66 = tpu.matmul %44, %65, %cst_18 {dimension_numbers = #tpu.dot_dimension_numbers<[1], [0], [0], [1], [0, 0, 1, 1], [], []>} : vector<288x12xbf16>, vector<12x8xbf16>, vector<288x8xf32> -> vector<288x8xf32>
    %67 = arith.addf %63, %66 : vector<288x8xf32>
    %c2 = arith.constant 2 : index
    %c0_19 = arith.constant 0 : index
    %c0_20 = arith.constant 0 : index
    %68 = vector.load %arg5[%c2, %c0_19, %c0_20] : memref<3x12x8xbf16, #tpu.memory_space<vmem>>, vector<1x12x8xbf16>
    %69 = vector.shape_cast %68 : vector<1x12x8xbf16> to vector<12x8xbf16>
    %cst_21 = arith.constant dense<0.000000e+00> : vector<288x8xf32>
    %70 = tpu.matmul %46, %69, %cst_21 {dimension_numbers = #tpu.dot_dimension_numbers<[1], [0], [0], [1], [0, 0, 1, 1], [], []>} : vector<288x12xbf16>, vector<12x8xbf16>, vector<288x8xf32> -> vector<288x8xf32>
    %71 = arith.addf %67, %70 : vector<288x8xf32>
    %c0_22 = arith.constant 0 : index
    %c0_23 = arith.constant 0 : index
    %72 = vector.load %arg6[%c0_22, %c0_23] : memref<1x8xf32, #tpu.memory_space<vmem>>, vector<1x8xf32>
    %73 = vector.shape_cast %72 : vector<1x8xf32> to vector<8xf32>
    %74 = vector.shape_cast %73 : vector<8xf32> to vector<1x8xf32>
    %75 = vector.broadcast %74 : vector<1x8xf32> to vector<288x8xf32>
    %76 = arith.mulf %71, %75 : vector<288x8xf32>
    %c0_24 = arith.constant 0 : index
    %c0_25 = arith.constant 0 : index
    %77 = vector.load %arg7[%c0_24, %c0_25] : memref<1x8xf32, #tpu.memory_space<vmem>>, vector<1x8xf32>
    %78 = vector.shape_cast %77 : vector<1x8xf32> to vector<8xf32>
    %79 = vector.shape_cast %78 : vector<8xf32> to vector<1x8xf32>
    %80 = vector.broadcast %79 : vector<1x8xf32> to vector<288x8xf32>
    %81 = arith.addf %76, %80 : vector<288x8xf32>
    %cst_26 = arith.constant 0.000000e+00 : f32
    %82 = vector.broadcast %cst_26 : f32 to vector<288x8xf32>
    %83 = arith.maximumf %81, %82 : vector<288x8xf32>
    %84 = vector.broadcast %58 : vector<288x1xf32> to vector<288x8xf32>
    %85 = arith.mulf %83, %84 : vector<288x8xf32>
    %86 = arith.truncf %85 : vector<288x8xf32> to vector<288x8xbf16>
    %87 = vector.shape_cast %86 : vector<288x8xbf16> to vector<18x16x8xbf16>
    %cst_27 = arith.constant 0.000000e+00 : bf16
    %88 = vector.broadcast %cst_27 : bf16 to vector<18x1x8xbf16>
    %89 = vector.extract_strided_slice %87 {offsets = [0, 0, 0], sizes = [18, 15, 8], strides = [1, 1, 1]} : vector<18x16x8xbf16> to vector<18x15x8xbf16>
    %90 = tpu.concatenate %88, %89 in 1 : vector<18x1x8xbf16>, vector<18x15x8xbf16> -> vector<18x16x8xbf16>
    %91 = vector.extract_strided_slice %87 {offsets = [0, 1, 0], sizes = [18, 15, 8], strides = [1, 1, 1]} : vector<18x16x8xbf16> to vector<18x15x8xbf16>
    %92 = tpu.concatenate %91, %88 in 1 : vector<18x15x8xbf16>, vector<18x1x8xbf16> -> vector<18x16x8xbf16>
    %93 = tpu.concatenate %90, %87, %92 in 2 : vector<18x16x8xbf16>, vector<18x16x8xbf16>, vector<18x16x8xbf16> -> vector<18x16x24xbf16>
    %94 = vector.extract_strided_slice %93 {offsets = [0, 0, 0], sizes = [16, 16, 24], strides = [1, 1, 1]} : vector<18x16x24xbf16> to vector<16x16x24xbf16>
    %95 = vector.shape_cast %94 : vector<16x16x24xbf16> to vector<256x24xbf16>
    %96 = vector.extract_strided_slice %93 {offsets = [1, 0, 0], sizes = [16, 16, 24], strides = [1, 1, 1]} : vector<18x16x24xbf16> to vector<16x16x24xbf16>
    %97 = vector.shape_cast %96 : vector<16x16x24xbf16> to vector<256x24xbf16>
    %98 = vector.extract_strided_slice %93 {offsets = [2, 0, 0], sizes = [16, 16, 24], strides = [1, 1, 1]} : vector<18x16x24xbf16> to vector<16x16x24xbf16>
    %99 = vector.shape_cast %98 : vector<16x16x24xbf16> to vector<256x24xbf16>
    %100 = vector.extract_strided_slice %4 {offsets = [2, 0, 0], sizes = [16, 16, 4], strides = [1, 1, 1]} : vector<20x16x4xbf16> to vector<16x16x4xbf16>
    %101 = vector.shape_cast %100 : vector<16x16x4xbf16> to vector<256x4xbf16>
    %cst_28 = arith.constant 0.000000e+00 : f32
    %102 = vector.broadcast %cst_28 : f32 to vector<256x8xf32>
    %c0_29 = arith.constant 0 : index
    %c0_30 = arith.constant 0 : index
    %c0_31 = arith.constant 0 : index
    %103 = vector.load %arg8[%c0_29, %c0_30, %c0_31] : memref<3x24x8xbf16, #tpu.memory_space<vmem>>, vector<1x24x8xbf16>
    %104 = vector.shape_cast %103 : vector<1x24x8xbf16> to vector<24x8xbf16>
    %cst_32 = arith.constant dense<0.000000e+00> : vector<256x8xf32>
    %105 = tpu.matmul %95, %104, %cst_32 {dimension_numbers = #tpu.dot_dimension_numbers<[1], [0], [0], [1], [0, 0, 1, 1], [], []>} : vector<256x24xbf16>, vector<24x8xbf16>, vector<256x8xf32> -> vector<256x8xf32>
    %106 = arith.addf %102, %105 : vector<256x8xf32>
    %c1_33 = arith.constant 1 : index
    %c0_34 = arith.constant 0 : index
    %c0_35 = arith.constant 0 : index
    %107 = vector.load %arg8[%c1_33, %c0_34, %c0_35] : memref<3x24x8xbf16, #tpu.memory_space<vmem>>, vector<1x24x8xbf16>
    %108 = vector.shape_cast %107 : vector<1x24x8xbf16> to vector<24x8xbf16>
    %cst_36 = arith.constant dense<0.000000e+00> : vector<256x8xf32>
    %109 = tpu.matmul %97, %108, %cst_36 {dimension_numbers = #tpu.dot_dimension_numbers<[1], [0], [0], [1], [0, 0, 1, 1], [], []>} : vector<256x24xbf16>, vector<24x8xbf16>, vector<256x8xf32> -> vector<256x8xf32>
    %110 = arith.addf %106, %109 : vector<256x8xf32>
    %c2_37 = arith.constant 2 : index
    %c0_38 = arith.constant 0 : index
    %c0_39 = arith.constant 0 : index
    %111 = vector.load %arg8[%c2_37, %c0_38, %c0_39] : memref<3x24x8xbf16, #tpu.memory_space<vmem>>, vector<1x24x8xbf16>
    %112 = vector.shape_cast %111 : vector<1x24x8xbf16> to vector<24x8xbf16>
    %cst_40 = arith.constant dense<0.000000e+00> : vector<256x8xf32>
    %113 = tpu.matmul %99, %112, %cst_40 {dimension_numbers = #tpu.dot_dimension_numbers<[1], [0], [0], [1], [0, 0, 1, 1], [], []>} : vector<256x24xbf16>, vector<24x8xbf16>, vector<256x8xf32> -> vector<256x8xf32>
    %114 = arith.addf %110, %113 : vector<256x8xf32>
    %c0_41 = arith.constant 0 : index
    %c0_42 = arith.constant 0 : index
    %115 = vector.load %arg9[%c0_41, %c0_42] : memref<1x8xf32, #tpu.memory_space<vmem>>, vector<1x8xf32>
    %116 = vector.shape_cast %115 : vector<1x8xf32> to vector<8xf32>
    %117 = vector.shape_cast %116 : vector<8xf32> to vector<1x8xf32>
    %118 = vector.broadcast %117 : vector<1x8xf32> to vector<256x8xf32>
    %119 = arith.addf %114, %118 : vector<256x8xf32>
    %c0_43 = arith.constant 0 : index
    %c0_44 = arith.constant 0 : index
    %120 = vector.load %arg10[%c0_43, %c0_44] : memref<4x8xbf16, #tpu.memory_space<vmem>>, vector<4x8xbf16>
    %cst_45 = arith.constant dense<0.000000e+00> : vector<256x8xf32>
    %121 = tpu.matmul %101, %120, %cst_45 {dimension_numbers = #tpu.dot_dimension_numbers<[1], [0], [0], [1], [0, 0, 1, 1], [], []>} : vector<256x4xbf16>, vector<4x8xbf16>, vector<256x8xf32> -> vector<256x8xf32>
    %122 = arith.addf %119, %121 : vector<256x8xf32>
    %123 = vector.shape_cast %122 : vector<256x8xf32> to vector<16x16x8xf32>
    %124 = arith.truncf %123 : vector<16x16x8xf32> to vector<16x16x8xbf16>
    %c0_46 = arith.constant 0 : index
    %c0_47 = arith.constant 0 : index
    %c0_48 = arith.constant 0 : index
    %c0_49 = arith.constant 0 : index
    %125 = vector.load %arg11[%c0_46, %c0_47, %c0_48, %c0_49] : memref<1x16x16x8xbf16, #tpu.memory_space<vmem>>, vector<1x16x16x8xbf16>
    %126 = vector.shape_cast %125 : vector<1x16x16x8xbf16> to vector<16x16x8xbf16>
    %127 = vector.shape_cast %124 : vector<16x16x8xbf16> to vector<1x16x16x8xbf16>
    tpu.vector_store %arg11[%c0_46, %c0_47, %c0_48, %c0_49], %127 {strides = array<i32>} : memref<1x16x16x8xbf16, #tpu.memory_space<vmem>>, vector<1x16x16x8xbf16>,
    return
  }
  func.func @transform_0(%arg0: i32, %arg1: i32) -> (i32, i32, i32, i32) {
    %c0_i32 = arith.constant 0 : i32
    %c0_i32_0 = arith.constant 0 : i32
    %c0_i32_1 = arith.constant 0 : i32
    %c0_i32_2 = arith.constant 0 : i32
    return %arg0, %c0_i32, %c0_i32_0, %c0_i32_1 : i32, i32, i32, i32
  }
  func.func @transform_1(%arg0: i32, %arg1: i32) -> (i32, i32) {
    %c0_i32 = arith.constant 0 : i32
    %c0_i32_0 = arith.constant 0 : i32
    %c0_i32_1 = arith.constant 0 : i32
    return %c0_i32, %c0_i32_0 : i32, i32
  }
  func.func @transform_2(%arg0: i32, %arg1: i32) -> (i32, i32) {
    %c0_i32 = arith.constant 0 : i32
    %c0_i32_0 = arith.constant 0 : i32
    %c0_i32_1 = arith.constant 0 : i32
    return %c0_i32, %c0_i32_0 : i32, i32
  }
  func.func @transform_3(%arg0: i32, %arg1: i32) -> (i32, i32, i32) {
    %c0_i32 = arith.constant 0 : i32
    %c0_i32_0 = arith.constant 0 : i32
    %c0_i32_1 = arith.constant 0 : i32
    %c0_i32_2 = arith.constant 0 : i32
    return %c0_i32, %c0_i32_0, %c0_i32_1 : i32, i32, i32
  }
  func.func @transform_4(%arg0: i32, %arg1: i32) -> (i32, i32) {
    %c0_i32 = arith.constant 0 : i32
    %c0_i32_0 = arith.constant 0 : i32
    %c0_i32_1 = arith.constant 0 : i32
    return %c0_i32, %c0_i32_0 : i32, i32
  }
  func.func @transform_5(%arg0: i32, %arg1: i32) -> (i32, i32) {
    %c0_i32 = arith.constant 0 : i32
    %c0_i32_0 = arith.constant 0 : i32
    %c0_i32_1 = arith.constant 0 : i32
    return %c0_i32, %c0_i32_0 : i32, i32
  }
  func.func @transform_6(%arg0: i32, %arg1: i32) -> (i32, i32, i32) {
    %c0_i32 = arith.constant 0 : i32
    %c0_i32_0 = arith.constant 0 : i32
    %c0_i32_1 = arith.constant 0 : i32
    %c0_i32_2 = arith.constant 0 : i32
    return %c0_i32, %c0_i32_0, %c0_i32_1 : i32, i32, i32
  }
  func.func @transform_7(%arg0: i32, %arg1: i32) -> (i32, i32) {
    %c0_i32 = arith.constant 0 : i32
    %c0_i32_0 = arith.constant 0 : i32
    %c0_i32_1 = arith.constant 0 : i32
    return %c0_i32, %c0_i32_0 : i32, i32
  }
  func.func @transform_8(%arg0: i32, %arg1: i32) -> (i32, i32) {
    %c0_i32 = arith.constant 0 : i32
    %c0_i32_0 = arith.constant 0 : i32
    %c0_i32_1 = arith.constant 0 : i32
    return %c0_i32, %c0_i32_0 : i32, i32
  }
  func.func @transform_9(%arg0: i32, %arg1: i32) -> (i32, i32, i32, i32) {
    %c0_i32 = arith.constant 0 : i32
    %c0_i32_0 = arith.constant 0 : i32
    %c0_i32_1 = arith.constant 0 : i32
    return %arg0, %arg1, %c0_i32, %c0_i32_0 : i32, i32, i32, i32
  }
}

module attributes {stable_mosaic.version = 11 : i64} {
  func.func @kernel(%arg0: i32, %arg1: i32, %arg2: memref<1x20x16x4xbf16, #tpu.memory_space<vmem>>, %arg3: memref<1x4xf32, #tpu.memory_space<vmem>>, %arg4: memref<1x4xf32, #tpu.memory_space<vmem>>, %arg5: memref<3x12x8xbf16, #tpu.memory_space<vmem>>, %arg6: memref<1x8xf32, #tpu.memory_space<vmem>>, %arg7: memref<1x8xf32, #tpu.memory_space<vmem>>, %arg8: memref<3x24x8xbf16, #tpu.memory_space<vmem>>, %arg9: memref<1x8xf32, #tpu.memory_space<vmem>>, %arg10: memref<4x8xbf16, #tpu.memory_space<vmem>>, %arg11: memref<1x16x16x8xbf16, #tpu.memory_space<vmem>>) attributes {dimension_semantics = [#tpu.dimension_semantics<parallel>, #tpu.dimension_semantics<parallel>], iteration_bounds = array<i64: 2, 1>, scalar_prefetch = 0 : i64, scratch_operands = 0 : i64, tpu.core_type = #tpu.core_type<tc>, window_params = [{transform_indices = @transform_0, window_bounds = array<i64: 1, 20, 16, 4>}, {pipeline_mode = #tpu.pipeline_mode<synchronous>, transform_indices = @transform_1, window_bounds = array<i64: 1, 4>}, {pipeline_mode = #tpu.pipeline_mode<synchronous>, transform_indices = @transform_2, window_bounds = array<i64: 1, 4>}, {pipeline_mode = #tpu.pipeline_mode<synchronous>, transform_indices = @transform_3, window_bounds = array<i64: 3, 12, 8>}, {pipeline_mode = #tpu.pipeline_mode<synchronous>, transform_indices = @transform_4, window_bounds = array<i64: 1, 8>}, {pipeline_mode = #tpu.pipeline_mode<synchronous>, transform_indices = @transform_5, window_bounds = array<i64: 1, 8>}, {pipeline_mode = #tpu.pipeline_mode<synchronous>, transform_indices = @transform_6, window_bounds = array<i64: 3, 24, 8>}, {pipeline_mode = #tpu.pipeline_mode<synchronous>, transform_indices = @transform_7, window_bounds = array<i64: 1, 8>}, {pipeline_mode = #tpu.pipeline_mode<synchronous>, transform_indices = @transform_8, window_bounds = array<i64: 4, 8>}, {transform_indices = @transform_9, window_bounds = array<i64: 1, 16, 16, 8>}]} {
    %c16_i32 = arith.constant 16 : i32
    %0 = arith.muli %arg1, %c16_i32 : i32
    %1 = tpu.assume_multiple %0, 16 : i32
    %c0 = arith.constant 0 : index
    %2 = arith.index_cast %1 : i32 to index
    %c0_0 = arith.constant 0 : index
    %c0_1 = arith.constant 0 : index
    %3 = vector.load %arg2[%c0, %2, %c0_0, %c0_1] : memref<1x20x16x4xbf16, #tpu.memory_space<vmem>>, vector<1x20x16x4xbf16>
    %4 = vector.shape_cast %3 : vector<1x20x16x4xbf16> to vector<20x16x4xbf16>
    %5 = arith.extf %4 : vector<20x16x4xbf16> to vector<20x16x4xf32>
    %6 = vector.shape_cast %5 : vector<20x16x4xf32> to vector<320x4xf32>
    %c0_2 = arith.constant 0 : index
    %c0_3 = arith.constant 0 : index
    %7 = vector.load %arg3[%c0_2, %c0_3] : memref<1x4xf32, #tpu.memory_space<vmem>>, vector<1x4xf32>
    %8 = vector.shape_cast %7 : vector<1x4xf32> to vector<4xf32>
    %9 = vector.shape_cast %8 : vector<4xf32> to vector<1x4xf32>
    %10 = vector.broadcast %9 : vector<1x4xf32> to vector<320x4xf32>
    %11 = arith.mulf %6, %10 : vector<320x4xf32>
    %c0_4 = arith.constant 0 : index
    %c0_5 = arith.constant 0 : index
    %12 = vector.load %arg4[%c0_4, %c0_5] : memref<1x4xf32, #tpu.memory_space<vmem>>, vector<1x4xf32>
    %13 = vector.shape_cast %12 : vector<1x4xf32> to vector<4xf32>
    %14 = vector.shape_cast %13 : vector<4xf32> to vector<1x4xf32>
    %15 = vector.broadcast %14 : vector<1x4xf32> to vector<320x4xf32>
    %16 = arith.addf %11, %15 : vector<320x4xf32>
    %cst = arith.constant 0.000000e+00 : f32
    %17 = vector.broadcast %cst : f32 to vector<320x4xf32>
    %18 = arith.maximumf %16, %17 : vector<320x4xf32>
    %19 = tpu.iota {dimensions = array<i32: 0>} : vector<320x1xi32>
    %c2_i32 = arith.constant 2 : i32
    %20 = arith.subi %c2_i32, %1 : i32
    %c16_i32_6 = arith.constant 16 : i32
    %21 = arith.muli %20, %c16_i32_6 : i32
    %22 = vector.broadcast %21 : i32 to vector<320x1xi32>
    %23 = arith.cmpi sge, %19, %22 : vector<320x1xi32>
    %c18_i32 = arith.constant 18 : i32
    %24 = arith.subi %c18_i32, %1 : i32
    %c16_i32_7 = arith.constant 16 : i32
    %25 = arith.muli %24, %c16_i32_7 : i32
    %26 = vector.broadcast %25 : i32 to vector<320x1xi32>
    %27 = arith.cmpi slt, %19, %26 : vector<320x1xi32>
    %28 = arith.andi %23, %27 : vector<320x1xi1>
    %29 = arith.extui %28 : vector<320x1xi1> to vector<320x1xi32>
    %30 = arith.sitofp %29 : vector<320x1xi32> to vector<320x1xf32>
    %31 = vector.broadcast %30 : vector<320x1xf32> to vector<320x4xf32>
    %32 = arith.mulf %18, %31 : vector<320x4xf32>
    %33 = arith.truncf %32 : vector<320x4xf32> to vector<320x4xbf16>
    %34 = vector.shape_cast %33 : vector<320x4xbf16> to vector<20x16x4xbf16>
    %cst_8 = arith.constant 0.000000e+00 : bf16
    %35 = vector.broadcast %cst_8 : bf16 to vector<20x1x4xbf16>
    %36 = vector.extract_strided_slice %34 {offsets = [0, 0, 0], sizes = [20, 15, 4], strides = [1, 1, 1]} : vector<20x16x4xbf16> to vector<20x15x4xbf16>
    %37 = tpu.concatenate %35, %36 in 1 : vector<20x1x4xbf16>, vector<20x15x4xbf16> -> vector<20x16x4xbf16>
    %38 = vector.extract_strided_slice %34 {offsets = [0, 1, 0], sizes = [20, 15, 4], strides = [1, 1, 1]} : vector<20x16x4xbf16> to vector<20x15x4xbf16>
    %39 = tpu.concatenate %38, %35 in 1 : vector<20x15x4xbf16>, vector<20x1x4xbf16> -> vector<20x16x4xbf16>
    %40 = tpu.concatenate %37, %34, %39 in 2 : vector<20x16x4xbf16>, vector<20x16x4xbf16>, vector<20x16x4xbf16> -> vector<20x16x12xbf16>
    %41 = vector.extract_strided_slice %40 {offsets = [0, 0, 0], sizes = [18, 16, 12], strides = [1, 1, 1]} : vector<20x16x12xbf16> to vector<18x16x12xbf16>
    %42 = vector.shape_cast %41 : vector<18x16x12xbf16> to vector<288x12xbf16>
    %43 = vector.extract_strided_slice %40 {offsets = [1, 0, 0], sizes = [18, 16, 12], strides = [1, 1, 1]} : vector<20x16x12xbf16> to vector<18x16x12xbf16>
    %44 = vector.shape_cast %43 : vector<18x16x12xbf16> to vector<288x12xbf16>
    %45 = vector.extract_strided_slice %40 {offsets = [2, 0, 0], sizes = [18, 16, 12], strides = [1, 1, 1]} : vector<20x16x12xbf16> to vector<18x16x12xbf16>
    %46 = vector.shape_cast %45 : vector<18x16x12xbf16> to vector<288x12xbf16>
    %47 = tpu.iota {dimensions = array<i32: 0>} : vector<288x1xi32>
    %c1_i32 = arith.constant 1 : i32
    %48 = arith.subi %c1_i32, %1 : i32
    %c16_i32_9 = arith.constant 16 : i32
    %49 = arith.muli %48, %c16_i32_9 : i32
    %50 = vector.broadcast %49 : i32 to vector<288x1xi32>
    %51 = arith.cmpi sge, %47, %50 : vector<288x1xi32>
    %c17_i32 = arith.constant 17 : i32
    %52 = arith.subi %c17_i32, %1 : i32
    %c16_i32_10 = arith.constant 16 : i32
    %53 = arith.muli %52, %c16_i32_10 : i32
    %54 = vector.broadcast %53 : i32 to vector<288x1xi32>
    %55 = arith.cmpi slt, %47, %54 : vector<288x1xi32>
    %56 = arith.andi %51, %55 : vector<288x1xi1>
    %57 = arith.extui %56 : vector<288x1xi1> to vector<288x1xi32>
    %58 = arith.sitofp %57 : vector<288x1xi32> to vector<288x1xf32>
    %cst_11 = arith.constant 0.000000e+00 : f32
    %59 = vector.broadcast %cst_11 : f32 to vector<288x8xf32>
    %c0_12 = arith.constant 0 : index
    %c0_13 = arith.constant 0 : index
    %c0_14 = arith.constant 0 : index
    %60 = vector.load %arg5[%c0_12, %c0_13, %c0_14] : memref<3x12x8xbf16, #tpu.memory_space<vmem>>, vector<1x12x8xbf16>
    %61 = vector.shape_cast %60 : vector<1x12x8xbf16> to vector<12x8xbf16>
    %cst_15 = arith.constant dense<0.000000e+00> : vector<288x8xf32>
    %62 = tpu.matmul %42, %61, %cst_15 {dimension_numbers = #tpu.dot_dimension_numbers<[1], [0], [0], [1], [0, 0, 1, 1], [], []>} : vector<288x12xbf16>, vector<12x8xbf16>, vector<288x8xf32> -> vector<288x8xf32>
    %63 = arith.addf %59, %62 : vector<288x8xf32>
    %c1 = arith.constant 1 : index
    %c0_16 = arith.constant 0 : index
    %c0_17 = arith.constant 0 : index
    %64 = vector.load %arg5[%c1, %c0_16, %c0_17] : memref<3x12x8xbf16, #tpu.memory_space<vmem>>, vector<1x12x8xbf16>
    %65 = vector.shape_cast %64 : vector<1x12x8xbf16> to vector<12x8xbf16>
    %cst_18 = arith.constant dense<0.000000e+00> : vector<288x8xf32>
    %66 = tpu.matmul %44, %65, %cst_18 {dimension_numbers = #tpu.dot_dimension_numbers<[1], [0], [0], [1], [0, 0, 1, 1], [], []>} : vector<288x12xbf16>, vector<12x8xbf16>, vector<288x8xf32> -> vector<288x8xf32>
    %67 = arith.addf %63, %66 : vector<288x8xf32>
    %c2 = arith.constant 2 : index
    %c0_19 = arith.constant 0 : index
    %c0_20 = arith.constant 0 : index
    %68 = vector.load %arg5[%c2, %c0_19, %c0_20] : memref<3x12x8xbf16, #tpu.memory_space<vmem>>, vector<1x12x8xbf16>
    %69 = vector.shape_cast %68 : vector<1x12x8xbf16> to vector<12x8xbf16>
    %cst_21 = arith.constant dense<0.000000e+00> : vector<288x8xf32>
    %70 = tpu.matmul %46, %69, %cst_21 {dimension_numbers = #tpu.dot_dimension_numbers<[1], [0], [0], [1], [0, 0, 1, 1], [], []>} : vector<288x12xbf16>, vector<12x8xbf16>, vector<288x8xf32> -> vector<288x8xf32>
    %71 = arith.addf %67, %70 : vector<288x8xf32>
    %c0_22 = arith.constant 0 : index
    %c0_23 = arith.constant 0 : index
    %72 = vector.load %arg6[%c0_22, %c0_23] : memref<1x8xf32, #tpu.memory_space<vmem>>, vector<1x8xf32>
    %73 = vector.shape_cast %72 : vector<1x8xf32> to vector<8xf32>
    %74 = vector.shape_cast %73 : vector<8xf32> to vector<1x8xf32>
    %75 = vector.broadcast %74 : vector<1x8xf32> to vector<288x8xf32>
    %76 = arith.mulf %71, %75 : vector<288x8xf32>
    %c0_24 = arith.constant 0 : index
    %c0_25 = arith.constant 0 : index
    %77 = vector.load %arg7[%c0_24, %c0_25] : memref<1x8xf32, #tpu.memory_space<vmem>>, vector<1x8xf32>
    %78 = vector.shape_cast %77 : vector<1x8xf32> to vector<8xf32>
    %79 = vector.shape_cast %78 : vector<8xf32> to vector<1x8xf32>
    %80 = vector.broadcast %79 : vector<1x8xf32> to vector<288x8xf32>
    %81 = arith.addf %76, %80 : vector<288x8xf32>
    %cst_26 = arith.constant 0.000000e+00 : f32
    %82 = vector.broadcast %cst_26 : f32 to vector<288x8xf32>
    %83 = arith.maximumf %81, %82 : vector<288x8xf32>
    %84 = vector.broadcast %58 : vector<288x1xf32> to vector<288x8xf32>
    %85 = arith.mulf %83, %84 : vector<288x8xf32>
    %86 = arith.truncf %85 : vector<288x8xf32> to vector<288x8xbf16>
    %87 = vector.shape_cast %86 : vector<288x8xbf16> to vector<18x16x8xbf16>
    %cst_27 = arith.constant 0.000000e+00 : bf16
    %88 = vector.broadcast %cst_27 : bf16 to vector<18x1x8xbf16>
    %89 = vector.extract_strided_slice %87 {offsets = [0, 0, 0], sizes = [18, 15, 8], strides = [1, 1, 1]} : vector<18x16x8xbf16> to vector<18x15x8xbf16>
    %90 = tpu.concatenate %88, %89 in 1 : vector<18x1x8xbf16>, vector<18x15x8xbf16> -> vector<18x16x8xbf16>
    %91 = vector.extract_strided_slice %87 {offsets = [0, 1, 0], sizes = [18, 15, 8], strides = [1, 1, 1]} : vector<18x16x8xbf16> to vector<18x15x8xbf16>
    %92 = tpu.concatenate %91, %88 in 1 : vector<18x15x8xbf16>, vector<18x1x8xbf16> -> vector<18x16x8xbf16>
    %93 = tpu.concatenate %90, %87, %92 in 2 : vector<18x16x8xbf16>, vector<18x16x8xbf16>, vector<18x16x8xbf16> -> vector<18x16x24xbf16>
    %94 = vector.extract_strided_slice %93 {offsets = [0, 0, 0], sizes = [16, 16, 24], strides = [1, 1, 1]} : vector<18x16x24xbf16> to vector<16x16x24xbf16>
    %95 = vector.shape_cast %94 : vector<16x16x24xbf16> to vector<256x24xbf16>
    %96 = vector.extract_strided_slice %93 {offsets = [1, 0, 0], sizes = [16, 16, 24], strides = [1, 1, 1]} : vector<18x16x24xbf16> to vector<16x16x24xbf16>
    %97 = vector.shape_cast %96 : vector<16x16x24xbf16> to vector<256x24xbf16>
    %98 = vector.extract_strided_slice %93 {offsets = [2, 0, 0], sizes = [16, 16, 24], strides = [1, 1, 1]} : vector<18x16x24xbf16> to vector<16x16x24xbf16>
    %99 = vector.shape_cast %98 : vector<16x16x24xbf16> to vector<256x24xbf16>
    %100 = vector.extract_strided_slice %4 {offsets = [2, 0, 0], sizes = [16, 16, 4], strides = [1, 1, 1]} : vector<20x16x4xbf16> to vector<16x16x4xbf16>
    %101 = vector.shape_cast %100 : vector<16x16x4xbf16> to vector<256x4xbf16>
    %cst_28 = arith.constant 0.000000e+00 : f32
    %102 = vector.broadcast %cst_28 : f32 to vector<256x8xf32>
    %c0_29 = arith.constant 0 : index
    %c0_30 = arith.constant 0 : index
    %c0_31 = arith.constant 0 : index
    %103 = vector.load %arg8[%c0_29, %c0_30, %c0_31] : memref<3x24x8xbf16, #tpu.memory_space<vmem>>, vector<1x24x8xbf16>
    %104 = vector.shape_cast %103 : vector<1x24x8xbf16> to vector<24x8xbf16>
    %cst_32 = arith.constant dense<0.000000e+00> : vector<256x8xf32>
    %105 = tpu.matmul %95, %104, %cst_32 {dimension_numbers = #tpu.dot_dimension_numbers<[1], [0], [0], [1], [0, 0, 1, 1], [], []>} : vector<256x24xbf16>, vector<24x8xbf16>, vector<256x8xf32> -> vector<256x8xf32>
    %106 = arith.addf %102, %105 : vector<256x8xf32>
    %c1_33 = arith.constant 1 : index
    %c0_34 = arith.constant 0 : index
    %c0_35 = arith.constant 0 : index
    %107 = vector.load %arg8[%c1_33, %c0_34, %c0_35] : memref<3x24x8xbf16, #tpu.memory_space<vmem>>, vector<1x24x8xbf16>
    %108 = vector.shape_cast %107 : vector<1x24x8xbf16> to vector<24x8xbf16>
    %cst_36 = arith.constant dense<0.000000e+00> : vector<256x8xf32>
    %109 = tpu.matmul %97, %108, %cst_36 {dimension_numbers = #tpu.dot_dimension_numbers<[1], [0], [0], [1], [0, 0, 1, 1], [], []>} : vector<256x24xbf16>, vector<24x8xbf16>, vector<256x8xf32> -> vector<256x8xf32>
    %110 = arith.addf %106, %109 : vector<256x8xf32>
    %c2_37 = arith.constant 2 : index
    %c0_38 = arith.constant 0 : index
    %c0_39 = arith.constant 0 : index
    %111 = vector.load %arg8[%c2_37, %c0_38, %c0_39] : memref<3x24x8xbf16, #tpu.memory_space<vmem>>, vector<1x24x8xbf16>
    %112 = vector.shape_cast %111 : vector<1x24x8xbf16> to vector<24x8xbf16>
    %cst_40 = arith.constant dense<0.000000e+00> : vector<256x8xf32>
    %113 = tpu.matmul %99, %112, %cst_40 {dimension_numbers = #tpu.dot_dimension_numbers<[1], [0], [0], [1], [0, 0, 1, 1], [], []>} : vector<256x24xbf16>, vector<24x8xbf16>, vector<256x8xf32> -> vector<256x8xf32>
    %114 = arith.addf %110, %113 : vector<256x8xf32>
    %c0_41 = arith.constant 0 : index
    %c0_42 = arith.constant 0 : index
    %115 = vector.load %arg9[%c0_41, %c0_42] : memref<1x8xf32, #tpu.memory_space<vmem>>, vector<1x8xf32>
    %116 = vector.shape_cast %115 : vector<1x8xf32> to vector<8xf32>
    %117 = vector.shape_cast %116 : vector<8xf32> to vector<1x8xf32>
    %118 = vector.broadcast %117 : vector<1x8xf32> to vector<256x8xf32>
    %119 = arith.addf %114, %118 : vector<256x8xf32>
    %c0_43 = arith.constant 0 : index
    %c0_44 = arith.constant 0 : index
    %120 = vector.load %arg10[%c0_43, %c0_44] : memref<4x8xbf16, #tpu.memory_space<vmem>>, vector<4x8xbf16>
    %cst_45 = arith.constant dense<0.000000e+00> : vector<256x8xf32>
    %121 = tpu.matmul %101, %120, %cst_45 {dimension_numbers = #tpu.dot_dimension_numbers<[1], [0], [0], [1], [0, 0, 1, 1], [], []>} : vector<256x4xbf16>, vector<4x8xbf16>, vector<256x8xf32> -> vector<256x8xf32>
    %122 = arith.addf %119, %121 : vector<256x8xf32>
    %123 = vector.shape_cast %122 : vector<256x8xf32> to vector<16x16x8xf32>
    %124 = arith.truncf %123 : vector<16x16x8xf32> to vector<16x16x8xbf16>
    %c0_46 = arith.constant 0 : index
    %c0_47 = arith.constant 0 : index
    %c0_48 = arith.constant 0 : index
    %c0_49 = arith.constant 0 : index
    %125 = vector.load %arg11[%c0_46, %c0_47, %c0_48, %c0_49] : memref<1x16x16x8xbf16, #tpu.memory_space<vmem>>, vector<1x16x16x8xbf16>
    %126 = vector.shape_cast %125 : vector<1x16x16x8xbf16> to vector<16x16x8xbf16>
    %127 = vector.shape_cast %124 : vector<16x16x8xbf16> to vector<1x16x16x8xbf16>
    tpu.vector_store %arg11[%c0_46, %c0_47, %c0_48, %c0_49], %127 {strides = array<i32>} : memref<1x16x16x8xbf16, #tpu.memory_space<vmem>>, vector<1x16x16x8xbf16>,
    return
  }
  func.func @transform_0(%arg0: i32, %arg1: i32) -> (i32, i32, i32, i32) {
    %c0_i32 = arith.constant 0 : i32
    %c0_i32_0 = arith.constant 0 : i32
    %c0_i32_1 = arith.constant 0 : i32
    %c0_i32_2 = arith.constant 0 : i32
    return %arg0, %c0_i32, %c0_i32_0, %c0_i32_1 : i32, i32, i32, i32
  }
  func.func @transform_1(%arg0: i32, %arg1: i32) -> (i32, i32) {
    %c0_i32 = arith.constant 0 : i32
    %c0_i32_0 = arith.constant 0 : i32
    %c0_i32_1 = arith.constant 0 : i32
    return %c0_i32, %c0_i32_0 : i32, i32
  }
  func.func @transform_2(%arg0: i32, %arg1: i32) -> (i32, i32) {
    %c0_i32 = arith.constant 0 : i32
    %c0_i32_0 = arith.constant 0 : i32
    %c0_i32_1 = arith.constant 0 : i32
    return %c0_i32, %c0_i32_0 : i32, i32
  }
  func.func @transform_3(%arg0: i32, %arg1: i32) -> (i32, i32, i32) {
    %c0_i32 = arith.constant 0 : i32
    %c0_i32_0 = arith.constant 0 : i32
    %c0_i32_1 = arith.constant 0 : i32
    %c0_i32_2 = arith.constant 0 : i32
    return %c0_i32, %c0_i32_0, %c0_i32_1 : i32, i32, i32
  }
  func.func @transform_4(%arg0: i32, %arg1: i32) -> (i32, i32) {
    %c0_i32 = arith.constant 0 : i32
    %c0_i32_0 = arith.constant 0 : i32
    %c0_i32_1 = arith.constant 0 : i32
    return %c0_i32, %c0_i32_0 : i32, i32
  }
  func.func @transform_5(%arg0: i32, %arg1: i32) -> (i32, i32) {
    %c0_i32 = arith.constant 0 : i32
    %c0_i32_0 = arith.constant 0 : i32
    %c0_i32_1 = arith.constant 0 : i32
    return %c0_i32, %c0_i32_0 : i32, i32
  }
  func.func @transform_6(%arg0: i32, %arg1: i32) -> (i32, i32, i32) {
    %c0_i32 = arith.constant 0 : i32
    %c0_i32_0 = arith.constant 0 : i32
    %c0_i32_1 = arith.constant 0 : i32
    %c0_i32_2 = arith.constant 0 : i32
    return %c0_i32, %c0_i32_0, %c0_i32_1 : i32, i32, i32
  }
  func.func @transform_7(%arg0: i32, %arg1: i32) -> (i32, i32) {
    %c0_i32 = arith.constant 0 : i32
    %c0_i32_0 = arith.constant 0 : i32
    %c0_i32_1 = arith.constant 0 : i32
    return %c0_i32, %c0_i32_0 : i32, i32
  }
  func.func @transform_8(%arg0: i32, %arg1: i32) -> (i32, i32) {
    %c0_i32 = arith.constant 0 : i32
    %c0_i32_0 = arith.constant 0 : i32
    %c0_i32_1 = arith.constant 0 : i32
    return %c0_i32, %c0_i32_0 : i32, i32
  }
  func.func @transform_9(%arg0: i32, %arg1: i32) -> (i32, i32, i32, i32) {
    %c0_i32 = arith.constant 0 : i32
    %c0_i32_0 = arith.constant 0 : i32
    %c0_i32_1 = arith.constant 0 : i32
    return %arg0, %arg1, %c0_i32, %c0_i32_0 : i32, i32, i32, i32
  }
}

</mosaic_0001>

<bundles_post_ra>
// kernel: tpu_custom_call.1
= control target key start
LH: loop header
LB: loop body
LE: loop exit
PB: predicated region body
PF: predicated region fallthrough
CT: control target
= control target key end

     0   :  { %s3966_s30 = smov 0   ;;  %s3968_s10 = smov 0   ;;  %s5522_s0 = inlined_call_operand.vmem [shape: bf16[2,20,16,4], index: 0, kind: input, shape index: {}]   ;;  %s5523_s1 = inlined_call_operand.vmem [shape: f32[1,4], index: 1, kind: input, shape index: {}]   ;;  %s5524_s2 = inlined_call_operand.vmem [shape: f32[1,4], index: 2, kind: input, shape index: {}]   ;;  %s5525_s3 = inlined_call_operand.vmem [shape: bf16[3,12,8], index: 3, kind: input, shape index: {}]   ;;  %s5526_s4 = inlined_call_operand.vmem [shape: f32[1,8], index: 4, kind: input, shape index: {}]   ;;  %s5527_s5 = inlined_call_operand.vmem [shape: f32[1,8], index: 5, kind: input, shape index: {}]   ;;  %s5528_s6 = inlined_call_operand.vmem [shape: bf16[3,24,8], index: 6, kind: input, shape index: {}]   ;;  %s5529_s7 = inlined_call_operand.vmem [shape: f32[1,8], index: 7, kind: input, shape index: {}]   ;;  %s5530_s8 = inlined_call_operand.vmem [shape: bf16[4,8], index: 8, kind: input, shape index: {}]   ;;  %s5531_s9 = inlined_call_operand.vmem [shape: bf16[2,16,16,8], index: 9, kind: output, shape index: {}]  }
   0x1   :  { %s3970_s11 = smov 0  }
   0x2 LB: > { %s31_s12 = sadd.s32 1, %s3907_s10  ;;  %p3584_p0 = scmp.ge.s32.totalorder %s3911_s11, 1  ;;  %s3911_s11 = sphi %s3970_s11, %s19_s11   ;;  %s3907_s10 = sphi %s3968_s10, %s5543_s10   ;;  %s3903_s30 = sphi %s3966_s30, %s5542_s30  }
   0x3   : > { %p33_p1 = scmp.ge.s32.totalorder %s31_s12, 2  ;;  %p301_p2 = scmp.lt.s32.totalorder %s3911_s11, 3 }
   0x5   : > { %s5545_s12 = smov (%p33_p1, %s31_s12), 0  ;;  %p302_p3 = pnand %p3584_p0, %p301_p2 }
   0x7   : > { %305 = sbr.rel (%p302_p3) target bundleno = 1257 (0x4e9), region = 56 }
   0xc   : > { %p342_p4 = scmp.lt.s32.totalorder %s3903_s30, 1  ;;  %v3995_v0 = vld [vmem:[%s5523_s1] ss:$0 sm:$0xff]  ;;  %vm1241_vm0 = vcmask 1047552   ;;  %vm1242_vm1 = vsmask.f32 7424 }
   0xd   : > { %v4003_v6 = vld [vmem:[%s5524_s2] ss:$0 sm:$0xff]  ;;  %s3913_s21 = smov 4   ;;  %vm4047_vm2 = vmand %vm1241_vm0, %vm1242_vm1  ;;  %s3914_s22 = smov 8   ;;  %vm1699_vm3 = vcmask 1045504   ;;  %vm1158_vm4 = vcmask 1040384  }
   0xe   : > { %s5547_s30 = smov (!%p342_p4, %s3903_s30), 1  ;;  %vm1159_vm5 = vsmask.f32 256  ;;  %vm1364_vm7 = vcmask 31744   ;;  %vm1425_vm8 = vcmask 64512   ;;  %vm1662_vm9 = vcmask 97280  }
   0xf   : > { %s3852_s13 = smul.u32 160, %s5547_s30  ;;  %vm4279_vm6 = vmand %vm1158_vm4, %vm1159_vm5  ;;  %s3915_s25 = smov 16   ;;  %vm2801_vm10 = vcmask 1043456   ;;  %vm2715_vm11 = vcmask 130048   ;;  %vm2768_vm12 = vcmask 195584   ;;  %vm3301_vm13 = vcmask 1041408  }
  0x10   : > { %s3806_s20 = sshll.u32 %s5547_s30, 7  ;;  %vm3458_vm14 = vcmask 60416  }
  0x11   : > { %s3990_s16 = scalar_lea.vmem %s5522_s0, %s3852_s13  ;;  %s5339_s26 = scalar_lea.vmem %s5531_s9, %s3806_s20 }
  0x12   : > { %v393_v1 = vld [vmem:[%s3990_s16 + $0x78] sm:$0xff]   ;;  %v395_v2 = vld [vmem:[%s3990_s16 + $0x80] sm:$0xff]   ;;  %v3846_v3 = vld [vmem:[%s3990_s16 + $0x90] sm:$0xff]  }
  0x13   : > { %v433_v4 = vunpack.c.l.bf16 %v393_v1  ;;  %v434_v5 = vunpack.c.h.bf16 %v393_v1  ;;  %v435_v7 = vunpack.c.l.bf16 %v395_v2  ;;  %v436_v8 = vunpack.c.h.bf16 %v395_v2  ;;  %v391_v9 = vld [vmem:[%s3990_s16 + $0x70] sm:$0xff]   ;;  %v397_v2 = vld [vmem:[%s3990_s16 + $0x88] sm:$0xff]  }
  0x14   : > { %v3839_v10 = vunpack.c.l.bf16 %v3846_v3  ;;  %v3840_v11 = vunpack.c.h.bf16 %v3846_v3  ;;  %v431_v12 = vunpack.c.l.bf16 %v391_v9  ;;  %v432_v13 = vunpack.c.h.bf16 %v391_v9  ;;  %v367_v46 = vld [vmem:[%s3990_s16 + $0x10] sm:$0xff]  }
  0x15   : > { %v477_v14 = vmul.f32 %v3995_v0, %v433_v4  ;;  %v478_v15 = vmul.f32 %v3995_v0, %v434_v5  ;;  %v479_v16 = vmul.f32 %v3995_v0, %v435_v7  ;;  %v480_v17 = vmul.f32 %v3995_v0, %v436_v8 }
  0x16   : > { %v483_v18 = vmul.f32 %v3995_v0, %v3839_v10  ;;  %v484_v19 = vmul.f32 %v3995_v0, %v3840_v11  ;;  %v475_v20 = vmul.f32 %v3995_v0, %v431_v12  ;;  %v476_v21 = vmul.f32 %v3995_v0, %v432_v13 }
  0x17   : > { %v521_v22 = vadd.f32 %v4003_v6, %v477_v14  ;;  %v522_v23 = vadd.f32 %v4003_v6, %v478_v15  ;;  %v523_v24 = vadd.f32 %v4003_v6, %v479_v16  ;;  %v524_v25 = vadd.f32 %v4003_v6, %v480_v17 }
  0x18   : > { %v527_v26 = vadd.f32 %v4003_v6, %v483_v18  ;;  %v528_v27 = vadd.f32 %v4003_v6, %v484_v19  ;;  %v519_v28 = vadd.f32 %v4003_v6, %v475_v20  ;;  %v520_v29 = vadd.f32 %v4003_v6, %v476_v21  ;;  %v3830_v20 = vld [vmem:[%s3990_s16] sm:$0xff]  }
  0x19   : > { %v561_v30 = vmax.f32 %v521_v22, 0.0  ;;  %v562_v31 = vmax.f32 %v522_v23, 0.0  ;;  %v563_v32 = vmax.f32 %v523_v24, 0.0  ;;  %v564_v33 = vmax.f32 %v524_v25, 0.0  ;;  %v3845_v25 = vld [vmem:[%s3990_s16 + $0x8] sm:$0xff]  }
  0x1a   : > { %v567_v34 = vmax.f32 %v527_v26, 0.0  ;;  %v568_v35 = vmax.f32 %v528_v27, 0.0  ;;  %v559_v36 = vmax.f32 %v519_v28, 0.0  ;;  %v560_v37 = vmax.f32 %v520_v29, 0.0 }
  0x1b   : > { %v888_v38 = vpack.c.bf16 %v561_v30, %v561_v30  ;;  %v889_v39 = vpack.c.bf16 %v562_v31, %v562_v31  ;;  %v890_v40 = vpack.c.bf16 %v563_v32, %v563_v32  ;;  %v891_v41 = vpack.c.bf16 %v564_v33, %v564_v33 }
  0x1c   : > { %v854_v42 = vmul.f32 0.0, %v567_v34  ;;  %v855_v43 = vmul.f32 0.0, %v568_v35  ;;  %v886_v44 = vpack.c.bf16 %v559_v36, %v559_v36  ;;  %v887_v45 = vpack.c.bf16 %v560_v37, %v560_v37 }
  0x1d   : > { %v968_v47 = vunpack.c.l.b16 %v888_v38  ;;  %v969_v48 = vunpack.c.l.b16 %v889_v39  ;;  %v970_v49 = vunpack.c.l.b16 %v890_v40  ;;  %v971_v50 = vunpack.c.l.b16 %v891_v41 }
  0x1e   : > { %v894_v51 = vpack.c.bf16 %v854_v42, %v854_v42  ;;  %v895_v52 = vpack.c.bf16 %v855_v43, %v855_v43  ;;  %v966_v53 = vunpack.c.l.b16 %v886_v44  ;;  %v967_v54 = vunpack.c.l.b16 %v887_v45 }
  0x1f   : > { %v4023_v55 = vpack.c.b16 %v969_v48, %v968_v47  ;;  %v4025_v56 = vpack.c.b16 %v971_v50, %v970_v49  ;;  %v407_v57 = vunpack.c.l.bf16 %v367_v46  ;;  %v408_v60 = vunpack.c.h.bf16 %v367_v46 }
  0x20   : > { %v974_v58 = vunpack.c.l.b16 %v894_v51  ;;  %v975_v59 = vunpack.c.l.b16 %v895_v52  ;;  %v4038_v4 = vpack.c.b16 %v967_v54, %v966_v53  ;;  %v437_v12 = vunpack.c.l.bf16 %v397_v2 }
  0x21   : > { %1294 = vrot.lane.b32.xlu0 %v4023_v55, %s3913_s21  ;;  %1296 = vrot.lane.b32.xlu1 %v4025_v56, %s3913_s21  ;;  %v1104_v61 = vshrl.u32 %v4023_v55, 16  ;;  %v1107_v62 = vshll.u32 %v4023_v55, 16  ;;  %v1111_v63 = vshrl.u32 %v4025_v56, 16  ;;  %v1114_v1 = vshll.u32 %v4025_v56, 16 }
  0x22   : > { %v4036_v3 = vpack.c.b16 %v975_v59, %v974_v58  ;;  %v451_v5 = vmul.f32 %v3995_v0, %v407_v57  ;;  %v452_v15 = vmul.f32 %v3995_v0, %v408_v60  ;;  %v1100_v18 = vshll.u32 %v4038_v4, 16 }
  0x23   : > { %v1211_v7 = vrot.slane %v1107_v62, 1  ;;  %v1213_v8 = vrot.slane %v1114_v1, 1  ;;  %v438_v19 = vunpack.c.h.bf16 %v397_v2  ;;  %v481_v26 = vmul.f32 %v3995_v0, %v437_v12 }
  0x24   : > { %v1125_v10 = vshrl.u32 %v4036_v3, 16  ;;  %v1128_v11 = vshll.u32 %v4036_v3, 16  ;;  %v495_v16 = vadd.f32 %v4003_v6, %v451_v5  ;;  %v496_v23 = vadd.f32 %v4003_v6, %v452_v15 }
  0x25   : > { %v1212_v13 = vor.u32 %v1211_v7, %v1104_v61  ;;  %v1214_v14 = vor.u32 %v1213_v8, %v1111_v63  ;;  %v482_v27 = vmul.f32 %v3995_v0, %v438_v19  ;;  %v3831_v30 = vunpack.c.l.bf16 %v3830_v20 }
  0x26   : > { %v1217_v17 = vrot.slane %v1128_v11, 1  ;;  %v535_v24 = vmax.f32 %v495_v16, 0.0  ;;  %v536_v29 = vmax.f32 %v496_v23, 0.0  ;;  %v3832_v31 = vunpack.c.h.bf16 %v3830_v20  ;;  %v369_v20 = vld [vmem:[%s3990_s16 + $0x18] sm:$0xff]  }
  0x27   : > { %v1259_v21 = vsel %vm4047_vm2, %v1212_v13, 0  ;;  %v1260_v22 = vsel %vm4047_vm2, %v1214_v14, 0  ;;  %v1097_v32 = vshrl.u32 %v4038_v4, 16  ;;  %v525_v33 = vadd.f32 %v4003_v6, %v481_v26 }
  0x28   : > { %v1218_v28 = vor.u32 %v1217_v17, %v1125_v10  ;;  %v526_v34 = vadd.f32 %v4003_v6, %v482_v27  ;;  %v3835_v35 = vunpack.c.l.bf16 %v3845_v25  ;;  %v1209_v36 = vrot.slane %v1100_v18, 1 }
  0x29   : > { %1354 = vrot.lane.b32.xlu0 %v1259_v21, %s3914_s22  ;;  %1356 = vrot.lane.b32.xlu1 %v1260_v22, %s3914_s22  ;;  %v862_v37 = vpack.c.bf16 %v535_v24, %v535_v24  ;;  %v447_v38 = vmul.f32 %v3995_v0, %v3831_v30  ;;  %v448_v39 = vmul.f32 %v3995_v0, %v3832_v31  ;;  %v565_v40 = vmax.f32 %v525_v33, 0.0 }
  0x2a   : > { %v566_v41 = vmax.f32 %v526_v34, 0.0  ;;  %v3836_v42 = vunpack.c.h.bf16 %v3845_v25  ;;  %v449_v43 = vmul.f32 %v3995_v0, %v3835_v35  ;;  %v1262_v44 = vsel %vm4047_vm2, %v1218_v28, 0  ;;  %v371_v25 = vld [vmem:[%s3990_s16 + $0x20] sm:$0xff]  }
  0x2b   : > { %v863_v45 = vpack.c.bf16 %v536_v29, %v536_v29  ;;  %v491_v46 = vadd.f32 %v4003_v6, %v447_v38  ;;  %v492_v47 = vadd.f32 %v4003_v6, %v448_v39  ;;  %v892_v48 = vpack.c.bf16 %v565_v40, %v565_v40 }
  0x2c   : > { %v893_v49 = vpack.c.bf16 %v566_v41, %v566_v41  ;;  %v450_v50 = vmul.f32 %v3995_v0, %v3836_v42  ;;  %v493_v51 = vadd.f32 %v4003_v6, %v449_v43  ;;  %v942_v60 = vunpack.c.l.b16 %v862_v37 }
  0x2d   : > { %v531_v52 = vmax.f32 %v491_v46, 0.0  ;;  %v532_v53 = vmax.f32 %v492_v47, 0.0  ;;  %v972_v54 = vunpack.c.l.b16 %v892_v48  ;;  %v943_v2 = vunpack.c.l.b16 %v863_v45 }
  0x2e   : > { %v973_v57 = vunpack.c.l.b16 %v893_v49  ;;  %v494_v58 = vadd.f32 %v4003_v6, %v450_v50  ;;  %v533_v59 = vmax.f32 %v493_v51, 0.0  ;;  %v1210_v8 = vor.u32 %v1209_v36, %v1097_v32  ;;  %v373_v51 = vld [vmem:[%s3990_s16 + $0x28] sm:$0xff]  }
  0x2f   : > { %v818_v5 = vmul.f32 0.0, %v531_v52  ;;  %v819_v7 = vmul.f32 0.0, %v532_v53  ;;  %v4102_v21 = vpack.c.b16 %v943_v2, %v942_v60  ;;  %v409_v24 = vunpack.c.l.bf16 %v369_v20 }
  0x30   : > { %v4095_v12 = vpack.c.b16 %v973_v57, %v972_v54  ;;  %v534_v13 = vmax.f32 %v494_v58, 0.0  ;;  %v820_v14 = vmul.f32 0.0, %v533_v59  ;;  %v1258_v26 = vsel %vm4047_vm2, %v1210_v8, 0 }
  0x31   : > { %1300 = vrot.lane.b32.xlu0 %v4036_v3, %s3913_s21  ;;  %1360 = vrot.lane.b32.xlu1 %v1262_v44, %s3914_s22  ;;  %v858_v22 = vpack.c.bf16 %v818_v5, %v818_v5  ;;  %v859_v23 = vpack.c.bf16 %v819_v7, %v819_v7  ;;  %v410_v30 = vunpack.c.h.bf16 %v369_v20  ;;  %v453_v31 = vmul.f32 %v3995_v0, %v409_v24 }
  0x32   : > { %1298 = vrot.lane.b32.xlu2 %v4095_v12, %s3913_s21  ;;  %v821_v15 = vmul.f32 0.0, %v534_v13  ;;  %v860_v16 = vpack.c.bf16 %v820_v14, %v820_v14  ;;  %v1118_v17 = vshrl.u32 %v4095_v12, 16  ;;  %v1121_v19 = vshll.u32 %v4095_v12, 16 }
  0x33   : > { %v411_v35 = vunpack.c.l.bf16 %v371_v25  ;;  %v412_v36 = vunpack.c.h.bf16 %v371_v25  ;;  %v938_v37 = vunpack.c.l.b16 %v858_v22  ;;  %v939_v38 = vunpack.c.l.b16 %v859_v23 }
  0x34   : > { %v861_v27 = vpack.c.bf16 %v821_v15, %v821_v15  ;;  %v940_v28 = vunpack.c.l.b16 %v860_v16  ;;  %v1215_v29 = vrot.slane %v1121_v19, 1  ;;  %v454_v39 = vmul.f32 %v3995_v0, %v410_v30 }
  0x35   : > { %v497_v40 = vadd.f32 %v4003_v6, %v453_v31  ;;  %v455_v43 = vmul.f32 %v3995_v0, %v411_v35  ;;  %v456_v44 = vmul.f32 %v3995_v0, %v412_v36  ;;  %v1016_v48 = vshll.u32 %v4102_v21, 16 }
  0x36   : > { %v941_v33 = vunpack.c.l.b16 %v861_v27  ;;  %v1216_v34 = vor.u32 %v1215_v29, %v1118_v17  ;;  %v498_v45 = vadd.f32 %v4003_v6, %v454_v39  ;;  %v4130_v52 = vpack.c.b16 %v939_v38, %v938_v37 }
  0x37   : > { %v537_v46 = vmax.f32 %v497_v40, 0.0  ;;  %v499_v49 = vadd.f32 %v4003_v6, %v455_v43  ;;  %v500_v50 = vadd.f32 %v4003_v6, %v456_v44  ;;  %v413_v57 = vunpack.c.l.bf16 %v373_v51 }
  0x38   : > { %v4117_v41 = vpack.c.b16 %v941_v33, %v940_v28  ;;  %v1261_v42 = vsel %vm4047_vm2, %v1216_v34, 0  ;;  %v538_v53 = vmax.f32 %v498_v45, 0.0  ;;  %v414_v7 = vunpack.c.h.bf16 %v373_v51 }
  0x39   : > { %1352 = vrot.lane.b32.xlu0 %v1258_v26, %s3914_s22  ;;  %1268 = vrot.lane.b32.xlu1 %v4102_v21, %s3913_s21  ;;  %v864_v54 = vpack.c.bf16 %v537_v46, %v537_v46  ;;  %v539_v60 = vmax.f32 %v499_v49, 0.0  ;;  %v540_v2 = vmax.f32 %v500_v50, 0.0  ;;  %v1013_v8 = vshrl.u32 %v4102_v21, 16 }
  0x3a   : > { %1358 = vrot.lane.b32.xlu2 %v1261_v42, %s3914_s22  ;;  %v1009_v47 = vshll.u32 %v4117_v41, 16  ;;  %v1006_v58 = vshrl.u32 %v4117_v41, 16  ;;  %v865_v5 = vpack.c.bf16 %v538_v53, %v538_v53  ;;  %v457_v15 = vmul.f32 %v3995_v0, %v413_v57 }
  0x3b   : > { %v866_v13 = vpack.c.bf16 %v539_v60, %v539_v60  ;;  %v867_v14 = vpack.c.bf16 %v540_v2, %v540_v2  ;;  %v1185_v16 = vrot.slane %v1016_v48, 1  ;;  %v944_v20 = vunpack.c.l.b16 %v864_v54 }
  0x3c   : > { %v1183_v59 = vrot.slane %v1009_v47, 1  ;;  %v945_v22 = vunpack.c.l.b16 %v865_v5  ;;  %v458_v23 = vmul.f32 %v3995_v0, %v414_v7  ;;  %v501_v27 = vadd.f32 %v4003_v6, %v457_v15 }
  0x3d   : > { %v946_v25 = vunpack.c.l.b16 %v866_v13  ;;  %v947_v26 = vunpack.c.l.b16 %v867_v14  ;;  %v1186_v31 = vor.u32 %v1185_v16, %v1013_v8  ;;  %v1002_v33 = vshll.u32 %v4130_v52, 16 }
  0x3e   : > { %v1184_v24 = vor.u32 %v1183_v59, %v1006_v58  ;;  %v502_v28 = vadd.f32 %v4003_v6, %v458_v23  ;;  %v541_v30 = vmax.f32 %v501_v27, 0.0  ;;  %v4155_v34 = vpack.c.b16 %v945_v22, %v944_v20  ;;  %v375_v22 = vld [vmem:[%s3990_s16 + $0x30] sm:$0xff]  }
  0x3f   : > { %v4150_v29 = vpack.c.b16 %v947_v26, %v946_v25  ;;  %v1246_v44 = vsel %vm4047_vm2, %v1186_v31, 0  ;;  %v999_v45 = vshrl.u32 %v4130_v52, 16  ;;  %v1181_v46 = vrot.slane %v1002_v33, 1 }
  0x40   : > { %v542_v35 = vmax.f32 %v502_v28, 0.0  ;;  %v1245_v36 = vsel %vm4047_vm2, %v1184_v24, 0  ;;  %v868_v39 = vpack.c.bf16 %v541_v30, %v541_v30  ;;  %v1023_v54 = vshll.u32 %v4155_v34, 16 }
  0x41   : > { %1264 = vrot.lane.b32.xlu0 %v4130_v52, %s3913_s21  ;;  %1266 = vrot.lane.b32.xlu1 %v4117_v41, %s3913_s21  ;;  %v1027_v37 = vshrl.u32 %v4150_v29, 16  ;;  %v1030_v38 = vshll.u32 %v4150_v29, 16  ;;  %v1182_v53 = vor.u32 %v1181_v46, %v999_v45  ;;  %v1020_v7 = vshrl.u32 %v4155_v34, 16  ;;  %v3824_v46 = vld [vmem:[%s5525_s3 + $0x8] sm:$0x30] }
  0x42   : > { %1292 = vrot.lane.b32.xlu2 %v4038_v4, %s3913_s21  ;;  %v869_v40 = vpack.c.bf16 %v542_v35, %v542_v35  ;;  %v948_v43 = vunpack.c.l.b16 %v868_v39  ;;  %v1187_v13 = vrot.slane %v1023_v54, 1  ;;  %v415_v23 = vunpack.c.l.bf16 %v375_v22 }
  0x43   : > { %v1189_v42 = vrot.slane %v1030_v38, 1  ;;  %v1244_v5 = vsel %vm4047_vm2, %v1182_v53, 0  ;;  %v416_v24 = vunpack.c.h.bf16 %v375_v22  ;;  %v1120_v35 = vrot.slane %v1118_v17, 7 }
  0x44   : > { %v949_v49 = vunpack.c.l.b16 %v869_v40  ;;  %v1188_v15 = vor.u32 %v1187_v13, %v1020_v7  ;;  %v459_v25 = vmul.f32 %v3995_v0, %v415_v23  ;;  %v377_v40 = vld [vmem:[%s3990_s16 + $0x38] sm:$0xff]  }
  0x45   : > { %v1190_v50 = vor.u32 %v1189_v42, %v1027_v37  ;;  %v460_v26 = vmul.f32 %v3995_v0, %v416_v24  ;;  %v417_v17 = vunpack.c.l.bf16 %v377_v40  ;;  %v418_v53 = vunpack.c.h.bf16 %v377_v40 }
  0x46   : > { %v4173_v51 = vpack.c.b16 %v949_v49, %v948_v43  ;;  %v1247_v20 = vsel %vm4047_vm2, %v1188_v15, 0  ;;  %v503_v27 = vadd.f32 %v4003_v6, %v459_v25 }
  0x47   : > { %v1248_v59 = vsel %vm4047_vm2, %v1190_v50, 0  ;;  %v504_v28 = vadd.f32 %v4003_v6, %v460_v26  ;;  %v4222_v50 = vor.u32 %v1121_v19, %v1120_v35  ;;  %v462_v13 = vmul.f32 %v3995_v0, %v418_v53 }
  0x48   : > { %v1037_v57 = vshll.u32 %v4173_v51, 16  ;;  %v1034_v60 = vshrl.u32 %v4173_v51, 16  ;;  %v543_v30 = vmax.f32 %v503_v27, 0.0 }
  0x49   : > { %1326 = vrot.lane.b32.xlu0 %v1245_v36, %s3914_s22  ;;  %1270 = vrot.lane.b32.xlu1 %v4155_v34, %s3913_s21  ;;  %v544_v31 = vmax.f32 %v504_v28, 0.0  ;;  %v506_v12 = vadd.f32 %v4003_v6, %v462_v13 }
  0x4a   : > { %1328 = vrot.lane.b32.xlu2 %v1246_v44, %s3914_s22  ;;  %v1191_v2 = vrot.slane %v1037_v57, 1  ;;  %v870_v36 = vpack.c.bf16 %v543_v30, %v543_v30  ;;  %v3592_v44 = vld [vmem:[%s5525_s3 + $0x8] sm:$0xf] }
  0x4b   : > { %v871_v39 = vpack.c.bf16 %v544_v31, %v544_v31  ;;  %v3593_v49 = vor.u32 %v3824_v46, %v3592_v44  ;;  %v546_v15 = vmax.f32 %v506_v12, 0.0  ;;  %v379_v31 = vld [vmem:[%s3990_s16 + $0x40] sm:$0xff]  }
  0x4c   : > { %v1192_v14 = vor.u32 %v1191_v2, %v1034_v60  ;;  %v950_v42 = vunpack.c.l.b16 %v870_v36  ;;  %v419_v36 = vunpack.c.l.bf16 %v379_v31 }
  0x4d   : > { %v951_v43 = vunpack.c.l.b16 %v871_v39  ;;  %v1701_v2 = vsel %vm1699_vm3, %v3593_v49, 0  ;;  %v873_v23 = vpack.c.bf16 %v546_v15, %v546_v15  ;;  %v420_v39 = vunpack.c.h.bf16 %v379_v31 }
  0x4e   : > { %v1249_v16 = vsel %vm4047_vm2, %v1192_v14, 0  ;;  %3848 = vmatpush.bf16.msra.mxu2 %v1701_v2  ;;  %1710 = vmatpush.bf16.msra.mxu0 %v1701_v2 }
  0x4f   : > { %v953_v26 = vunpack.c.l.b16 %v873_v23  ;;  %v1106_v23 = vrot.slane %v1104_v61, 7 }
  0x51   : > { %1272 = vrot.lane.b32.xlu0 %v4150_v29, %s3913_s21  ;;  %1332 = vrot.lane.b32.xlu1 %v1248_v59, %s3914_s22  ;;  %v4224_v59 = vpack.c.b16 %v951_v43, %v950_v42  ;;  %v463_v42 = vmul.f32 %v3995_v0, %v419_v36  ;;  %v464_v43 = vmul.f32 %v3995_v0, %v420_v39 }
  0x52   : > { %1324 = vrot.lane.b32.xlu2 %v1244_v5, %s3914_s22  ;;  %v461_v5 = vmul.f32 %v3995_v0, %v417_v17  ;;  %v1109_v36 = vor.u32 %v1107_v62, %v1106_v23  ;;  %v381_v62 = vld [vmem:[%s3990_s16 + $0x48] sm:$0xff]  }
  0x53   : > { %v507_v46 = vadd.f32 %v4003_v6, %v463_v42  ;;  %v508_v49 = vadd.f32 %v4003_v6, %v464_v43  ;;  %v1044_v53 = vshll.u32 %v4224_v59, 16  ;;  %v1041_v13 = vshrl.u32 %v4224_v59, 16 }
  0x54   : > { %v505_v14 = vadd.f32 %v4003_v6, %v461_v5 }
  0x55   : > { %v547_v2 = vmax.f32 %v507_v46, 0.0  ;;  %v548_v5 = vmax.f32 %v508_v49, 0.0  ;;  %v421_v46 = vunpack.c.l.bf16 %v381_v62  ;;  %v422_v49 = vunpack.c.h.bf16 %v381_v62  ;;  %v383_v62 = vld [vmem:[%s3990_s16 + $0x50] sm:$0xff]  }
  0x56   : > { %v545_v19 = vmax.f32 %v505_v14, 0.0  ;;  %v1193_v14 = vrot.slane %v1044_v53, 1 }
  0x57   : > { %v874_v12 = vpack.c.bf16 %v547_v2, %v547_v2 }
  0x58   : > { %v872_v22 = vpack.c.bf16 %v545_v19, %v545_v19  ;;  %v875_v19 = vpack.c.bf16 %v548_v5, %v548_v5 }
  0x59   : > { %1334 = vrot.lane.b32.xlu0 %v1249_v16, %s3914_s22  ;;  %1276 = vrot.lane.b32.xlu1 %v4224_v59, %s3913_s21  ;;  %v3614_v16 = vld [vmem:[%s5525_s3] sm:$0xf] }
  0x5a   : > { %1330 = vrot.lane.b32.xlu2 %v1247_v20, %s3914_s22  ;;  %v3823_v20 = vld [vmem:[%s5525_s3] sm:$0x30]  ;;  %v952_v25 = vunpack.c.l.b16 %v872_v22  ;;  %v955_v22 = vunpack.c.l.b16 %v875_v19  ;;  %v466_v19 = vmul.f32 %v3995_v0, %v422_v49  ;;  %v423_v49 = vunpack.c.l.bf16 %v383_v62 }
  0x5b   : > { %v3615_v24 = vor.u32 %v3823_v20, %v3614_v16  ;;  %v1194_v16 = vor.u32 %v1193_v14, %v1041_v13  ;;  %v954_v20 = vunpack.c.l.b16 %v874_v12  ;;  %v465_v12 = vmul.f32 %v3995_v0, %v421_v46 }
  0x5c   : > { %v4240_v28 = vpack.c.b16 %v953_v26, %v952_v25  ;;  %v510_v23 = vadd.f32 %v4003_v6, %v466_v19  ;;  %v467_v19 = vmul.f32 %v3995_v0, %v423_v49 }
  0x5d   : > { %v1810_v27 = vsel %vm1699_vm3, %v3615_v24, 0  ;;  %v1250_v24 = vsel %vm4047_vm2, %v1194_v16, 0  ;;  %v4270_v25 = vpack.c.b16 %v955_v22, %v954_v20  ;;  %v1113_v16 = vrot.slane %v1111_v63, 7 }
  0x5e   : > { %3849 = vmatpush.bf16.msrb.mxu2 %v1810_v27  ;;  %1819 = vmatpush.bf16.msra.mxu1 %v1810_v27  ;;  %v1051_v30 = vshll.u32 %v4240_v28, 16  ;;  %v1048_v35 = vshrl.u32 %v4240_v28, 16  ;;  %v509_v22 = vadd.f32 %v4003_v6, %v465_v12 }
  0x5f   : > { %v1058_v26 = vshll.u32 %v4270_v25, 16  ;;  %v1055_v39 = vshrl.u32 %v4270_v25, 16 }
  0x60   : > { %v1195_v40 = vrot.slane %v1051_v30, 1 }
  0x61   : > { %1278 = vrot.lane.b32.xlu0 %v4240_v28, %s3913_s21  ;;  %v1197_v61 = vrot.slane %v1058_v26, 1 }
  0x62   : > { %1274 = vrot.lane.b32.xlu2 %v4173_v51, %s3913_s21  ;;  %v1196_v44 = vor.u32 %v1195_v40, %v1048_v35  ;;  %v1043_v51 = vrot.slane %v1041_v13, 7 }
  0x63   : > { %v1198_v43 = vor.u32 %v1197_v61, %v1055_v39 }
  0x64   : > { %v1251_v17 = vsel %vm4047_vm2, %v1196_v44, 0  ;;  %v1176_v44 = vsel %vm4279_vm6, 0, %v1109_v36  ;;  %v1116_v36 = vor.u32 %v1114_v1, %v1113_v16  ;;  %v511_v16 = vadd.f32 %v4003_v6, %v467_v19 }
  0x65   : > { %1338 = vrot.lane.b32.xlu1 %v1251_v17, %s3914_s22  ;;  %v1252_v55 = vsel %vm4047_vm2, %v1198_v43, 0 }
  0x69   : > { %1340 = vrot.lane.b32.xlu0 %v1252_v55, %s3914_s22 }
  0x6a   : > { %1336 = vrot.lane.b32.xlu2 %v1250_v24, %s3914_s22  ;;  %v549_v24 = vmax.f32 %v509_v22, 0.0  ;;  %v1001_v22 = vrot.slane %v999_v45, 7 }
  0x6c   : > { %v876_v61 = vpack.c.bf16 %v549_v24, %v549_v24  ;;  %v1004_v45 = vor.u32 %v1002_v33, %v1001_v22 }
  0x6e   : > { %v956_v46 = vunpack.c.l.b16 %v876_v61 }
  0x72   : > { %1280 = vrot.lane.b32.xlu2 %v4270_v25, %s3913_s21 }
  0x8c   : > { %v4262_v15 = vpop.permute.xlu2 %1298 }
  0x93   : > { %v1295_v27 = vpop.permute.xlu0 %1294  ;;  %v1297_v31 = vpop.permute.xlu1 %1296 }
  0x94   : > { %v4283_v42 = vpop.permute.xlu2 %1358  ;;  %v1412_v17 = vsel %vm1364_vm7, %v1176_v44, %v1295_v27  ;;  %v550_v27 = vmax.f32 %v510_v23, 0.0 }
  0x96   : > { %v877_v43 = vpack.c.bf16 %v550_v27, %v550_v27  ;;  %v551_v27 = vmax.f32 %v511_v16, 0.0 }
  0x98   : > { %v957_v63 = vunpack.c.l.b16 %v877_v43 }
  0x9a   : > { %v4318_v12 = vpack.c.b16 %v957_v63, %v956_v46  ;;  %v878_v46 = vpack.c.bf16 %v551_v27, %v551_v27  ;;  %v1008_v63 = vrot.slane %v1006_v58, 7  ;;  %v385_v58 = vld [vmem:[%s3990_s16 + $0x58] sm:$0xff]  }
  0x9b   : > { %v1355_v2 = vpop.permute.xlu0 %1354  ;;  %v1357_v5 = vpop.permute.xlu1 %1356 }
  0x9c   : > { %v4297_v14 = vsel %vm1425_vm8, %v1412_v17, %v1355_v2  ;;  %v4305_v20 = vpop.permute.xlu2 %1292  ;;  %v424_v17 = vunpack.c.h.bf16 %v383_v62  ;;  %v1177_v2 = vsel %vm4279_vm6, 0, %v1116_v36  ;;  %1282 = vrot.lane.b32.xlu1 %v4318_v12, %s3913_s21  ;;  %v958_v49 = vunpack.c.l.b16 %v878_v46 }
  0x9d   : > { %3608 = vmatmul.msk.bf16.vlgmr.msra.gmra.mxu2 %vm1662_vm9, %v4297_v14  ;;  %v1415_v23 = vsel %vm1364_vm7, %v1177_v2, %v1297_v31  ;;  %v1011_v19 = vor.u32 %v1009_v47, %v1008_v63  ;;  %v1178_v47 = vsel %vm4279_vm6, 0, %v4222_v50 }
  0x9e   : > { %v468_v56 = vmul.f32 %v3995_v0, %v424_v17  ;;  %v4334_v43 = vsel %vm1425_vm8, %v1415_v23, %v1357_v5  ;;  %v1161_v5 = vsel %vm4279_vm6, 0, %v1004_v45  ;;  %v425_v23 = vunpack.c.l.bf16 %v385_v58 }
  0x9f   : > { %v1162_v46 = vsel %vm4279_vm6, 0, %v1011_v19  ;;  %v1418_v50 = vsel %vm1364_vm7, %v1178_v47, %v4262_v15 }
  0xa0   : > { %v512_v24 = vadd.f32 %v4003_v6, %v468_v56  ;;  %v469_v45 = vmul.f32 %v3995_v0, %v425_v23  ;;  %v1015_v23 = vrot.slane %v1013_v8, 7  ;;  %v3825_v8 = vld [vmem:[%s5525_s3 + $0x10] sm:$0x30] }
  0xa2   : > { %v552_v61 = vmax.f32 %v512_v24, 0.0  ;;  %v426_v24 = vunpack.c.h.bf16 %v385_v58 }
  0xa3   : > { %v4311_v44 = vpop.permute.xlu0 %1300  ;;  %v4313_v55 = vpop.permute.xlu1 %1360 }
  0xa4   : > { %v4322_v1 = vpop.permute.xlu2 %1328  ;;  %v879_v31 = vpack.c.bf16 %v552_v61, %v552_v61 }
  0xa6   : > { %v959_v17 = vunpack.c.l.b16 %v879_v31  ;;  %v470_v31 = vmul.f32 %v3995_v0, %v426_v24 }
  0xa8   : > { %v4346_v2 = vpack.c.b16 %v959_v17, %v958_v49  ;;  %v513_v49 = vadd.f32 %v4003_v6, %v469_v45  ;;  %v514_v17 = vadd.f32 %v4003_v6, %v470_v31 }
  0xaa   : > { %1284 = vrot.lane.b32.xlu0 %v4346_v2, %s3913_s21  ;;  %v1069_v52 = vshrl.u32 %v4346_v2, 16  ;;  %v1072_v33 = vshll.u32 %v4346_v2, 16  ;;  %v554_v58 = vmax.f32 %v514_v17, 0.0  ;;  %v1018_v17 = vor.u32 %v1016_v48, %v1015_v23 }
  0xab   : > { %v4331_v36 = vpop.permute.xlu0 %1352  ;;  %v4336_v62 = vpop.permute.xlu1 %1268 }
  0xac   : > { %v1325_v56 = vpop.permute.xlu2 %1324  ;;  %v1201_v41 = vrot.slane %v1072_v33, 1 }
  0xad   : > { %3609 = vmatmul.msk.bf16.gmra.mxu2 %vm1662_vm9, %v4334_v43 }
  0xae   : > { %v1202_v63 = vor.u32 %v1201_v41, %v1069_v52  ;;  %v1062_v41 = vshrl.u32 %v4318_v12, 16 }
  0xb0   : > { %v1254_v19 = vsel %vm4047_vm2, %v1202_v63, 0 }
  0xb1   : > { %1344 = vrot.lane.b32.xlu1 %v1254_v19, %s3914_s22 }
  0xb3   : > { %v1265_v16 = vpop.permute.xlu0 %1264  ;;  %v1267_v61 = vpop.permute.xlu1 %1266 }
  0xb4   : > { %v1367_v22 = vsel %vm1364_vm7, %v1161_v5, %v1265_v16  ;;  %v1370_v5 = vsel %vm1364_vm7, %v1162_v46, %v1267_v61  ;;  %v553_v16 = vmax.f32 %v513_v49, 0.0  ;;  %v881_v61 = vpack.c.bf16 %v554_v58, %v554_v58 }
  0xb5   : > { %v1427_v27 = vsel %vm1425_vm8, %v1367_v22, %v1325_v56  ;;  %v1065_v56 = vshll.u32 %v4318_v12, 16  ;;  %v1127_v22 = vrot.slane %v1125_v10, 7  ;;  %v3638_v10 = vld [vmem:[%s5525_s3 + $0x10] sm:$0xf]  ;;  %v1071_v12 = vrot.slane %v1069_v52, 7 }
  0xb6   : > { %3616 = vmatmul.msk.bf16.vlgmr.msra.gmra.mxu1 %vm1662_vm9, %v1427_v27  ;;  %v4385_v27 = vsel %vm1425_vm8, %v1418_v50, %v4283_v42  ;;  %v880_v42 = vpack.c.bf16 %v553_v16, %v553_v16  ;;  %v3639_v46 = vor.u32 %v3825_v8, %v3638_v10  ;;  %v961_v63 = vunpack.c.l.b16 %v881_v61 }
  0xb7   : > { %v1199_v47 = vrot.slane %v1065_v56, 1  ;;  %v1130_v49 = vor.u32 %v1128_v11, %v1127_v22  ;;  %v1163_v11 = vsel %vm4279_vm6, 0, %v1018_v17  ;;  %v1099_v8 = vrot.slane %v1097_v32, 7 }
  0xb8   : > { %v960_v31 = vunpack.c.l.b16 %v880_v42  ;;  %v1922_v50 = vsel %vm1699_vm3, %v3639_v46, 0  ;;  %v1373_v22 = vsel %vm1364_vm7, %v1163_v11, %v4336_v62  ;;  %v1022_v42 = vrot.slane %v1020_v7, 7 }
  0xb9   : > { %v1200_v45 = vor.u32 %v1199_v47, %v1062_v41  ;;  %1931 = vmatpush.bf16.msra.mxu2 %v1922_v50  ;;  %v1179_v3 = vsel %vm4279_vm6, 0, %v1130_v49  ;;  %v387_v47 = vld [vmem:[%s3990_s16 + $0x60] sm:$0xff]   ;;  %v4433_v10 = vsel %vm1425_vm8, %v1373_v22, %v4322_v1  ;;  %v1102_v32 = vor.u32 %v1100_v18, %v1099_v8 }
  0xba   : > { %v4409_v19 = vpack.c.b16 %v961_v63, %v960_v31  ;;  %v1421_v48 = vsel %vm1364_vm7, %v1179_v3, %v4311_v44  ;;  %v427_v62 = vunpack.c.l.bf16 %v387_v47  ;;  %v1025_v7 = vor.u32 %v1023_v54, %v1022_v42 }
  0xbb   : > { %v1327_v24 = vpop.permute.xlu0 %1326  ;;  %v4437_v44 = vsel %vm1425_vm8, %v1421_v48, %v4313_v55  ;;  %v1175_v17 = vsel %vm4279_vm6, 0, %v1102_v32  ;;  %v1271_v3 = vpop.permute.xlu1 %1270 }
  0xbc   : > { %v1429_v15 = vsel %vm1425_vm8, %v1370_v5, %v1327_v24  ;;  %v1253_v5 = vsel %vm4047_vm2, %v1200_v45, 0  ;;  %v1076_v16 = vshrl.u32 %v4409_v19, 16  ;;  %v1079_v58 = vshll.u32 %v4409_v19, 16 }
  0xbd   : > { %3594 = vmatmul.msk.bf16.vlgmr.msra.gmra.mxu0 %vm1662_vm9, %v1429_v15  ;;  %3610 = vmatmul.msk.bf16.gmra.mxu2 %vm1662_vm9, %v4385_v27  ;;  %v471_v61 = vmul.f32 %v3995_v0, %v427_v62  ;;  %v1164_v50 = vsel %vm4279_vm6, 0, %v1025_v7  ;;  %v1409_v22 = vsel %vm1364_vm7, %v1175_v17, %v4305_v20  ;;  %v1029_v20 = vrot.slane %v1027_v37, 7 }
  0xbe   : > { %1342 = vrot.lane.b32.xlu2 %v1253_v5, %s3914_s22  ;;  %v1203_v21 = vrot.slane %v1079_v58, 1  ;;  %v389_v5 = vld [vmem:[%s3990_s16 + $0x68] sm:$0xff]  }
  0xbf   : > { %v515_v55 = vadd.f32 %v4003_v6, %v471_v61  ;;  %v429_v48 = vunpack.c.l.bf16 %v389_v5  ;;  %v430_v4 = vunpack.c.h.bf16 %v389_v5  ;;  %v1036_v5 = vrot.slane %v1034_v60, 7 }
  0xc0   : > { %v1204_v23 = vor.u32 %v1203_v21, %v1076_v16 }
  0xc1   : > { %v555_v45 = vmax.f32 %v515_v55, 0.0  ;;  %v473_v34 = vmul.f32 %v3995_v0, %v429_v48  ;;  %v474_v54 = vmul.f32 %v3995_v0, %v430_v4  ;;  %v1039_v48 = vor.u32 %v1037_v57, %v1036_v5 }
  0xc2   : > { %v1255_v24 = vsel %vm4047_vm2, %v1204_v23, 0  ;;  %v1376_v23 = vsel %vm1364_vm7, %v1164_v50, %v1271_v3  ;;  %v1046_v57 = vor.u32 %v1044_v53, %v1043_v51 }
  0xc3   : > { %1346 = vrot.lane.b32.xlu0 %v1255_v24, %s3914_s22  ;;  %v882_v63 = vpack.c.bf16 %v555_v45, %v555_v45  ;;  %v1331_v24 = vpop.permute.xlu2 %1330  ;;  %v518_v62 = vadd.f32 %v4003_v6, %v474_v54  ;;  %v1273_v45 = vpop.permute.xlu0 %1272  ;;  %v1166_v4 = vsel %vm4279_vm6, 0, %v1039_v48 }
  0xc4   : > { %v4479_v8 = vsel %vm1425_vm8, %v1376_v23, %v1331_v24  ;;  %v1167_v24 = vsel %vm4279_vm6, 0, %v1046_v57 }
  0xc5   : > { %v962_v11 = vunpack.c.l.b16 %v882_v63  ;;  %v558_v42 = vmax.f32 %v518_v62, 0.0  ;;  %v1333_v63 = vpop.permute.xlu1 %1332 }
  0xc6   : > { %3617 = vmatmul.msk.bf16.gmra.mxu1 %vm1662_vm9, %v1429_v15  ;;  %1286 = vrot.lane.b32.xlu2 %v4409_v19, %s3913_s21  ;;  %v428_v15 = vunpack.c.h.bf16 %v387_v47  ;;  %v517_v47 = vadd.f32 %v4003_v6, %v473_v34 }
  0xc8   : > { %v472_v1 = vmul.f32 %v3995_v0, %v428_v15  ;;  %v4476_v15 = vsel %vm1425_vm8, %v1409_v22, %v4331_v36  ;;  %v557_v0 = vmax.f32 %v517_v47, 0.0  ;;  %v1032_v36 = vor.u32 %v1030_v38, %v1029_v20 }
  0xca   : > { %v516_v46 = vadd.f32 %v4003_v6, %v472_v1  ;;  %v884_v61 = vpack.c.bf16 %v557_v0, %v557_v0  ;;  %v885_v1 = vpack.c.bf16 %v558_v42, %v558_v42  ;;  %v1165_v7 = vsel %vm4279_vm6, 0, %v1032_v36 }
  0xcb   : > { %v1379_v38 = vsel %vm1364_vm7, %v1165_v7, %v1273_v45  ;;  %v1275_v34 = vpop.permute.xlu2 %1274  ;;  %v1335_v22 = vpop.permute.xlu0 %1334  ;;  %v1050_v42 = vrot.slane %v1048_v35, 7 }
  0xcc   : > { %v556_v31 = vmax.f32 %v516_v46, 0.0  ;;  %v964_v6 = vunpack.c.l.b16 %v884_v61  ;;  %v965_v55 = vunpack.c.l.b16 %v885_v1  ;;  %v4508_v17 = vsel %vm1425_vm8, %v1379_v38, %v1333_v63 }
  0xcd   : > { %3595 = vmatmul.msk.bf16.gmra.mxu0 %vm1662_vm9, %v4433_v10  ;;  %3611 = vmatmul.msk.bf16.gmra.mxu2 %vm1662_vm9, %v4437_v44  ;;  %v1382_v54 = vsel %vm1364_vm7, %v1166_v4, %v1275_v34  ;;  %v1277_v47 = vpop.permute.xlu1 %1276  ;;  %v1053_v59 = vor.u32 %v1051_v30, %v1050_v42 }
  0xce   : > { %v883_v49 = vpack.c.bf16 %v556_v31, %v556_v31  ;;  %v4489_v46 = vpack.c.b16 %v965_v55, %v964_v6  ;;  %v4533_v23 = vsel %vm1425_vm8, %v1382_v54, %v1335_v22  ;;  %v1385_v62 = vsel %vm1364_vm7, %v1167_v24, %v1277_v47 }
  0xcf   : > { %v1168_v53 = vsel %vm4279_vm6, 0, %v1053_v59  ;;  %v1057_v6 = vrot.slane %v1055_v39, 7 }
  0xd0   : > { %v963_v21 = vunpack.c.l.b16 %v883_v49  ;;  %1290 = vrot.lane.b32.xlu0 %v4489_v46, %s3913_s21  ;;  %v1090_v37 = vshrl.u32 %v4489_v46, 16  ;;  %v1093_v32 = vshll.u32 %v4489_v46, 16 }
  0xd1   : > { %v1060_v30 = vor.u32 %v1058_v26, %v1057_v6 }
  0xd2   : > { %v4463_v18 = vpack.c.b16 %v963_v21, %v962_v11  ;;  %v1207_v31 = vrot.slane %v1093_v32, 1 }
  0xd3   : > { %v1337_v0 = vpop.permute.xlu2 %1336  ;;  %v1279_v20 = vpop.permute.xlu0 %1278  ;;  %v1169_v55 = vsel %vm4279_vm6, 0, %v1060_v30 }
  0xd4   : > { %1288 = vrot.lane.b32.xlu1 %v4463_v18, %s3913_s21  ;;  %v1208_v29 = vor.u32 %v1207_v31, %v1090_v37  ;;  %v1086_v50 = vshll.u32 %v4463_v18, 16  ;;  %v1083_v3 = vshrl.u32 %v4463_v18, 16  ;;  %v4549_v13 = vsel %vm1425_vm8, %v1385_v62, %v1337_v0 }
  0xd5   : > { %v1388_v61 = vsel %vm1364_vm7, %v1168_v53, %v1279_v20  ;;  %v1092_v18 = vrot.slane %v1090_v37, 7 }
  0xd6   : > { %3618 = vmatmul.msk.bf16.gmra.mxu1 %vm1662_vm9, %v4433_v10  ;;  %v1257_v49 = vsel %vm4047_vm2, %v1208_v29, 0  ;;  %v1205_v11 = vrot.slane %v1086_v50, 1 }
  0xd7   : > { %v1339_v1 = vpop.permute.xlu1 %1338 }
  0xd8   : > { %v1206_v21 = vor.u32 %v1205_v11, %v1083_v3  ;;  %v4565_v35 = vsel %vm1425_vm8, %v1388_v61, %v1339_v1 }
  0xda   : > { %v1256_v60 = vsel %vm4047_vm2, %v1206_v21, 0 }
  0xdb   : > { %1348 = vrot.lane.b32.xlu2 %v1256_v60, %s3914_s22  ;;  %v1281_v36 = vpop.permute.xlu2 %1280  ;;  %v1341_v7 = vpop.permute.xlu0 %1340  ;;  %v1074_v60 = vor.u32 %v1072_v33, %v1071_v12  ;;  %v1078_v33 = vrot.slane %v1076_v16, 7 }
  0xdc   : > { %1350 = vrot.lane.b32.xlu1 %v1257_v49, %s3914_s22  ;;  %v1391_v39 = vsel %vm1364_vm7, %v1169_v55, %v1281_v36 }
  0xdd   : > { %3596 = vmatmul.msk.bf16.gmra.mxu0 %vm1662_vm9, %v4479_v8  ;;  %3630 = vmatmul.msk.bf16.vlgmr.msrb.gmra.mxu2 %vm1662_vm9, %v4476_v15  ;;  %v4585_v31 = vsel %vm1425_vm8, %v1391_v39, %v1341_v7  ;;  %v1171_v54 = vsel %vm4279_vm6, 0, %v1074_v60  ;;  %v1081_v42 = vor.u32 %v1079_v58, %v1078_v33  ;;  %v1085_v58 = vrot.slane %v1083_v3, 7 }
  0xdf   : > { %v1172_v20 = vsel %vm4279_vm6, 0, %v1081_v42  ;;  %v1088_v39 = vor.u32 %v1086_v50, %v1085_v58 }
  0xe6   : > { %3619 = vmatmul.msk.bf16.gmra.mxu1 %vm1662_vm9, %v4479_v8 }
  0xed   : > { %3597 = vmatmul.msk.bf16.gmra.mxu0 %vm1662_vm9, %v4508_v17  ;;  %3631 = vmatmul.msk.bf16.gmra.mxu2 %vm1662_vm9, %v4297_v14 }
  0xf6   : > { %3620 = vmatmul.msk.bf16.gmra.mxu1 %vm1662_vm9, %v4508_v17 }
  0xfd   : > { %3598 = vmatmul.msk.bf16.gmra.mxu0 %vm1662_vm9, %v4533_v23  ;;  %3632 = vmatmul.msk.bf16.gmra.mxu2 %vm1662_vm9, %v4334_v43 }
 0x106   : > { %3621 = vmatmul.msk.bf16.gmra.mxu1 %vm1662_vm9, %v4533_v23 }
 0x10d   : > { %3599 = vmatmul.msk.bf16.gmra.mxu0 %vm1662_vm9, %v4549_v13  ;;  %3633 = vmatmul.msk.bf16.gmra.mxu2 %vm1662_vm9, %v4385_v27 }
 0x10e   : > { %v1283_v63 = vpop.permute.xlu1 %1282 }
 0x116   : > { %3622 = vmatmul.msk.bf16.gmra.mxu1 %vm1662_vm9, %v4549_v13 }
 0x118   : > { %v1343_v49 = vpop.permute.xlu2 %1342 }
 0x11c   : > { %v1285_v22 = vpop.permute.xlu0 %1284 }
 0x11d   : > { %3600 = vmatmul.msk.bf16.gmra.mxu0 %vm1662_vm9, %v4565_v35  ;;  %3640 = vmatmul.msk.bf16.vlgmr.msra.gmra.mxu2 %vm1662_vm9, %v4433_v10  ;;  %v1064_v10 = vrot.slane %v1062_v41, 7  ;;  %v1397_v51 = vsel %vm1364_vm7, %v1171_v54, %v1285_v22 }
 0x11f   : > { %v1067_v26 = vor.u32 %v1065_v56, %v1064_v10  ;;  %v1173_v10 = vsel %vm4279_vm6, 0, %v1088_v39 }
 0x120   : > { %v4573_v28 = vpop.f32.mrf.mxu2  ;;  %v1287_v61 = vpop.permute.xlu2 %1286 }
 0x121   : > { %v1170_v38 = vsel %vm4279_vm6, 0, %v1067_v26  ;;  %v1400_v16 = vsel %vm1364_vm7, %v1172_v20, %v1287_v61 }
 0x122   : > { %v1394_v41 = vsel %vm1364_vm7, %v1170_v38, %v1283_v63 }
 0x123   : > { %v1345_v57 = vpop.permute.xlu1 %1344 }
 0x124   : > { %v4627_v47 = vsel %vm1425_vm8, %v1397_v51, %v1345_v57 }
 0x126   : > { %3623 = vmatmul.msk.bf16.gmra.mxu1 %vm1662_vm9, %v4565_v35 }
 0x128   : > { %v4582_v45 = vpop.f32.mrf.mxu2 }
 0x12d   : > { %3601 = vmatmul.msk.bf16.gmra.mxu0 %vm1662_vm9, %v4585_v31  ;;  %3641 = vmatmul.msk.bf16.gmra.mxu2 %vm1662_vm9, %v4479_v8  ;;  %v4605_v8 = vsel %vm1425_vm8, %v1394_v41, %v1343_v49 }
 0x130   : > { %v4593_v25 = vpop.f32.mrf.mxu2 }
 0x133   : > { %v1821_v29 = vpop.f32.mrf.mxu1 }
 0x135   : > { %v1347_v1 = vpop.permute.xlu0 %1346 }
 0x136   : > { %3624 = vmatmul.msk.bf16.gmra.mxu1 %vm1662_vm9, %v4585_v31  ;;  %v1449_v55 = vsel %vm1425_vm8, %v1400_v16, %v1347_v1 }
 0x138   : > { %v4602_v5 = vpop.f32.mrf.mxu2 }
 0x13a   : > { %v1712_v11 = vpop.f32.mrf.mxu0 }
 0x13b   : > { %v4607_v21 = vadd.f32 %v1821_v29, %v1712_v11  ;;  %v1823_v56 = vpop.f32.mrf.mxu1  ;;  %v1349_v29 = vpop.permute.xlu2 %1348 }
 0x13d   : > { %3602 = vmatmul.msk.bf16.gmra.mxu0 %vm1662_vm9, %v4605_v8  ;;  %3642 = vmatmul.msk.bf16.gmra.mxu2 %vm1662_vm9, %v4508_v17 }
 0x140   : > { %v4615_v48 = vpop.f32.mrf.mxu2 }
 0x142   : > { %v1714_v4 = vpop.f32.mrf.mxu0  ;;  %v1291_v49 = vpop.permute.xlu0 %1290 }
 0x143   : > { %v4619_v34 = vadd.f32 %v1823_v56, %v1714_v4  ;;  %v1826_v52 = vpop.f32.mrf.mxu1 }
 0x146   : > { %3625 = vmatmul.msk.bf16.gmra.mxu1 %vm1662_vm9, %v4605_v8  ;;  %v1289_v26 = vpop.permute.xlu1 %1288 }
 0x147   : > { %v1403_v3 = vsel %vm1364_vm7, %v1173_v10, %v1289_v26 }
 0x148   : > { %v1794_v17 = vpop.f32.mrf.mxu2 }
 0x14a   : > { %v1717_v24 = vpop.f32.mrf.mxu0 }
 0x14b   : > { %v4629_v2 = vadd.f32 %v1826_v52, %v1717_v24  ;;  %v1828_v0 = vpop.f32.mrf.mxu1  ;;  %v4715_v52 = vld [vmem:[%s5526_s4] ss:$0 sm:$0xff] }
 0x14c   : > { %v4723_v24 = vld [vmem:[%s5527_s5] ss:$0 sm:$0xff] }
 0x14d   : > { %3603 = vmatmul.msk.bf16.gmra.mxu0 %vm1662_vm9, %v4627_v47  ;;  %3643 = vmatmul.msk.bf16.gmra.mxu2 %vm1662_vm9, %v4533_v23 }
 0x14e   : > { %v1351_v11 = vpop.permute.xlu1 %1350 }
 0x150   : > { %v1797_v62 = vpop.f32.mrf.mxu2 }
 0x152   : > { %v1719_v59 = vpop.f32.mrf.mxu0 }
 0x153   : > { %v4639_v53 = vadd.f32 %v1828_v0, %v1719_v59  ;;  %v1831_v30 = vpop.f32.mrf.mxu1 }
 0x156   : > { %3626 = vmatmul.msk.bf16.gmra.mxu1 %vm1662_vm9, %v4627_v47 }
 0x158   : > { %v1799_v6 = vpop.f32.mrf.mxu2 }
 0x15a   : > { %v1722_v23 = vpop.f32.mrf.mxu0 }
 0x15b   : > { %v4647_v19 = vadd.f32 %v1831_v30, %v1722_v23  ;;  %v1833_v54 = vpop.f32.mrf.mxu1 }
 0x15d   : > { %3604 = vmatmul.msk.bf16.gmra.mxu0 %vm1662_vm9, %v1449_v55  ;;  %3644 = vmatmul.msk.bf16.gmra.mxu2 %vm1662_vm9, %v4549_v13  ;;  %v4667_v13 = vsel %vm1425_vm8, %v1403_v3, %v1349_v29 }
 0x160   : > { %v1891_v36 = vpop.f32.mrf.mxu2 }
 0x161   : > { %v4657_v7 = vadd.f32 %v1891_v36, %v4573_v28  ;;  %v1095_v28 = vor.u32 %v1093_v32, %v1092_v18 }
 0x166   : > { %3627 = vmatmul.msk.bf16.gmra.mxu1 %vm1662_vm9, %v1449_v55 }
 0x168   : > { %v1893_v38 = vpop.f32.mrf.mxu2 }
 0x169   : > { %v4664_v63 = vadd.f32 %v1893_v38, %v4582_v45  ;;  %v1174_v45 = vsel %vm4279_vm6, 0, %v1095_v28 }
 0x16a   : > { %v1406_v37 = vsel %vm1364_vm7, %v1174_v45, %v1291_v49 }
 0x16b   : > { %v4689_v46 = vsel %vm1425_vm8, %v1406_v37, %v1351_v11 }
 0x16d   : > { %3605 = vmatmul.msk.bf16.gmra.mxu0 %vm1662_vm9, %v4667_v13  ;;  %3645 = vmatmul.msk.bf16.gmra.mxu2 %vm1662_vm9, %v4565_v35 }
 0x170   : > { %v1896_v50 = vpop.f32.mrf.mxu2 }
 0x171   : > { %v4678_v41 = vadd.f32 %v1896_v50, %v4593_v25 }
 0x176   : > { %3628 = vmatmul.msk.bf16.gmra.mxu1 %vm1662_vm9, %v4667_v13 }
 0x178   : > { %v1898_v12 = vpop.f32.mrf.mxu2 }
 0x179   : > { %v4686_v35 = vadd.f32 %v1898_v12, %v4602_v5 }
 0x17d   : > { %3606 = vmatmul.msk.bf16.gmra.mxu0 %vm1662_vm9, %v4689_v46  ;;  %3646 = vmatmul.msk.bf16.gmra.mxu2 %vm1662_vm9, %v4585_v31  ;;  %v1724_v31 = vpop.f32.mrf.mxu0 }
 0x180   : > { %v1901_v32 = vpop.f32.mrf.mxu2 }
 0x181   : > { %v4696_v25 = vadd.f32 %v1901_v32, %v4615_v48 }
 0x185   : > { %v4717_v57 = vpop.f32.mrf.mxu0 }
 0x186   : > { %3629 = vmatmul.msk.bf16.gmra.mxu1 %vm1662_vm9, %v4689_v46 }
 0x188   : > { %v1903_v56 = vpop.f32.mrf.mxu2 }
 0x189   : > { %v4700_v60 = vadd.f32 %v1903_v56, %v1794_v17 }
 0x18d   : > { %3607 = vmatmul.msk.bf16.gmra.mxu0 %vm1662_vm9, %v4476_v15  ;;  %3647 = vmatmul.msk.bf16.gmra.mxu2 %vm1662_vm9, %v4605_v8  ;;  %v1836_v8 = vpop.f32.mrf.mxu1  ;;  %v4728_v59 = vpop.f32.mrf.mxu0 }
 0x190   : > { %v1906_v5 = vpop.f32.mrf.mxu2 }
 0x191   : > { %v4706_v4 = vadd.f32 %v1906_v5, %v1797_v62 }
 0x195   : > { %v4730_v20 = vpop.f32.mrf.mxu1  ;;  %v4737_v39 = vpop.f32.mrf.mxu0 }
 0x198   : > { %v1908_v22 = vpop.f32.mrf.mxu2 }
 0x199   : > { %v4708_v48 = vadd.f32 %v1908_v22, %v1799_v6 }
 0x19d   : > { %3648 = vmatmul.msk.bf16.gmra.mxu2 %vm1662_vm9, %v4627_v47  ;;  %v4739_v10 = vpop.f32.mrf.mxu1 }
 0x1a0   : > { %v1933_v51 = vpop.f32.mrf.mxu2 }
 0x1a1   : > { %v2023_v17 = vadd.f32 %v1933_v51, %v4607_v21 }
 0x1a3   : > { %v2063_v33 = vmul.f32 %v4715_v52, %v2023_v17 }
 0x1a5   : > { %v2103_v47 = vadd.f32 %v4723_v24, %v2063_v33  ;;  %v1843_v12 = vpop.f32.mrf.mxu1 }
 0x1a7   : > { %v2139_v0 = vmax.f32 %v2103_v47, 0.0 }
 0x1a8   : > { %v1935_v62 = vpop.f32.mrf.mxu2 }
 0x1a9   : > { %v2024_v42 = vadd.f32 %v1935_v62, %v4619_v34  ;;  %v2175_v21 = vmul.f32 0.0, %v2139_v0  ;;  %v1834_v0 = vadd.f32 %v1833_v54, %v1724_v31 }
 0x1ab   : > { %v2064_v61 = vmul.f32 %v4715_v52, %v2024_v42  ;;  %v2211_v23 = vpack.c.bf16 %v2175_v21, %v2175_v21 }
 0x1ad   : > { %v2104_v16 = vadd.f32 %v4723_v24, %v2064_v61  ;;  %3649 = vmatmul.msk.bf16.gmra.mxu2 %vm1662_vm9, %v1449_v55  ;;  %v2283_v26 = vunpack.c.l.b16 %v2211_v23 }
 0x1af   : > { %v2140_v1 = vmax.f32 %v2104_v16, 0.0  ;;  %v4765_v16 = vpop.f32.mrf.mxu1 }
 0x1b0   : > { %v1938_v6 = vpop.f32.mrf.mxu2 }
 0x1b1   : > { %v2176_v30 = vmul.f32 0.0, %v2140_v1  ;;  %v2025_v58 = vadd.f32 %v1938_v6, %v4629_v2 }
 0x1b3   : > { %v2065_v36 = vmul.f32 %v4715_v52, %v2025_v58  ;;  %v2212_v34 = vpack.c.bf16 %v2176_v30, %v2176_v30  ;;  %v1837_v58 = vadd.f32 %v1836_v8, %v4717_v57 }
 0x1b5   : > { %v2284_v3 = vunpack.c.l.b16 %v2212_v34  ;;  %v2105_v29 = vadd.f32 %v4723_v24, %v2065_v36 }
 0x1b7   : > { %v4742_v38 = vpack.c.b16 %v2284_v3, %v2283_v26  ;;  %v2141_v28 = vmax.f32 %v2105_v29, 0.0 }
 0x1b8   : > { %v1940_v55 = vpop.f32.mrf.mxu2 }
 0x1b9   : > { %v2026_v18 = vadd.f32 %v1940_v55, %v4639_v53  ;;  %v2338_v50 = vshrl.u32 %v4742_v38, 16  ;;  %v2341_v45 = vshll.u32 %v4742_v38, 16  ;;  %v1734_v53 = vpop.f32.mrf.mxu0  ;;  %v2213_v32 = vpack.c.bf16 %v2141_v28, %v2141_v28 }
 0x1bb   : > { %v2066_v2 = vmul.f32 %v4715_v52, %v2026_v18  ;;  %v2340_v49 = vrot.slane %v2338_v50, 7  ;;  %v2285_v33 = vunpack.c.l.b16 %v2213_v32  ;;  %v1848_v18 = vpop.f32.mrf.mxu1  ;;  %v1839_v32 = vadd.f32 %v4730_v20, %v4728_v59 }
 0x1bd   : > { %v2106_v37 = vadd.f32 %v4723_v24, %v2066_v2  ;;  %3650 = vmatmul.msk.bf16.gmra.mxu2 %vm1662_vm9, %v4667_v13  ;;  %v4755_v11 = vor.u32 %v2341_v45, %v2340_v49 }
 0x1bf   : > { %v2142_v56 = vmax.f32 %v2106_v37, 0.0 }
 0x1c0   : > { %v1943_v5 = vpop.f32.mrf.mxu2 }
 0x1c1   : > { %v2027_v22 = vadd.f32 %v1943_v5, %v4647_v19  ;;  %v2214_v51 = vpack.c.bf16 %v2142_v56, %v2142_v56  ;;  %v4763_v21 = vpop.f32.mrf.mxu0 }
 0x1c3   : > { %v2067_v17 = vmul.f32 %v4715_v52, %v2027_v22  ;;  %v2286_v47 = vunpack.c.l.b16 %v2214_v51  ;;  %v4796_v59 = vpop.f32.mrf.mxu1 }
 0x1c5   : > { %v4759_v62 = vpack.c.b16 %v2286_v47, %v2285_v33  ;;  %v2107_v13 = vadd.f32 %v4723_v24, %v2067_v17 }
 0x1c7   : > { %v2345_v42 = vshrl.u32 %v4759_v62, 16  ;;  %v2348_v6 = vshll.u32 %v4759_v62, 16  ;;  %v2143_v23 = vmax.f32 %v2107_v13, 0.0 }
 0x1c8   : > { %v1945_v61 = vpop.f32.mrf.mxu2 }
 0x1c9   : > { %v2028_v1 = vadd.f32 %v1945_v61, %v1834_v0  ;;  %v2347_v19 = vrot.slane %v2345_v42, 7  ;;  %v2215_v36 = vpack.c.bf16 %v2143_v23, %v2143_v23  ;;  %v1739_v55 = vpop.f32.mrf.mxu0  ;;  %v1842_v0 = vadd.f32 %v4739_v10, %v4737_v39 }
 0x1cb   : > { %v2068_v30 = vmul.f32 %v4715_v52, %v2028_v1  ;;  %v4773_v31 = vor.u32 %v2348_v6, %v2347_v19  ;;  %v2287_v28 = vunpack.c.l.b16 %v2215_v36 }
 0x1cd   : > { %v2108_v54 = vadd.f32 %v4723_v24, %v2068_v30  ;;  %3651 = vmatmul.msk.bf16.gmra.mxu2 %vm1662_vm9, %v4689_v46 }
 0x1cf   : > { %v2144_v34 = vmax.f32 %v2108_v54, 0.0 }
 0x1d0   : > { %v1948_v26 = vpop.f32.mrf.mxu2 }
 0x1d1   : > { %v2216_v3 = vpack.c.bf16 %v2144_v34, %v2144_v34  ;;  %v2029_v29 = vadd.f32 %v1948_v26, %v1837_v58  ;;  %v4794_v47 = vpop.f32.mrf.mxu0  ;;  %v1844_v34 = vadd.f32 %v1843_v12, %v1734_v53 }
 0x1d3   : > { %v2288_v2 = vunpack.c.l.b16 %v2216_v3  ;;  %v2069_v49 = vmul.f32 %v4715_v52, %v2029_v29  ;;  %v1853_v3 = vpop.f32.mrf.mxu1 }
 0x1d5   : > { %v4780_v37 = vpack.c.b16 %v2288_v2, %v2287_v28  ;;  %v2109_v46 = vadd.f32 %v4723_v24, %v2069_v49 }
 0x1d7   : > { %v2352_v57 = vshrl.u32 %v4780_v37, 16  ;;  %v2355_v22 = vshll.u32 %v4780_v37, 16  ;;  %v2145_v51 = vmax.f32 %v2109_v46, 0.0 }
 0x1d8   : > { %v1950_v8 = vpop.f32.mrf.mxu2 }
 0x1d9   : > { %v2030_v56 = vadd.f32 %v1950_v8, %v1839_v32  ;;  %v2354_v5 = vrot.slane %v2352_v57, 7  ;;  %v2217_v13 = vpack.c.bf16 %v2145_v51, %v2145_v51  ;;  %v1744_v26 = vpop.f32.mrf.mxu0 }
 0x1db   : > { %v2070_v17 = vmul.f32 %v4715_v52, %v2030_v56  ;;  %v4792_v33 = vor.u32 %v2355_v22, %v2354_v5  ;;  %v2289_v54 = vunpack.c.l.b16 %v2217_v13  ;;  %v1847_v5 = vadd.f32 %v4765_v16, %v4763_v21  ;;  %v1856_v13 = vpop.f32.mrf.mxu1 }
 0x1dd   : > { %v2110_v20 = vadd.f32 %v4723_v24, %v2070_v17  ;;  %3652 = vmatmul.msk.bf16.gmra.mxu2 %vm1662_vm9, %v4476_v15 }
 0x1df   : > { %v2146_v61 = vmax.f32 %v2110_v20, 0.0 }
 0x1e0   : > { %v1953_v1 = vpop.f32.mrf.mxu2 }
 0x1e1   : > { %v2031_v19 = vadd.f32 %v1953_v1, %v1842_v0  ;;  %v2218_v23 = vpack.c.bf16 %v2146_v61, %v2146_v61  ;;  %v1747_v0 = vpop.f32.mrf.mxu0 }
 0x1e3   : > { %v2071_v30 = vmul.f32 %v4715_v52, %v2031_v19  ;;  %v2290_v58 = vunpack.c.l.b16 %v2218_v23 }
 0x1e5   : > { %v2322_v36 = vpack.c.b16 %v2290_v58, %v2289_v54  ;;  %v2111_v29 = vadd.f32 %v4723_v24, %v2071_v30  ;;  %v1849_v54 = vadd.f32 %v1848_v18, %v1739_v55 }
 0x1e7   : > { %2577 = vrot.lane.b32.xlu2 %v2322_v36, %s3914_s22  ;;  %v2359_v15 = vshrl.u32 %v2322_v36, 16  ;;  %v2362_v28 = vshll.u32 %v2322_v36, 16  ;;  %v2147_v32 = vmax.f32 %v2111_v29, 0.0 }
 0x1e8   : > { %v1955_v39 = vpop.f32.mrf.mxu2 }
 0x1e9   : > { %v2032_v10 = vadd.f32 %v1955_v39, %v1844_v34  ;;  %v2505_v2 = vrot.slane %v2362_v28, 1  ;;  %v2361_v49 = vrot.slane %v2359_v15, 7  ;;  %v2219_v51 = vpack.c.bf16 %v2147_v32, %v2147_v32  ;;  %v1858_v39 = vpop.f32.mrf.mxu1 }
 0x1eb   : > { %v2072_v46 = vmul.f32 %v4715_v52, %v2032_v10  ;;  %v2506_v8 = vor.u32 %v2505_v2, %v2359_v15  ;;  %v4807_v56 = vor.u32 %v2362_v28, %v2361_v49  ;;  %v2291_v23 = vunpack.c.l.b16 %v2219_v51  ;;  %v1749_v28 = vpop.f32.mrf.mxu0 }
 0x1ed   : > { %v2112_v53 = vadd.f32 %v4723_v24, %v2072_v46  ;;  %3653 = vmatmul.msk.bf16.gmra.mxu2 %vm1662_vm9, %v4297_v14  ;;  %v2556_v12 = vsel %vm4047_vm2, %v2506_v8, 0  ;;  %v1852_v46 = vadd.f32 %v4796_v59, %v4794_v47 }
 0x1ee   : > { %2631 = vrot.lane.b32.xlu0 %v2556_v12, %s3915_s25 }
 0x1ef   : > { %v2148_v17 = vmax.f32 %v2112_v53, 0.0 }
 0x1f0   : > { %v1958_v20 = vpop.f32.mrf.mxu2 }
 0x1f1   : > { %v2033_v61 = vadd.f32 %v1958_v20, %v1847_v5  ;;  %v2220_v1 = vpack.c.bf16 %v2148_v17, %v2148_v17 }
 0x1f3   : > { %v2073_v19 = vmul.f32 %v4715_v52, %v2033_v61  ;;  %v2292_v14 = vunpack.c.l.b16 %v2220_v1  ;;  %v1752_v1 = vpop.f32.mrf.mxu0 }
 0x1f5   : > { %v2323_v30 = vpack.c.b16 %v2292_v14, %v2291_v23  ;;  %v2113_v58 = vadd.f32 %v4723_v24, %v2073_v19  ;;  %v1861_v19 = vpop.f32.mrf.mxu1  ;;  %v1854_v23 = vadd.f32 %v1853_v3, %v1744_v26  ;;  %v1857_v3 = vadd.f32 %v1856_v13, %v1747_v0 }
 0x1f7   : > { %2579 = vrot.lane.b32.xlu1 %v2323_v30, %s3914_s22  ;;  %v2366_v36 = vshrl.u32 %v2323_v30, 16  ;;  %v2369_v34 = vshll.u32 %v2323_v30, 16  ;;  %v2149_v10 = vmax.f32 %v2113_v58, 0.0 }
 0x1f8   : > { %v1960_v21 = vpop.f32.mrf.mxu2 }
 0x1f9   : > { %v2034_v16 = vadd.f32 %v1960_v21, %v1849_v54  ;;  %v2368_v29 = vrot.slane %v2366_v36, 7  ;;  %v2507_v15 = vrot.slane %v2369_v34, 1  ;;  %v2221_v8 = vpack.c.bf16 %v2149_v10, %v2149_v10 }
 0x1fb   : > { %v2074_v2 = vmul.f32 %v4715_v52, %v2034_v16  ;;  %v2508_v49 = vor.u32 %v2507_v15, %v2366_v36  ;;  %v4821_v32 = vor.u32 %v2369_v34, %v2368_v29  ;;  %v2293_v20 = vunpack.c.l.b16 %v2221_v8  ;;  %v1754_v10 = vpop.f32.mrf.mxu0 }
 0x1fd   : > { %v2114_v55 = vadd.f32 %v4723_v24, %v2074_v2  ;;  %3654 = vmatmul.msk.bf16.gmra.mxu2 %vm1662_vm9, %v4334_v43  ;;  %v2557_v18 = vsel %vm4047_vm2, %v2508_v49, 0  ;;  %v1863_v2 = vpop.f32.mrf.mxu1 }
 0x1fe   : > { %2633 = vrot.lane.b32.xlu2 %v2557_v18, %s3915_s25 }
 0x1ff   : > { %v2150_v53 = vmax.f32 %v2114_v55, 0.0 }
 0x200   : > { %v1963_v12 = vpop.f32.mrf.mxu2 }
 0x201   : > { %v2035_v5 = vadd.f32 %v1963_v12, %v1852_v46  ;;  %v2222_v51 = vpack.c.bf16 %v2150_v53, %v2150_v53 }
 0x203   : > { %v2075_v17 = vmul.f32 %v4715_v52, %v2035_v5  ;;  %v2294_v61 = vunpack.c.l.b16 %v2222_v51  ;;  %v1757_v13 = vpop.f32.mrf.mxu0 }
 0x205   : > { %v2324_v43 = vpack.c.b16 %v2294_v61, %v2293_v20  ;;  %v2115_v14 = vadd.f32 %v4723_v24, %v2075_v17  ;;  %v1859_v17 = vadd.f32 %v1858_v39, %v1749_v28 }
 0x207   : > { %2581 = vrot.lane.b32.xlu0 %v2324_v43, %s3914_s22  ;;  %v2373_v30 = vshrl.u32 %v2324_v43, 16  ;;  %v2376_v54 = vshll.u32 %v2324_v43, 16  ;;  %v2151_v34 = vmax.f32 %v2115_v14, 0.0  ;;  %v1866_v43 = vpop.f32.mrf.mxu1 }
 0x208   : > { %v1965_v47 = vpop.f32.mrf.mxu2 }
 0x209   : > { %v2036_v59 = vadd.f32 %v1965_v47, %v1854_v23  ;;  %v2375_v58 = vrot.slane %v2373_v30, 7  ;;  %v2509_v36 = vrot.slane %v2376_v54, 1  ;;  %v2223_v49 = vpack.c.bf16 %v2151_v34, %v2151_v34 }
 0x20b   : > { %v2076_v21 = vmul.f32 %v4715_v52, %v2036_v59  ;;  %v2510_v16 = vor.u32 %v2509_v36, %v2373_v30  ;;  %v4835_v29 = vor.u32 %v2376_v54, %v2375_v58  ;;  %v2295_v12 = vunpack.c.l.b16 %v2223_v49 }
 0x20c   : > { %v1862_v36 = vadd.f32 %v1861_v19, %v1752_v1 }
 0x20d   : > { %v2116_v15 = vadd.f32 %v4723_v24, %v2076_v21  ;;  %3655 = vmatmul.msk.bf16.gmra.mxu2 %vm1662_vm9, %v4385_v27  ;;  %v2558_v26 = vsel %vm4047_vm2, %v2510_v16, 0 }
 0x20e   : > { %2635 = vrot.lane.b32.xlu1 %v2558_v26, %s3915_s25 }
 0x20f   : > { %v2152_v55 = vmax.f32 %v2116_v15, 0.0  ;;  %v1868_v49 = vpop.f32.mrf.mxu1 }
 0x210   : > { %v1968_v18 = vpop.f32.mrf.mxu2 }
 0x211   : > { %v2037_v46 = vadd.f32 %v1968_v18, %v1857_v3  ;;  %v2224_v8 = vpack.c.bf16 %v2152_v55, %v2152_v55  ;;  %v1759_v3 = vpop.f32.mrf.mxu0 }
 0x213   : > { %v2077_v53 = vmul.f32 %v4715_v52, %v2037_v46  ;;  %v2296_v5 = vunpack.c.l.b16 %v2224_v8 }
 0x215   : > { %v2325_v51 = vpack.c.b16 %v2296_v5, %v2295_v12  ;;  %v2117_v27 = vadd.f32 %v4723_v24, %v2077_v53  ;;  %v1864_v53 = vadd.f32 %v1863_v2, %v1754_v10 }
 0x217   : > { %2583 = vrot.lane.b32.xlu2 %v2325_v51, %s3914_s22  ;;  %v2380_v20 = vshrl.u32 %v2325_v51, 16  ;;  %v2383_v61 = vshll.u32 %v2325_v51, 16  ;;  %v2153_v54 = vmax.f32 %v2117_v27, 0.0 }
 0x218   : > { %v1970_v0 = vpop.f32.mrf.mxu2 }
 0x219   : > { %v2038_v23 = vadd.f32 %v1970_v0, %v1859_v17  ;;  %v2382_v14 = vrot.slane %v2380_v20, 7  ;;  %v2511_v30 = vrot.slane %v2383_v61, 1  ;;  %v2225_v34 = vpack.c.bf16 %v2153_v54, %v2153_v54 }
 0x21b   : > { %v2078_v47 = vmul.f32 %v4715_v52, %v2038_v23  ;;  %v2512_v59 = vor.u32 %v2511_v30, %v2380_v20  ;;  %v4847_v58 = vor.u32 %v2383_v61, %v2382_v14  ;;  %v2297_v18 = vunpack.c.l.b16 %v2225_v34  ;;  %v1762_v23 = vpop.f32.mrf.mxu0  ;;  %v1871_v14 = vpop.f32.mrf.mxu1 }
 0x21c   : > { %v1867_v30 = vadd.f32 %v1866_v43, %v1757_v13 }
 0x21d   : > { %v2118_v28 = vadd.f32 %v4723_v24, %v2078_v47  ;;  %3656 = vmatmul.msk.bf16.gmra.mxu2 %vm1662_vm9, %v4437_v44  ;;  %v2559_v39 = vsel %vm4047_vm2, %v2512_v59, 0 }
 0x21e   : > { %2637 = vrot.lane.b32.xlu0 %v2559_v39, %s3915_s25 }
 0x21f   : > { %v2154_v21 = vmax.f32 %v2118_v28, 0.0 }
 0x220   : > { %v1973_v16 = vpop.f32.mrf.mxu2 }
 0x221   : > { %v2039_v15 = vadd.f32 %v1973_v16, %v1862_v36  ;;  %v2226_v26 = vpack.c.bf16 %v2154_v21, %v2154_v21 }
 0x223   : > { %v2079_v55 = vmul.f32 %v4715_v52, %v2039_v15  ;;  %v2298_v46 = vunpack.c.l.b16 %v2226_v26  ;;  %v1869_v15 = vadd.f32 %v1868_v49, %v1759_v3  ;;  %v3660_v26 = vld [vmem:[%s5528_s6 + $0x14] sm:$0xf] }
 0x225   : > { %v2326_v8 = vpack.c.b16 %v2298_v46, %v2297_v18  ;;  %v2119_v44 = vadd.f32 %v4723_v24, %v2079_v55  ;;  %v1764_v55 = vpop.f32.mrf.mxu0  ;;  %v1873_v18 = vpop.f32.mrf.mxu1 }
 0x227   : > { %2585 = vrot.lane.b32.xlu1 %v2326_v8, %s3914_s22  ;;  %v2387_v12 = vshrl.u32 %v2326_v8, 16  ;;  %v2390_v5 = vshll.u32 %v2326_v8, 16  ;;  %v2155_v27 = vmax.f32 %v2119_v44, 0.0  ;;  %v2764_v8 = vunpack.c.l.b16 %v3660_v26 }
 0x228   : > { %v1975_v1 = vpop.f32.mrf.mxu2 }
 0x229   : > { %v2040_v19 = vadd.f32 %v1975_v1, %v1864_v53  ;;  %v2389_v51 = vrot.slane %v2387_v12, 7  ;;  %v2513_v17 = vrot.slane %v2390_v5, 1  ;;  %v2227_v54 = vpack.c.bf16 %v2155_v27, %v2155_v27 }
 0x22a   : > { %v2766_v1 = vpack.c.b16 %v2764_v8, %v2764_v8 }
 0x22b   : > { %v2080_v20 = vmul.f32 %v4715_v52, %v2040_v19  ;;  %v2514_v61 = vor.u32 %v2513_v17, %v2387_v12  ;;  %v4859_v0 = vor.u32 %v2390_v5, %v2389_v51  ;;  %v2299_v34 = vunpack.c.l.b16 %v2227_v54 }
 0x22c   : > { %v2803_v17 = vsel %vm2801_vm10, %v2766_v1, 0 }
 0x22d   : > { %v2120_v10 = vadd.f32 %v4723_v24, %v2080_v20  ;;  %v2560_v2 = vsel %vm4047_vm2, %v2514_v61, 0  ;;  %3850 = vmatpush.bf16.msra.mxu3 %v2803_v17  ;;  %2811 = vmatpush.bf16.msrb.mxu2 %v2803_v17  ;;  %v3827_v61 = vld [vmem:[%s5528_s6 + $0xc] sm:$0xff] }
 0x22e   : > { %2639 = vrot.lane.b32.xlu2 %v2560_v2, %s3915_s25 }
 0x22f   : > { %v2156_v47 = vmax.f32 %v2120_v10, 0.0  ;;  %v1872_v10 = vadd.f32 %v1871_v14, %v1762_v23 }
 0x230   : > { %v1978_v59 = vpop.f32.mrf.mxu2 }
 0x231   : > { %v2228_v28 = vpack.c.bf16 %v2156_v47, %v2156_v47  ;;  %v2041_v39 = vadd.f32 %v1978_v59, %v1867_v30  ;;  %v1767_v47 = vpop.f32.mrf.mxu0  ;;  %v1876_v59 = vpop.f32.mrf.mxu1  ;;  %3851 = vmatpush.bf16.msra.mxu3 %v3827_v61  ;;  %2812 = vmatpush.bf16.msrb.mxu2 %v3827_v61 }
 0x233   : > { %v2081_v36 = vmul.f32 %v4715_v52, %v2041_v39  ;;  %v2300_v21 = vunpack.c.l.b16 %v2228_v28 }
 0x235   : > { %v2327_v16 = vpack.c.b16 %v2300_v21, %v2299_v34  ;;  %v2121_v46 = vadd.f32 %v4723_v24, %v2081_v36 }
 0x237   : > { %2587 = vrot.lane.b32.xlu0 %v2327_v16, %s3914_s22  ;;  %v2394_v13 = vshrl.u32 %v2327_v16, 16  ;;  %v2397_v43 = vshll.u32 %v2327_v16, 16  ;;  %v2157_v3 = vmax.f32 %v2121_v46, 0.0 }
 0x238   : > { %v1980_v53 = vpop.f32.mrf.mxu2 }
 0x239   : > { %v2042_v44 = vadd.f32 %v1980_v53, %v1869_v15  ;;  %v2396_v12 = vrot.slane %v2394_v13, 7  ;;  %v2515_v5 = vrot.slane %v2397_v43, 1  ;;  %v2229_v2 = vpack.c.bf16 %v2157_v3, %v2157_v3  ;;  %v1769_v53 = vpop.f32.mrf.mxu0 }
 0x23a   : > { %v1874_v15 = vadd.f32 %v1873_v18, %v1764_v55 }
 0x23b   : > { %v2082_v49 = vmul.f32 %v4715_v52, %v2042_v44  ;;  %v2516_v19 = vor.u32 %v2515_v5, %v2394_v13  ;;  %v4872_v51 = vor.u32 %v2397_v43, %v2396_v12  ;;  %v2301_v34 = vunpack.c.l.b16 %v2229_v2  ;;  %v1878_v44 = vpop.f32.mrf.mxu1 }
 0x23d   : > { %v2122_v27 = vadd.f32 %v4723_v24, %v2082_v49  ;;  %v2561_v20 = vsel %vm4047_vm2, %v2516_v19, 0  ;;  %v1877_v49 = vadd.f32 %v1876_v59, %v1767_v47 }
 0x23e   : > { %2641 = vrot.lane.b32.xlu1 %v2561_v20, %s3915_s25 }
 0x23f   : > { %v2158_v30 = vmax.f32 %v2122_v27, 0.0 }
 0x240   : > { %v1983_v54 = vpop.f32.mrf.mxu2 }
 0x241   : > { %v2230_v28 = vpack.c.bf16 %v2158_v30, %v2158_v30  ;;  %v2043_v39 = vadd.f32 %v1983_v54, %v1872_v10  ;;  %v1772_v54 = vpop.f32.mrf.mxu0 }
 0x243   : > { %v2083_v36 = vmul.f32 %v4715_v52, %v2043_v39  ;;  %v2302_v21 = vunpack.c.l.b16 %v2230_v28  ;;  %v1881_v28 = vpop.f32.mrf.mxu1 }
 0x245   : > { %v2328_v16 = vpack.c.b16 %v2302_v21, %v2301_v34  ;;  %v2123_v26 = vadd.f32 %v4723_v24, %v2083_v36  ;;  %v1879_v36 = vadd.f32 %v1878_v44, %v1769_v53  ;;  %v2484_v44 = vsel %vm4279_vm6, 0, %v4807_v56 }
 0x247   : > { %2589 = vrot.lane.b32.xlu2 %v2328_v16, %s3914_s22  ;;  %v2401_v23 = vshrl.u32 %v2328_v16, 16  ;;  %v2404_v14 = vshll.u32 %v2328_v16, 16  ;;  %v2159_v12 = vmax.f32 %v2123_v26, 0.0 }
 0x248   : > { %v1985_v46 = vpop.f32.mrf.mxu2 }
 0x249   : > { %v2044_v13 = vadd.f32 %v1985_v46, %v1874_v15  ;;  %v2403_v43 = vrot.slane %v2401_v23, 7  ;;  %v2517_v8 = vrot.slane %v2404_v14, 1  ;;  %v2231_v19 = vpack.c.bf16 %v2159_v12, %v2159_v12 }
 0x24a   : > { %v1882_v12 = vadd.f32 %v1881_v28, %v1772_v54 }
 0x24b   : > { %v2084_v5 = vmul.f32 %v4715_v52, %v2044_v13  ;;  %v2518_v1 = vor.u32 %v2517_v8, %v2401_v23  ;;  %v4886_v3 = vor.u32 %v2404_v14, %v2403_v43  ;;  %v2303_v2 = vunpack.c.l.b16 %v2231_v19  ;;  %v2578_v43 = vpop.permute.xlu2 %2577 }
 0x24d   : > { %v2124_v55 = vadd.f32 %v4723_v24, %v2084_v5  ;;  %v2562_v18 = vsel %vm4047_vm2, %v2518_v1, 0  ;;  %v1774_v5 = vpop.f32.mrf.mxu0  ;;  %v1883_v1 = vpop.f32.mrf.mxu1 }
 0x24e   : > { %2643 = vrot.lane.b32.xlu0 %v2562_v18, %s3915_s25  ;;  %v1884_v54 = vadd.f32 %v1883_v1, %v1774_v5  ;;  %v2485_v5 = vsel %vm4279_vm6, 0, %v4821_v32  ;;  %v3703_v32 = vld [vmem:[%s5528_s6 + $0x20] sm:$0xf] }
 0x24f   : > { %v2160_v17 = vmax.f32 %v2124_v55, 0.0 }
 0x250   : > { %v1988_v27 = vpop.f32.mrf.mxu2 }
 0x251   : > { %v2232_v20 = vpack.c.bf16 %v2160_v17, %v2160_v17  ;;  %v2045_v61 = vadd.f32 %v1988_v27, %v1877_v49  ;;  %v2672_v49 = vsel %vm1425_vm8, %v2484_v44, %v2578_v43 }
 0x253   : > { %v2085_v10 = vmul.f32 %v4715_v52, %v2045_v61  ;;  %v2304_v30 = vunpack.c.l.b16 %v2232_v20 }
 0x255   : > { %v2329_v39 = vpack.c.b16 %v2304_v30, %v2303_v2  ;;  %v2125_v34 = vadd.f32 %v4723_v24, %v2085_v10 }
 0x257   : > { %2591 = vrot.lane.b32.xlu1 %v2329_v39, %s3914_s22  ;;  %v2408_v21 = vshrl.u32 %v2329_v39, 16  ;;  %v2411_v16 = vshll.u32 %v2329_v39, 16  ;;  %v2161_v23 = vmax.f32 %v2125_v34, 0.0 }
 0x258   : > { %v1990_v47 = vpop.f32.mrf.mxu2 }
 0x259   : > { %v2046_v59 = vadd.f32 %v1990_v47, %v1879_v36  ;;  %v2410_v15 = vrot.slane %v2408_v21, 7  ;;  %v2519_v26 = vrot.slane %v2411_v16, 1  ;;  %v2233_v55 = vpack.c.bf16 %v2161_v23, %v2161_v23 }
 0x25b   : > { %v2086_v14 = vmul.f32 %v4715_v52, %v2046_v59  ;;  %v2520_v46 = vor.u32 %v2519_v26, %v2408_v21  ;;  %v4896_v13 = vor.u32 %v2411_v16, %v2410_v15  ;;  %v2305_v10 = vunpack.c.l.b16 %v2233_v55  ;;  %v2754_v59 = vld [vmem:[%s5528_s6 + $0x8] sm:$0xf]  ;;  %v1777_v15 = vpop.f32.mrf.mxu0  ;;  %v1886_v26 = vpop.f32.mrf.mxu1 }
 0x25c   : > { %v2899_v23 = vunpack.c.l.b16 %v2754_v59 }
 0x25d   : > { %v2126_v8 = vadd.f32 %v4723_v24, %v2086_v14  ;;  %v2563_v53 = vsel %vm4047_vm2, %v2520_v46, 0 }
 0x25e   : > { %2645 = vrot.lane.b32.xlu2 %v2563_v53, %s3915_s25  ;;  %v2901_v53 = vpack.c.b16 %v2899_v23, %v2899_v23 }
 0x25f   : > { %v2162_v18 = vmax.f32 %v2126_v8, 0.0 }
 0x260   : > { %v1993_v19 = vpop.f32.mrf.mxu2  ;;  %v2632_v17 = vpop.permute.xlu0 %2631 }
 0x261   : > { %v2234_v27 = vpack.c.bf16 %v2162_v18, %v2162_v18  ;;  %v2047_v20 = vadd.f32 %v1993_v19, %v1882_v12  ;;  %v4907_v61 = vsel %vm2715_vm11, %v2672_v49, %v2632_v17  ;;  %v2906_v18 = vsel %vm2801_vm10, %v2901_v53, 0 }
 0x262   : > { %3667 = vmatmul.msk.bf16.vlgmr.msra.gmra.mxu3 %vm2768_vm12, %v4907_v61  ;;  %v1887_v49 = vadd.f32 %v1886_v26, %v1777_v15 }
 0x263   : > { %v2087_v56 = vmul.f32 %v4715_v52, %v2047_v20  ;;  %v2306_v2 = vunpack.c.l.b16 %v2234_v27  ;;  %2914 = vmatpush.bf16.msrb.mxu3 %v2906_v18  ;;  %v2634_v27 = vpop.permute.xlu2 %2633 }
 0x265   : > { %v2330_v30 = vpack.c.b16 %v2306_v2, %v2305_v10  ;;  %v2127_v28 = vadd.f32 %v4723_v24, %v2087_v56 }
 0x267   : > { %2593 = vrot.lane.b32.xlu0 %v2330_v30, %s3914_s22  ;;  %v2415_v39 = vshrl.u32 %v2330_v30, 16  ;;  %v2418_v36 = vshll.u32 %v2330_v30, 16  ;;  %v2163_v14 = vmax.f32 %v2127_v28, 0.0  ;;  %v3172_v30 = vld [vmem:[%s5530_s8] sm:$0x3] }
 0x268   : > { %v1995_v34 = vpop.f32.mrf.mxu2  ;;  %v3303_v28 = vsel %vm3301_vm13, %v3172_v30, 0 }
 0x269   : > { %v2048_v21 = vadd.f32 %v1995_v34, %v1884_v54  ;;  %v2417_v16 = vrot.slane %v2415_v39, 7  ;;  %v2521_v47 = vrot.slane %v2418_v36, 1  ;;  %v2580_v43 = vpop.permute.xlu1 %2579  ;;  %v2235_v19 = vpack.c.bf16 %v2163_v14, %v2163_v14  ;;  %3312 = vmatpush.bf16.msrb.mxu1 %v3303_v28 }
 0x26a   : > { %v2675_v55 = vsel %vm1425_vm8, %v2485_v5, %v2580_v43  ;;  %v3006_v54 = vunpack.c.l.b16 %v3703_v32 }
 0x26b   : > { %v2088_v46 = vmul.f32 %v4715_v52, %v2048_v21  ;;  %v2522_v8 = vor.u32 %v2521_v47, %v2415_v39  ;;  %v4918_v44 = vor.u32 %v2418_v36, %v2417_v16  ;;  %v4930_v2 = vsel %vm2715_vm11, %v2675_v55, %v2634_v27  ;;  %v1779_v21 = vpop.f32.mrf.mxu0  ;;  %v1888_v16 = vpop.f32.mrf.mxu1 }
 0x26c   : > { %v2307_v36 = vunpack.c.l.b16 %v2235_v19  ;;  %v3008_v47 = vpack.c.b16 %v3006_v54, %v3006_v54  ;;  %v1889_v26 = vadd.f32 %v1888_v16, %v1779_v21 }
 0x26d   : > { %v2128_v12 = vadd.f32 %v4723_v24, %v2088_v46  ;;  %v2564_v1 = vsel %vm4047_vm2, %v2522_v8, 0 }
 0x26e   : > { %2647 = vrot.lane.b32.xlu1 %v2564_v1, %s3915_s25  ;;  %v3013_v15 = vsel %vm2801_vm10, %v3008_v47, 0 }
 0x26f   : > { %v2164_v17 = vmax.f32 %v2128_v12, 0.0  ;;  %3021 = vmatpush.bf16.msrb.mxu0 %v3013_v15 }
 0x270   : > { %v1998_v20 = vpop.f32.mrf.mxu2 }
 0x271   : > { %v2236_v56 = vpack.c.bf16 %v2164_v17, %v2164_v17  ;;  %v2049_v10 = vadd.f32 %v1998_v20, %v1887_v49 }
 0x272   : > { %3668 = vmatmul.msk.bf16.gmra.mxu3 %vm2768_vm12, %v4930_v2 }
 0x273   : > { %v2089_v39 = vmul.f32 %v4715_v52, %v2049_v10  ;;  %v2308_v34 = vunpack.c.l.b16 %v2236_v56  ;;  %v2486_v56 = vsel %vm4279_vm6, 0, %v4835_v29 }
 0x275   : > { %v2331_v59 = vpack.c.b16 %v2308_v34, %v2307_v36  ;;  %v2129_v23 = vadd.f32 %v4723_v24, %v2089_v39 }
 0x277   : > { %2595 = vrot.lane.b32.xlu2 %v2331_v59, %s3914_s22  ;;  %v2422_v14 = vshrl.u32 %v2331_v59, 16  ;;  %v2425_v46 = vshll.u32 %v2331_v59, 16  ;;  %v2165_v5 = vmax.f32 %v2129_v23, 0.0 }
 0x278   : > { %v2000_v43 = vpop.f32.mrf.mxu2 }
 0x279   : > { %v2050_v8 = vadd.f32 %v2000_v43, %v1889_v26  ;;  %v2424_v53 = vrot.slane %v2422_v14, 7  ;;  %v2523_v12 = vrot.slane %v2425_v46, 1  ;;  %v2582_v19 = vpop.permute.xlu0 %2581  ;;  %v2237_v27 = vpack.c.bf16 %v2165_v5, %v2165_v5 }
 0x27a   : > { %v2678_v10 = vsel %vm1425_vm8, %v2486_v56, %v2582_v19 }
 0x27b   : > { %v2090_v1 = vmul.f32 %v4715_v52, %v2050_v8  ;;  %v2524_v55 = vor.u32 %v2523_v12, %v2422_v14  ;;  %v4945_v18 = vor.u32 %v2425_v46, %v2424_v53  ;;  %v2309_v34 = vunpack.c.l.b16 %v2237_v27  ;;  %v2584_v53 = vpop.permute.xlu2 %2583 }
 0x27d   : > { %v2130_v49 = vadd.f32 %v4723_v24, %v2090_v1  ;;  %v2565_v17 = vsel %vm4047_vm2, %v2524_v55, 0 }
 0x27e   : > { %2649 = vrot.lane.b32.xlu0 %v2565_v17, %s3915_s25 }
 0x27f   : > { %v2166_v20 = vmax.f32 %v2130_v49, 0.0 }
 0x280   : > { %v2003_v32 = vpop.f32.mrf.mxu2  ;;  %v2636_v30 = vpop.permute.xlu1 %2635 }
 0x281   : > { %v2238_v54 = vpack.c.bf16 %v2166_v20, %v2166_v20  ;;  %v2051_v28 = vadd.f32 %v2003_v32, %v4657_v7  ;;  %v4957_v39 = vsel %vm2715_vm11, %v2678_v10, %v2636_v30 }
 0x282   : > { %3669 = vmatmul.msk.bf16.gmra.mxu3 %vm2768_vm12, %v4957_v39 }
 0x283   : > { %v2091_v36 = vmul.f32 %v4715_v52, %v2051_v28  ;;  %v2310_v21 = vunpack.c.l.b16 %v2238_v54 }
 0x285   : > { %v2332_v16 = vpack.c.b16 %v2310_v21, %v2309_v34  ;;  %v2131_v29 = vadd.f32 %v4723_v24, %v2091_v36 }
 0x287   : > { %2597 = vrot.lane.b32.xlu1 %v2332_v16, %s3914_s22  ;;  %v2429_v47 = vshrl.u32 %v2332_v16, 16  ;;  %v2432_v59 = vshll.u32 %v2332_v16, 16  ;;  %v2167_v14 = vmax.f32 %v2131_v29, 0.0 }
 0x288   : > { %v2005_v15 = vpop.f32.mrf.mxu2 }
 0x289   : > { %v2052_v7 = vadd.f32 %v2005_v15, %v4664_v63  ;;  %v2431_v26 = vrot.slane %v2429_v47, 7  ;;  %v2525_v23 = vrot.slane %v2432_v59, 1  ;;  %v2487_v63 = vsel %vm4279_vm6, 0, %v4847_v58 }
 0x28a   : > { %v2239_v1 = vpack.c.bf16 %v2167_v14, %v2167_v14  ;;  %v2681_v49 = vsel %vm1425_vm8, %v2487_v63, %v2584_v53 }
 0x28b   : > { %v2092_v46 = vmul.f32 %v4715_v52, %v2052_v7  ;;  %v2526_v43 = vor.u32 %v2525_v23, %v2429_v47  ;;  %v4966_v8 = vor.u32 %v2432_v59, %v2431_v26  ;;  %v2488_v23 = vsel %vm4279_vm6, 0, %v4859_v0 }
 0x28c   : > { %v2311_v32 = vunpack.c.l.b16 %v2239_v1 }
 0x28d   : > { %v2132_v12 = vadd.f32 %v4723_v24, %v2092_v46  ;;  %v2566_v5 = vsel %vm4047_vm2, %v2526_v43, 0  ;;  %v3847_v46 = vld [vmem:[%s3990_s16 + $0x98] sm:$0xff]  }
 0x28e   : > { %2651 = vrot.lane.b32.xlu2 %v2566_v5, %s3915_s25  ;;  %v3843_v63 = vunpack.c.l.bf16 %v3847_v46  ;;  %v3844_v1 = vunpack.c.h.bf16 %v3847_v46 }
 0x28f   : > { %v2168_v55 = vmax.f32 %v2132_v12, 0.0  ;;  %v2640_v12 = vpop.permute.xlu2 %2639 }
 0x290   : > { %v2008_v19 = vpop.f32.mrf.mxu2  ;;  %v2638_v17 = vpop.permute.xlu0 %2637 }
 0x291   : > { %v2240_v27 = vpack.c.bf16 %v2168_v55, %v2168_v55  ;;  %v2053_v20 = vadd.f32 %v2008_v19, %v4678_v41  ;;  %v4978_v56 = vsel %vm2715_vm11, %v2681_v49, %v2638_v17 }
 0x292   : > { %3670 = vmatmul.msk.bf16.gmra.mxu3 %vm2768_vm12, %v4978_v56 }
 0x293   : > { %v2093_v10 = vmul.f32 %v4715_v52, %v2053_v20  ;;  %v2312_v30 = vunpack.c.l.b16 %v2240_v27  ;;  %v3885_v20 = vld [vmem:[%s5523_s1] ss:$0 sm:$0xff] }
 0x295   : > { %v2333_v58 = vpack.c.b16 %v2312_v30, %v2311_v32  ;;  %v2133_v54 = vadd.f32 %v4723_v24, %v2093_v10  ;;  %v485_v10 = vmul.f32 %v3885_v20, %v3843_v63  ;;  %v486_v32 = vmul.f32 %v3885_v20, %v3844_v1 }
 0x297   : > { %2599 = vrot.lane.b32.xlu0 %v2333_v58, %s3914_s22  ;;  %v2436_v28 = vshrl.u32 %v2333_v58, 16  ;;  %v2439_v36 = vshll.u32 %v2333_v58, 16  ;;  %v2169_v29 = vmax.f32 %v2133_v54, 0.0 }
 0x298   : > { %v2010_v34 = vpop.f32.mrf.mxu2 }
 0x299   : > { %v2054_v41 = vadd.f32 %v2010_v34, %v4686_v35  ;;  %v2438_v21 = vrot.slane %v2436_v28, 7  ;;  %v2527_v16 = vrot.slane %v2439_v36, 1  ;;  %v2586_v59 = vpop.permute.xlu1 %2585  ;;  %v2241_v43 = vpack.c.bf16 %v2169_v29, %v2169_v29 }
 0x29a   : > { %v2684_v35 = vsel %vm1425_vm8, %v2488_v23, %v2586_v59 }
 0x29b   : > { %v2094_v47 = vmul.f32 %v4715_v52, %v2054_v41  ;;  %v2528_v15 = vor.u32 %v2527_v16, %v2436_v28  ;;  %v4987_v7 = vor.u32 %v2439_v36, %v2438_v21  ;;  %v5000_v19 = vsel %vm2715_vm11, %v2684_v35, %v2640_v12 }
 0x29c   : > { %v2313_v17 = vunpack.c.l.b16 %v2241_v43  ;;  %v2489_v12 = vsel %vm4279_vm6, 0, %v4872_v51  ;;  %v2503_v51 = vrot.slane %v2355_v22, 1 }
 0x29d   : > { %v2134_v26 = vadd.f32 %v4723_v24, %v2094_v47  ;;  %v2567_v14 = vsel %vm4047_vm2, %v2528_v15, 0 }
 0x29e   : > { %2653 = vrot.lane.b32.xlu1 %v2567_v14, %s3915_s25  ;;  %v5025_v14 = vld [vmem:[%s5527_s5] ss:$0 sm:$0xff] }
 0x29f   : > { %v2170_v53 = vmax.f32 %v2134_v26, 0.0 }
 0x2a0   : > { %v2013_v5 = vpop.f32.mrf.mxu2 }
 0x2a1   : > { %v2242_v55 = vpack.c.bf16 %v2170_v53, %v2170_v53  ;;  %v2055_v49 = vadd.f32 %v2013_v5, %v4696_v25 }
 0x2a2   : > { %3671 = vmatmul.msk.bf16.gmra.mxu3 %vm2768_vm12, %v5000_v19 }
 0x2a3   : > { %v2095_v0 = vmul.f32 %v4715_v52, %v2055_v49  ;;  %v2314_v27 = vunpack.c.l.b16 %v2242_v55  ;;  %v3886_v52 = vld [vmem:[%s5524_s2] ss:$0 sm:$0xff] }
 0x2a4   : > { %v529_v36 = vadd.f32 %v3886_v52, %v485_v10  ;;  %v530_v34 = vadd.f32 %v3886_v52, %v486_v32 }
 0x2a5   : > { %v2334_v30 = vpack.c.b16 %v2314_v27, %v2313_v17  ;;  %v2135_v58 = vadd.f32 %v4723_v24, %v2095_v0  ;;  %v5017_v24 = vld [vmem:[%s5526_s4] ss:$0 sm:$0xff] }
 0x2a6   : > { %v569_v15 = vmax.f32 %v529_v36, 0.0  ;;  %v570_v26 = vmax.f32 %v530_v34, 0.0  ;;  %v2504_v34 = vor.u32 %v2503_v51, %v2352_v57  ;;  %v2493_v51 = vsel %vm4279_vm6, 0, %v4945_v18 }
 0x2a7   : > { %2601 = vrot.lane.b32.xlu2 %v2334_v30, %s3914_s22  ;;  %v2443_v25 = vshrl.u32 %v2334_v30, 16  ;;  %v2446_v54 = vshll.u32 %v2334_v30, 16  ;;  %v2171_v29 = vmax.f32 %v2135_v58, 0.0  ;;  %v2499_v30 = vrot.slane %v2341_v45, 1  ;;  %v2590_v45 = vpop.permute.xlu2 %2589 }
 0x2a8   : > { %v2015_v28 = vpop.f32.mrf.mxu2  ;;  %v856_v1 = vmul.f32 0.0, %v569_v15  ;;  %v857_v55 = vmul.f32 0.0, %v570_v26 }
 0x2a9   : > { %v2056_v41 = vadd.f32 %v2015_v28, %v4700_v60  ;;  %v2445_v21 = vrot.slane %v2443_v25, 7  ;;  %v2529_v16 = vrot.slane %v2446_v54, 1  ;;  %v2588_v46 = vpop.permute.xlu0 %2587  ;;  %v2243_v43 = vpack.c.bf16 %v2171_v29, %v2171_v29 }
 0x2aa   : > { %v2687_v5 = vsel %vm1425_vm8, %v2489_v12, %v2588_v46  ;;  %v896_v20 = vpack.c.bf16 %v856_v1, %v856_v1  ;;  %v897_v10 = vpack.c.bf16 %v857_v55, %v857_v55  ;;  %v2500_v22 = vor.u32 %v2499_v30, %v2338_v50 }
 0x2ab   : > { %v2096_v47 = vmul.f32 %v5017_v24, %v2056_v41  ;;  %v2530_v59 = vor.u32 %v2529_v16, %v2443_v25  ;;  %v5020_v23 = vor.u32 %v2446_v54, %v2445_v21  ;;  %v2315_v17 = vunpack.c.l.b16 %v2243_v43 }
 0x2ac   : > { %v976_v54 = vunpack.c.l.b16 %v896_v20  ;;  %v977_v28 = vunpack.c.l.b16 %v897_v10  ;;  %v2490_v50 = vsel %vm4279_vm6, 0, %v4886_v3  ;;  %v2501_v3 = vrot.slane %v2348_v6, 1 }
 0x2ad   : > { %v2136_v60 = vadd.f32 %v5025_v14, %v2096_v47  ;;  %v2568_v35 = vsel %vm4047_vm2, %v2530_v59, 0  ;;  %v2555_v47 = vsel %vm4047_vm2, %v2504_v34, 0  ;;  %v2690_v57 = vsel %vm1425_vm8, %v2490_v50, %v2590_v45 }
 0x2ae   : > { %2655 = vrot.lane.b32.xlu0 %v2568_v35, %s3915_s25  ;;  %v5053_v16 = vpack.c.b16 %v977_v28, %v976_v54  ;;  %v2502_v43 = vor.u32 %v2501_v3, %v2345_v42  ;;  %v2491_v6 = vsel %vm4279_vm6, 0, %v4896_v13  ;;  %v3826_v42 = vld [vmem:[%s5528_s6] sm:$0xff]  ;;  %v3828_v13 = vld [vmem:[%s5528_s6 + $0x18] sm:$0xff]  ;;  %v2492_v55 = vsel %vm4279_vm6, 0, %v4918_v44 }
 0x2af   : > { %v2172_v53 = vmax.f32 %v2136_v60, 0.0  ;;  %2915 = vmatpush.bf16.msrb.mxu3 %v3826_v42  ;;  %3022 = vmatpush.bf16.msrb.mxu0 %v3828_v13  ;;  %v2494_v28 = vsel %vm4279_vm6, 0, %v4966_v8  ;;  %v2495_v8 = vsel %vm4279_vm6, 0, %v4987_v7  ;;  %v2483_v13 = vsel %vm4279_vm6, 0, %v4792_v33 }
 0x2b0   : > { %v2642_v63 = vpop.permute.xlu1 %2641  ;;  %v1135_v15 = vshll.u32 %v5053_v16, 16  ;;  %v1132_v60 = vshrl.u32 %v5053_v16, 16 }
 0x2b1   : > { %v2244_v49 = vpack.c.bf16 %v2172_v53, %v2172_v53  ;;  %v5036_v0 = vsel %vm2715_vm11, %v2687_v5, %v2642_v63 }
 0x2b2   : > { %3672 = vmatmul.msk.bf16.gmra.mxu3 %vm2768_vm12, %v5036_v0  ;;  %v1219_v46 = vrot.slane %v1135_v15, 1  ;;  %v1134_v33 = vrot.slane %v1132_v60, 7 }
 0x2b3   : > { %v2316_v27 = vunpack.c.l.b16 %v2244_v49 }
 0x2b4   : > { %v1220_v35 = vor.u32 %v1219_v46, %v1132_v60  ;;  %v2496_v46 = vsel %vm4279_vm6, 0, %v5020_v23 }
 0x2b5   : > { %v2335_v32 = vpack.c.b16 %v2316_v27, %v2315_v17 }
 0x2b6   : > { %2571 = vrot.lane.b32.xlu0 %v4742_v38, %s3914_s22  ;;  %v2553_v38 = vsel %vm4047_vm2, %v2500_v22, 0  ;;  %v1263_v12 = vsel %vm4047_vm2, %v1220_v35, 0 }
 0x2b7   : > { %2603 = vrot.lane.b32.xlu1 %v2335_v32, %s3914_s22  ;;  %v2450_v58 = vshrl.u32 %v2335_v32, 16  ;;  %v2453_v25 = vshll.u32 %v2335_v32, 16 }
 0x2b8   : > { %v2646_v63 = vpop.permute.xlu2 %2645 }
 0x2b9   : > { %v2452_v52 = vrot.slane %v2450_v58, 7  ;;  %v2531_v36 = vrot.slane %v2453_v25, 1 }
 0x2bb   : > { %v2532_v41 = vor.u32 %v2531_v36, %v2450_v58  ;;  %v5051_v21 = vor.u32 %v2453_v25, %v2452_v52 }
 0x2bd   : > { %v2569_v29 = vsel %vm4047_vm2, %v2532_v41, 0 }
 0x2be   : > { %2657 = vrot.lane.b32.xlu2 %v2569_v29, %s3915_s25  ;;  %2629 = vrot.lane.b32.xlu0 %v2555_v47, %s3915_s25 }
 0x2bf   : > { %2625 = vrot.lane.b32.xlu1 %v2553_v38, %s3915_s25 }
 0x2c0   : > { %v2644_v59 = vpop.permute.xlu0 %2643 }
 0x2c1   : > { %v5070_v26 = vsel %vm2715_vm11, %v2690_v57, %v2644_v59 }
 0x2c2   : > { %3673 = vmatmul.msk.bf16.gmra.mxu3 %vm2768_vm12, %v5070_v26 }
 0x2c6   : > { %2575 = vrot.lane.b32.xlu2 %v4780_v37, %s3914_s22  ;;  %1302 = vrot.lane.b32.xlu0 %v5053_v16, %s3913_s21  ;;  %v2554_v37 = vsel %vm4047_vm2, %v2502_v43, 0 }
 0x2c7   : > { %2573 = vrot.lane.b32.xlu1 %v4759_v62, %s3914_s22 }
 0x2c9   : > { %v2592_v53 = vpop.permute.xlu1 %2591 }
 0x2ca   : > { %v2693_v5 = vsel %vm1425_vm8, %v2491_v6, %v2592_v53 }
 0x2cb   : > { %v5100_v62 = vsel %vm2715_vm11, %v2693_v5, %v2646_v63  ;;  %v2497_v5 = vsel %vm4279_vm6, 0, %v5051_v21  ;;  %v3807_v63 = vld [vmem:[%s3990_s16 + $0x10] sm:$0xff] }
 0x2cc   : > { %3788 = vmatmul.msk.bf16.vlgmr.msrb.gmra.mxu1 %vm1364_vm7, %v3807_v63 }
 0x2ce   : > { %2627 = vrot.lane.b32.xlu2 %v2554_v37, %s3915_s25 }
 0x2cf   : > { %1362 = vrot.lane.b32.xlu1 %v1263_v12, %s3914_s22 }
 0x2d1   : > { %v2596_v10 = vpop.permute.xlu2 %2595 }
 0x2d2   : > { %3674 = vmatmul.msk.bf16.gmra.mxu3 %vm2768_vm12, %v5100_v62  ;;  %v2699_v44 = vsel %vm1425_vm8, %v2493_v51, %v2596_v10  ;;  %v1137_v51 = vor.u32 %v1135_v15, %v1134_v33 }
 0x2d9   : > { %v2594_v1 = vpop.permute.xlu0 %2593 }
 0x2da   : > { %v2696_v49 = vsel %vm1425_vm8, %v2492_v55, %v2594_v1 }
 0x2e0   : > { %v2648_v17 = vpop.permute.xlu1 %2647 }
 0x2e1   : > { %v5115_v27 = vsel %vm2715_vm11, %v2696_v49, %v2648_v17 }
 0x2e2   : > { %3675 = vmatmul.msk.bf16.gmra.mxu3 %vm2768_vm12, %v5115_v27 }
 0x2e5   : > { %v5119_v20 = vpop.f32.mrf.mxu3 }
 0x2e8   : > { %v2652_v36 = vpop.permute.xlu2 %2651 }
 0x2ed   : > { %v5121_v32 = vpop.f32.mrf.mxu3 }
 0x2f0   : > { %v2650_v30 = vpop.permute.xlu0 %2649 }
 0x2f1   : > { %v5128_v58 = vsel %vm2715_vm11, %v2699_v44, %v2650_v30  ;;  %v1180_v30 = vsel %vm4279_vm6, 0, %v1137_v51 }
 0x2f2   : > { %3676 = vmatmul.msk.bf16.gmra.mxu3 %vm2768_vm12, %v5128_v58 }
 0x2f5   : > { %v5132_v25 = vpop.f32.mrf.mxu3 }
 0x2f9   : > { %v2598_v54 = vpop.permute.xlu1 %2597 }
 0x2fa   : > { %v2702_v18 = vsel %vm1425_vm8, %v2494_v28, %v2598_v54 }
 0x2fb   : > { %v5141_v34 = vsel %vm2715_vm11, %v2702_v18, %v2652_v36  ;;  %v3808_v18 = vld [vmem:[%s3990_s16 + $0x18] sm:$0xff]  ;;  %v2481_v36 = vsel %vm4279_vm6, 0, %v4755_v11 }
 0x2fc   : > { %3789 = vmatmul.msk.bf16.gmra.mxu1 %vm1364_vm7, %v3808_v18 }
 0x2fd   : > { %v5137_v52 = vpop.f32.mrf.mxu3 }
 0x301   : > { %v2602_v57 = vpop.permute.xlu2 %2601 }
 0x302   : > { %3677 = vmatmul.msk.bf16.gmra.mxu3 %vm2768_vm12, %v5141_v34  ;;  %v2708_v7 = vsel %vm1425_vm8, %v2496_v46, %v2602_v57  ;;  %v3809_v57 = vld [vmem:[%s3990_s16 + $0x20] sm:$0xff] }
 0x305   : > { %v5145_v22 = vpop.f32.mrf.mxu3 }
 0x309   : > { %v2600_v41 = vpop.permute.xlu0 %2599 }
 0x30a   : > { %v2705_v29 = vsel %vm1425_vm8, %v2495_v8, %v2600_v41 }
 0x30c   : > { %3790 = vmatmul.msk.bf16.gmra.mxu1 %vm1364_vm7, %v3809_v57 }
 0x30d   : > { %v5147_v45 = vpop.f32.mrf.mxu3 }
 0x310   : > { %v2654_v47 = vpop.permute.xlu1 %2653 }
 0x311   : > { %v5154_v38 = vsel %vm2715_vm11, %v2705_v29, %v2654_v47  ;;  %v2482_v29 = vsel %vm4279_vm6, 0, %v4773_v31 }
 0x312   : > { %3678 = vmatmul.msk.bf16.gmra.mxu3 %vm2768_vm12, %v5154_v38 }
 0x315   : > { %v5158_v50 = vpop.f32.mrf.mxu3 }
 0x318   : > { %v2658_v43 = vpop.permute.xlu2 %2657 }
 0x31d   : > { %v5160_v59 = vpop.f32.mrf.mxu3 }
 0x320   : > { %v2656_v3 = vpop.permute.xlu0 %2655  ;;  %v2576_v37 = vpop.permute.xlu2 %2575 }
 0x321   : > { %v5167_v35 = vsel %vm2715_vm11, %v2708_v7, %v2656_v3  ;;  %v2669_v1 = vsel %vm1425_vm8, %v2483_v13, %v2576_v37  ;;  %v3812_v13 = vld [vmem:[%s3990_s16 + $0x38] sm:$0xff] }
 0x322   : > { %3679 = vmatmul.msk.bf16.gmra.mxu3 %vm2768_vm12, %v5167_v35 }
 0x325   : > { %v5171_v53 = vpop.f32.mrf.mxu3 }
 0x328   : > { %v2572_v12 = vpop.permute.xlu0 %2571  ;;  %v2628_v7 = vpop.permute.xlu2 %2627 }
 0x329   : > { %v2604_v6 = vpop.permute.xlu1 %2603  ;;  %v2663_v16 = vsel %vm1425_vm8, %v2481_v36, %v2572_v12  ;;  %v3810_v12 = vld [vmem:[%s3990_s16 + $0x28] sm:$0xff] }
 0x32a   : > { %v2711_v42 = vsel %vm1425_vm8, %v2497_v5, %v2604_v6  ;;  %3791 = vmatmul.msk.bf16.gmra.mxu1 %vm1364_vm7, %v3810_v12  ;;  %v3811_v5 = vld [vmem:[%s3990_s16 + $0x30] sm:$0xff] }
 0x32b   : > { %v5187_v21 = vsel %vm2715_vm11, %v2711_v42, %v2658_v43 }
 0x32d   : > { %v5176_v23 = vpop.f32.mrf.mxu3 }
 0x330   : > { %v2630_v55 = vpop.permute.xlu0 %2629 }
 0x331   : > { %v2721_v49 = vsel %vm2715_vm11, %v2669_v1, %v2630_v55  ;;  %v2626_v17 = vpop.permute.xlu1 %2625  ;;  %v3813_v55 = vld [vmem:[%s3990_s16 + $0x40] sm:$0xff] }
 0x332   : > { %3680 = vmatmul.msk.bf16.gmra.mxu3 %vm2768_vm12, %v5187_v21  ;;  %3708 = vmatmul.msk.bf16.vlgmr.msrb.gmra.mxu0 %vm2768_vm12, %v2721_v49  ;;  %v2717_v15 = vsel %vm2715_vm11, %v2663_v16, %v2626_v17  ;;  %v3814_v17 = vld [vmem:[%s3990_s16 + $0x48] sm:$0xff]  ;;  %v3816_v16 = vld [vmem:[%s3990_s16 + $0x58] sm:$0xff] }
 0x335   : > { %v5194_v10 = vpop.f32.mrf.mxu3 }
 0x338   : > { %v1303_v54 = vpop.permute.xlu0 %1302 }
 0x339   : > { %v2574_v44 = vpop.permute.xlu1 %2573  ;;  %v1424_v60 = vsel %vm1364_vm7, %v1180_v30, %v1303_v54 }
 0x33a   : > { %v2666_v46 = vsel %vm1425_vm8, %v2482_v29, %v2574_v44  ;;  %3792 = vmatmul.msk.bf16.gmra.mxu1 %vm1364_vm7, %v3811_v5  ;;  %v3815_v44 = vld [vmem:[%s3990_s16 + $0x50] sm:$0xff]  ;;  %v3817_v5 = vld [vmem:[%s3990_s16 + $0x60] sm:$0xff] }
 0x33b   : > { %v2719_v3 = vsel %vm2715_vm11, %v2666_v46, %v2628_v7 }
 0x33d   : > { %v5200_v28 = vpop.f32.mrf.mxu3 }
 0x341   : > { %v1363_v41 = vpop.permute.xlu1 %1362 }
 0x342   : > { %v1465_v8 = vsel %vm1425_vm8, %v1424_v60, %v1363_v41  ;;  %3685 = vmatmul.msk.bf16.vlgmr.msrb.gmra.mxu3 %vm2768_vm12, %v2717_v15  ;;  %3709 = vmatmul.msk.bf16.gmra.mxu0 %vm2768_vm12, %v4907_v61 }
 0x343   : > { %3657 = vmatmul.msk.bf16.gmra.mxu2 %vm1662_vm9, %v1465_v8 }
 0x345   : > { %v5215_v11 = vpop.f32.mrf.mxu3 }
 0x34a   : > { %3793 = vmatmul.msk.bf16.gmra.mxu1 %vm1364_vm7, %v3812_v13 }
 0x34d   : > { %v5220_v47 = vpop.f32.mrf.mxu3 }
 0x352   : > { %3686 = vmatmul.msk.bf16.gmra.mxu3 %vm2768_vm12, %v2719_v3  ;;  %3710 = vmatmul.msk.bf16.gmra.mxu0 %vm2768_vm12, %v4930_v2 }
 0x353   : > { %3665 = vmatmul.msk.bf16.vlgmr.msrb.gmra.mxu2 %vm2768_vm12, %v2719_v3 }
 0x355   : > { %v5230_v31 = vpop.f32.mrf.mxu3 }
 0x35a   : > { %3794 = vmatmul.msk.bf16.gmra.mxu1 %vm1364_vm7, %v3813_v55 }
 0x35d   : > { %v5232_v43 = vpop.f32.mrf.mxu3 }
 0x362   : > { %3687 = vmatmul.msk.bf16.gmra.mxu3 %vm2768_vm12, %v2721_v49  ;;  %3711 = vmatmul.msk.bf16.gmra.mxu0 %vm2768_vm12, %v4957_v39 }
 0x363   : > { %3666 = vmatmul.msk.bf16.gmra.mxu2 %vm2768_vm12, %v2721_v49 }
 0x365   : > { %v5240_v6 = vpop.f32.mrf.mxu3 }
 0x36a   : > { %3795 = vmatmul.msk.bf16.gmra.mxu1 %vm1364_vm7, %v3814_v17 }
 0x36d   : > { %v5242_v37 = vpop.f32.mrf.mxu3 }
 0x372   : > { %3688 = vmatmul.msk.bf16.gmra.mxu3 %vm2768_vm12, %v4907_v61  ;;  %3712 = vmatmul.msk.bf16.gmra.mxu0 %vm2768_vm12, %v4978_v56 }
 0x375   : > { %v5250_v63 = vpop.f32.mrf.mxu3 }
 0x37a   : > { %3796 = vmatmul.msk.bf16.gmra.mxu1 %vm1364_vm7, %v3815_v44 }
 0x37d   : > { %v5252_v42 = vpop.f32.mrf.mxu3 }
 0x382   : > { %3689 = vmatmul.msk.bf16.gmra.mxu3 %vm2768_vm12, %v4930_v2  ;;  %3713 = vmatmul.msk.bf16.gmra.mxu0 %vm2768_vm12, %v5000_v19 }
 0x385   : > { %v5260_v1 = vpop.f32.mrf.mxu3 }
 0x38a   : > { %3797 = vmatmul.msk.bf16.gmra.mxu1 %vm1364_vm7, %v3816_v16 }
 0x38d   : > { %v5262_v61 = vpop.f32.mrf.mxu3 }
 0x392   : > { %3690 = vmatmul.msk.bf16.gmra.mxu3 %vm2768_vm12, %v4957_v39  ;;  %3714 = vmatmul.msk.bf16.gmra.mxu0 %vm2768_vm12, %v5036_v0  ;;  %v3314_v39 = vpop.f32.mrf.mxu1 }
 0x395   : > { %v5270_v49 = vpop.f32.mrf.mxu3 }
 0x39a   : > { %v5290_v54 = vpop.f32.mrf.mxu1  ;;  %3798 = vmatmul.msk.bf16.gmra.mxu1 %vm1364_vm7, %v3817_v5 }
 0x39d   : > { %v5272_v2 = vpop.f32.mrf.mxu3 }
 0x3a2   : > { %3691 = vmatmul.msk.bf16.gmra.mxu3 %vm2768_vm12, %v4978_v56  ;;  %3715 = vmatmul.msk.bf16.gmra.mxu0 %vm2768_vm12, %v5070_v26  ;;  %v5294_v36 = vpop.f32.mrf.mxu1 }
 0x3a5   : > { %v5280_v33 = vpop.f32.mrf.mxu3 }
 0x3ad   : > { %v5282_v51 = vpop.f32.mrf.mxu3 }
 0x3ae   : > { %5536 = vst [vmem:[#allocation2_spill] sm:$0xff] %v5282_v51 }
 0x3af   : > { %v3024_v30 = vpop.f32.mrf.mxu0 }
 0x3b2   : > { %3692 = vmatmul.msk.bf16.gmra.mxu3 %vm2768_vm12, %v5000_v19  ;;  %3716 = vmatmul.msk.bf16.gmra.mxu0 %vm2768_vm12, %v5100_v62  ;;  %v5306_v19 = vpop.f32.mrf.mxu1 }
 0x3b5   : > { %v5292_v56 = vpop.f32.mrf.mxu3 }
 0x3b6   : > { %5537 = vst [vmem:[#allocation3_spill] sm:$0xff] %v5292_v56 }
 0x3b7   : > { %v3026_v18 = vpop.f32.mrf.mxu0 }
 0x3ba   : > { %v5313_v3 = vpop.f32.mrf.mxu1 }
 0x3bd   : > { %v5296_v60 = vpop.f32.mrf.mxu3 }
 0x3be   : > { %5538 = vst [vmem:[#allocation4_spill] sm:$0xff] %v5296_v60 }
 0x3bf   : > { %v5299_v15 = vpop.f32.mrf.mxu0 }
 0x3c2   : > { %3693 = vmatmul.msk.bf16.gmra.mxu3 %vm2768_vm12, %v5036_v0  ;;  %3717 = vmatmul.msk.bf16.gmra.mxu0 %vm2768_vm12, %v5115_v27 }
 0x3c5   : > { %v2917_v41 = vpop.f32.mrf.mxu3 }
 0x3c6   : > { %v2018_v8 = vpop.f32.mrf.mxu2 }
 0x3c7   : > { %v2057_v29 = vadd.f32 %v2018_v8, %v4706_v4  ;;  %v5309_v57 = vpop.f32.mrf.mxu0  ;;  %v5324_v8 = vpop.f32.mrf.mxu1 }
 0x3c9   : > { %v2097_v46 = vmul.f32 %v5017_v24, %v2057_v29 }
 0x3cb   : > { %v2137_v7 = vadd.f32 %v5025_v14, %v2097_v46 }
 0x3cd   : > { %v2919_v12 = vpop.f32.mrf.mxu3  ;;  %v2173_v13 = vmax.f32 %v2137_v7, 0.0 }
 0x3ce   : > { %v2020_v0 = vpop.f32.mrf.mxu2 }
 0x3cf   : > { %v2058_v55 = vadd.f32 %v2020_v0, %v4708_v48  ;;  %v3034_v17 = vpop.f32.mrf.mxu0  ;;  %v2209_v4 = vmul.f32 0.0, %v2173_v13 }
 0x3d1   : > { %v2098_v44 = vmul.f32 %v5017_v24, %v2058_v55  ;;  %v2245_v7 = vpack.c.bf16 %v2209_v4, %v2209_v4  ;;  %v5329_v24 = vld [vmem:[%s5529_s7] ss:$0 sm:$0xff] }
 0x3d2   : > { %3694 = vmatmul.msk.bf16.gmra.mxu3 %vm2768_vm12, %v5070_v26  ;;  %3718 = vmatmul.msk.bf16.gmra.mxu0 %vm2768_vm12, %v5128_v58 }
 0x3d3   : > { %v2138_v16 = vadd.f32 %v5025_v14, %v2098_v44  ;;  %v2317_v13 = vunpack.c.l.b16 %v2245_v7 }
 0x3d5   : > { %v2174_v29 = vmax.f32 %v2138_v16, 0.0  ;;  %v2922_v46 = vpop.f32.mrf.mxu3  ;;  %v5333_v16 = vpop.f32.mrf.mxu1 }
 0x3d6   : > { %v2814_v48 = vpop.f32.mrf.mxu2 }
 0x3d7   : > { %v2210_v5 = vmul.f32 0.0, %v2174_v29  ;;  %v2918_v0 = vadd.f32 %v2917_v41, %v2814_v48  ;;  %v3036_v26 = vpop.f32.mrf.mxu0  ;;  %v3818_v29 = vld [vmem:[%s3990_s16 + $0x68] sm:$0xff] }
 0x3d8   : > { %3799 = vmatmul.msk.bf16.gmra.mxu1 %vm1364_vm7, %v3818_v29 }
 0x3d9   : > { %v2246_v55 = vpack.c.bf16 %v2210_v5, %v2210_v5  ;;  %v3104_v60 = vadd.f32 %v3024_v30, %v2918_v0 }
 0x3db   : > { %v3140_v14 = vadd.f32 %v5329_v24, %v3104_v60  ;;  %v2318_v44 = vunpack.c.l.b16 %v2246_v55 }
 0x3dd   : > { %v3394_v56 = vadd.f32 %v3314_v39, %v3140_v14  ;;  %v2924_v51 = vpop.f32.mrf.mxu3  ;;  %v2336_v4 = vpack.c.b16 %v2318_v44, %v2317_v13  ;;  %v3331_v13 = vpop.f32.mrf.mxu1 }
 0x3de   : > { %v2816_v41 = vpop.f32.mrf.mxu2 }
 0x3df   : > { %v3426_v30 = vpack.c.bf16 %v3394_v56, %v3394_v56  ;;  %v2920_v48 = vadd.f32 %v2919_v12, %v2816_v41  ;;  %v3039_v5 = vpop.f32.mrf.mxu0  ;;  %2605 = vrot.lane.b32.xlu2 %v2336_v4, %s3914_s22  ;;  %v2457_v60 = vshrl.u32 %v2336_v4, 16  ;;  %v2460_v7 = vshll.u32 %v2336_v4, 16 }
 0x3e1   : > { %3459 = vst.msk [vmem:[%s5339_s26] sm:$0xf] %vm3458_vm14, %v3426_v30  ;;  %v3105_v39 = vadd.f32 %v3026_v18, %v2920_v48  ;;  %v2533_v0 = vrot.slane %v2460_v7, 1  ;;  %v2459_v55 = vrot.slane %v2457_v60, 7 }
 0x3e2   : > { %3695 = vmatmul.msk.bf16.gmra.mxu3 %vm2768_vm12, %v5100_v62  ;;  %3719 = vmatmul.msk.bf16.gmra.mxu0 %vm2768_vm12, %v5141_v34 }
 0x3e3   : > { %v3141_v56 = vadd.f32 %v5329_v24, %v3105_v39  ;;  %v2534_v12 = vor.u32 %v2533_v0, %v2457_v60  ;;  %v5350_v14 = vor.u32 %v2460_v7, %v2459_v55 }
 0x3e5   : > { %v3395_v44 = vadd.f32 %v5290_v54, %v3141_v56  ;;  %v2927_v4 = vpop.f32.mrf.mxu3  ;;  %v2570_v18 = vsel %vm4047_vm2, %v2534_v12, 0  ;;  %v3819_v56 = vld [vmem:[%s3990_s16 + $0x70] sm:$0xff] }
 0x3e6   : > { %v2928_v29 = vadd.f32 %v2927_v4, %v5119_v20  ;;  %v2819_v62 = vpop.f32.mrf.mxu2  ;;  %2659 = vrot.lane.b32.xlu0 %v2570_v18, %s3915_s25  ;;  %v3334_v20 = vpop.f32.mrf.mxu1 }
 0x3e7   : > { %v3427_v41 = vpack.c.bf16 %v3395_v44, %v3395_v44  ;;  %v2923_v30 = vadd.f32 %v2922_v46, %v2819_v62  ;;  %v3041_v48 = vpop.f32.mrf.mxu0 }
 0x3e8   : > { %v3108_v39 = vadd.f32 %v3034_v17, %v2928_v29  ;;  %3800 = vmatmul.msk.bf16.gmra.mxu1 %vm1364_vm7, %v3819_v56 }
 0x3e9   : > { %3460 = vst.msk [vmem:[%s5339_s26 + $0x4] sm:$0xf] %vm3458_vm14, %v3427_v41  ;;  %v3106_v60 = vadd.f32 %v5299_v15, %v2923_v30 }
 0x3ea   : > { %v3144_v54 = vadd.f32 %v5329_v24, %v3108_v39 }
 0x3eb   : > { %v3142_v9 = vadd.f32 %v5329_v24, %v3106_v60 }
 0x3ec   : > { %v3398_v7 = vadd.f32 %v5313_v3, %v3144_v54 }
 0x3ed   : > { %v3396_v0 = vadd.f32 %v5294_v36, %v3142_v9  ;;  %v2929_v55 = vpop.f32.mrf.mxu3 }
 0x3ee   : > { %v3430_v46 = vpack.c.bf16 %v3398_v7, %v3398_v7  ;;  %v2930_v17 = vadd.f32 %v2929_v55, %v5121_v32  ;;  %v2821_v12 = vpop.f32.mrf.mxu2  ;;  %v3336_v29 = vpop.f32.mrf.mxu1  ;;  %v3820_v7 = vld [vmem:[%s3990_s16 + $0x78] sm:$0xff] }
 0x3ef   : > { %v3428_v44 = vpack.c.bf16 %v3396_v0, %v3396_v0  ;;  %v2925_v4 = vadd.f32 %v2924_v51, %v2821_v12  ;;  %v3044_v18 = vpop.f32.mrf.mxu0 }
 0x3f0   : > { %3463 = vst.msk [vmem:[%s5339_s26 + $0x10] sm:$0xf] %vm3458_vm14, %v3430_v46  ;;  %v3109_v15 = vadd.f32 %v3036_v26, %v2930_v17 }
 0x3f1   : > { %3461 = vst.msk [vmem:[%s5339_s26 + $0x8] sm:$0xf] %vm3458_vm14, %v3428_v44  ;;  %v3107_v36 = vadd.f32 %v5309_v57, %v2925_v4 }
 0x3f2   : > { %3696 = vmatmul.msk.bf16.gmra.mxu3 %vm2768_vm12, %v5115_v27  ;;  %3720 = vmatmul.msk.bf16.gmra.mxu0 %vm2768_vm12, %v5154_v38  ;;  %v3145_v32 = vadd.f32 %v5329_v24, %v3109_v15 }
 0x3f3   : > { %v3143_v51 = vadd.f32 %v5329_v24, %v3107_v36  ;;  %v3821_v36 = vld [vmem:[%s3990_s16 + $0x80] sm:$0xff] }
 0x3f4   : > { %v3399_v3 = vadd.f32 %v5324_v8, %v3145_v32 }
 0x3f5   : > { %v3397_v26 = vadd.f32 %v5306_v19, %v3143_v51  ;;  %v2932_v62 = vpop.f32.mrf.mxu3 }
 0x3f6   : > { %v3431_v41 = vpack.c.bf16 %v3399_v3, %v3399_v3  ;;  %v2933_v57 = vadd.f32 %v2932_v62, %v5132_v25  ;;  %v3339_v8 = vpop.f32.mrf.mxu1 }
 0x3f7   : > { %v3429_v30 = vpack.c.bf16 %v3397_v26, %v3397_v26  ;;  %v3046_v27 = vpop.f32.mrf.mxu0 }
 0x3f8   : > { %3464 = vst.msk [vmem:[%s5339_s26 + $0x14] sm:$0xf] %vm3458_vm14, %v3431_v41  ;;  %v3110_v39 = vadd.f32 %v3039_v5, %v2933_v57  ;;  %3801 = vmatmul.msk.bf16.gmra.mxu1 %vm1364_vm7, %v3820_v7 }
 0x3f9   : > { %3462 = vst.msk [vmem:[%s5339_s26 + $0xc] sm:$0xf] %vm3458_vm14, %v3429_v30 }
 0x3fa   : > { %v3146_v60 = vadd.f32 %v5329_v24, %v3110_v39 }
 0x3fc   : > { %v3400_v54 = vadd.f32 %v5333_v16, %v3146_v60 }
 0x3fd   : > { %v2934_v9 = vpop.f32.mrf.mxu3 }
 0x3fe   : > { %v3432_v19 = vpack.c.bf16 %v3400_v54, %v3400_v54  ;;  %v2935_v0 = vadd.f32 %v2934_v9, %v5137_v52  ;;  %v3341_v56 = vpop.f32.mrf.mxu1 }
 0x3ff   : > { %v3049_v55 = vpop.f32.mrf.mxu0 }
 0x400   : > { %3465 = vst.msk [vmem:[%s5339_s26 + $0x18] sm:$0xf] %vm3458_vm14, %v3432_v19  ;;  %v3111_v25 = vadd.f32 %v3041_v48, %v2935_v0 }
 0x402   : > { %3697 = vmatmul.msk.bf16.gmra.mxu3 %vm2768_vm12, %v5128_v58  ;;  %3721 = vmatmul.msk.bf16.gmra.mxu0 %vm2768_vm12, %v5167_v35  ;;  %v3147_v16 = vadd.f32 %v5329_v24, %v3111_v25 }
 0x404   : > { %v3401_v5 = vadd.f32 %v3331_v13, %v3147_v16 }
 0x405   : > { %v2937_v46 = vpop.f32.mrf.mxu3 }
 0x406   : > { %v3433_v52 = vpack.c.bf16 %v3401_v5, %v3401_v5  ;;  %v2938_v17 = vadd.f32 %v2937_v46, %v5145_v22  ;;  %v3344_v58 = vpop.f32.mrf.mxu1 }
 0x407   : > { %v3051_v12 = vpop.f32.mrf.mxu0 }
 0x408   : > { %3466 = vst.msk [vmem:[%s5339_s26 + $0x1c] sm:$0xf] %vm3458_vm14, %v3433_v52  ;;  %v3112_v48 = vadd.f32 %v3044_v18, %v2938_v17  ;;  %3802 = vmatmul.msk.bf16.gmra.mxu1 %vm1364_vm7, %v3821_v36 }
 0x40a   : > { %v3148_v44 = vadd.f32 %v5329_v24, %v3112_v48 }
 0x40c   : > { %v3402_v4 = vadd.f32 %v3334_v20, %v3148_v44  ;;  %v3822_v44 = vld [vmem:[%s3990_s16 + $0x88] sm:$0xff] }
 0x40d   : > { %v2939_v15 = vpop.f32.mrf.mxu3 }
 0x40e   : > { %v3434_v32 = vpack.c.bf16 %v3402_v4, %v3402_v4  ;;  %v2940_v13 = vadd.f32 %v2939_v15, %v5147_v45  ;;  %v3346_v3 = vpop.f32.mrf.mxu1 }
 0x40f   : > { %v3054_v51 = vpop.f32.mrf.mxu0 }
 0x410   : > { %3467 = vst.msk [vmem:[%s5339_s26 + $0x20] sm:$0xf] %vm3458_vm14, %v3434_v32  ;;  %v3113_v22 = vadd.f32 %v3046_v27, %v2940_v13 }
 0x412   : > { %3698 = vmatmul.msk.bf16.gmra.mxu3 %vm2768_vm12, %v5141_v34  ;;  %3722 = vmatmul.msk.bf16.gmra.mxu0 %vm2768_vm12, %v5187_v21  ;;  %v3149_v20 = vadd.f32 %v5329_v24, %v3113_v22 }
 0x414   : > { %v3403_v18 = vadd.f32 %v3336_v29, %v3149_v20 }
 0x415   : > { %v2942_v26 = vpop.f32.mrf.mxu3 }
 0x416   : > { %v3435_v62 = vpack.c.bf16 %v3403_v18, %v3403_v18  ;;  %v2943_v45 = vadd.f32 %v2942_v26, %v5158_v50  ;;  %v3349_v34 = vpop.f32.mrf.mxu1 }
 0x417   : > { %v3056_v41 = vpop.f32.mrf.mxu0 }
 0x418   : > { %3468 = vst.msk [vmem:[%s5339_s26 + $0x24] sm:$0xf] %vm3458_vm14, %v3435_v62  ;;  %v3114_v57 = vadd.f32 %v3049_v55, %v2943_v45  ;;  %3803 = vmatmul.msk.bf16.gmra.mxu1 %vm1364_vm7, %v3822_v44 }
 0x41a   : > { %v3150_v30 = vadd.f32 %v5329_v24, %v3114_v57 }
 0x41c   : > { %v3404_v27 = vadd.f32 %v3339_v8, %v3150_v30 }
 0x41d   : > { %v2944_v39 = vpop.f32.mrf.mxu3 }
 0x41e   : > { %v3436_v21 = vpack.c.bf16 %v3404_v27, %v3404_v27  ;;  %v2945_v60 = vadd.f32 %v2944_v39, %v5160_v59  ;;  %v3351_v19 = vpop.f32.mrf.mxu1 }
 0x41f   : > { %v3059_v54 = vpop.f32.mrf.mxu0 }
 0x420   : > { %3469 = vst.msk [vmem:[%s5339_s26 + $0x28] sm:$0xf] %vm3458_vm14, %v3436_v21  ;;  %v3115_v29 = vadd.f32 %v3051_v12, %v2945_v60 }
 0x422   : > { %3699 = vmatmul.msk.bf16.gmra.mxu3 %vm2768_vm12, %v5154_v38  ;;  %v3151_v50 = vadd.f32 %v5329_v24, %v3115_v29 }
 0x424   : > { %v3405_v9 = vadd.f32 %v3341_v56, %v3151_v50 }
 0x425   : > { %v2947_v7 = vpop.f32.mrf.mxu3 }
 0x426   : > { %v3437_v8 = vpack.c.bf16 %v3405_v9, %v3405_v9  ;;  %v2948_v0 = vadd.f32 %v2947_v7, %v5171_v53  ;;  %v3354_v56 = vpop.f32.mrf.mxu1 }
 0x427   : > { %v3061_v55 = vpop.f32.mrf.mxu0 }
 0x428   : > { %3470 = vst.msk [vmem:[%s5339_s26 + $0x2c] sm:$0xf] %vm3458_vm14, %v3437_v8  ;;  %v3116_v59 = vadd.f32 %v3054_v51, %v2948_v0  ;;  %v2498_v0 = vsel %vm4279_vm6, 0, %v5350_v14 }
 0x42a   : > { %v3152_v25 = vadd.f32 %v5329_v24, %v3116_v59 }
 0x42c   : > { %v3406_v16 = vadd.f32 %v3344_v58, %v3152_v25 }
 0x42d   : > { %v2949_v5 = vpop.f32.mrf.mxu3 }
 0x42e   : > { %v3438_v38 = vpack.c.bf16 %v3406_v16, %v3406_v16  ;;  %v2950_v46 = vadd.f32 %v2949_v5, %v5176_v23  ;;  %v3356_v36 = vpop.f32.mrf.mxu1 }
 0x42f   : > { %v3064_v52 = vpop.f32.mrf.mxu0 }
 0x430   : > { %3471 = vst.msk [vmem:[%s5339_s26 + $0x30] sm:$0xf] %vm3458_vm14, %v3438_v38  ;;  %v3117_v17 = vadd.f32 %v3056_v41, %v2950_v46 }
 0x432   : > { %3700 = vmatmul.msk.bf16.gmra.mxu3 %vm2768_vm12, %v5167_v35  ;;  %v3153_v53 = vadd.f32 %v5329_v24, %v3117_v17 }
 0x434   : > { %v3407_v12 = vadd.f32 %v3346_v3, %v3153_v53 }
 0x435   : > { %v2952_v48 = vpop.f32.mrf.mxu3 }
 0x436   : > { %v3439_v4 = vpack.c.bf16 %v3407_v12, %v3407_v12  ;;  %v2953_v58 = vadd.f32 %v2952_v48, %v5194_v10  ;;  %v3359_v3 = vpop.f32.mrf.mxu1 }
 0x437   : > { %v3066_v15 = vpop.f32.mrf.mxu0 }
 0x438   : > { %3472 = vst.msk [vmem:[%s5339_s26 + $0x34] sm:$0xf] %vm3458_vm14, %v3439_v4  ;;  %v3118_v23 = vadd.f32 %v3059_v54, %v2953_v58 }
 0x439   : > { %v2606_v50 = vpop.permute.xlu2 %2605 }
 0x43a   : > { %v3154_v32 = vadd.f32 %v5329_v24, %v3118_v23 }
 0x43c   : > { %v3408_v35 = vadd.f32 %v3349_v34, %v3154_v32 }
 0x43d   : > { %v2954_v13 = vpop.f32.mrf.mxu3 }
 0x43e   : > { %v3440_v51 = vpack.c.bf16 %v3408_v35, %v3408_v35  ;;  %v2955_v22 = vadd.f32 %v2954_v13, %v5200_v28  ;;  %v3361_v39 = vpop.f32.mrf.mxu1 }
 0x43f   : > { %v3069_v18 = vpop.f32.mrf.mxu0 }
 0x440   : > { %3473 = vst.msk [vmem:[%s5339_s26 + $0x38] sm:$0xf] %vm3458_vm14, %v3440_v51  ;;  %v3119_v20 = vadd.f32 %v3061_v55, %v2955_v22 }
 0x442   : > { %v3155_v10 = vadd.f32 %v5329_v24, %v3119_v20 }
 0x444   : > { %v3409_v26 = vadd.f32 %v3351_v19, %v3155_v10 }
 0x445   : > { %v2957_v62 = vpop.f32.mrf.mxu3 }
 0x446   : > { %v3441_v45 = vpack.c.bf16 %v3409_v26, %v3409_v26  ;;  %v2958_v41 = vadd.f32 %v2957_v62, %v5215_v11  ;;  %v3364_v55 = vpop.f32.mrf.mxu1 }
 0x447   : > { %v3071_v27 = vpop.f32.mrf.mxu0 }
 0x448   : > { %3474 = vst.msk [vmem:[%s5339_s26 + $0x3c] sm:$0xf] %vm3458_vm14, %v3441_v45  ;;  %v3120_v57 = vadd.f32 %v3064_v52, %v2958_v41 }
 0x44a   : > { %v3156_v30 = vadd.f32 %v5329_v24, %v3120_v57 }
 0x44c   : > { %v3410_v28 = vadd.f32 %v3354_v56, %v3156_v30 }
 0x44d   : > { %v2959_v34 = vpop.f32.mrf.mxu3 }
 0x44e   : > { %v3442_v21 = vpack.c.bf16 %v3410_v28, %v3410_v28  ;;  %v2960_v60 = vadd.f32 %v2959_v34, %v5220_v47  ;;  %v2714_v47 = vsel %vm1425_vm8, %v2498_v0, %v2606_v50  ;;  %v3366_v56 = vpop.f32.mrf.mxu1 }
 0x44f   : > { %v3074_v9 = vpop.f32.mrf.mxu0 }
 0x450   : > { %3475 = vst.msk [vmem:[%s5339_s26 + $0x40] sm:$0xf] %vm3458_vm14, %v3442_v21  ;;  %v3121_v54 = vadd.f32 %v3066_v15, %v2960_v60 }
 0x452   : > { %v3157_v29 = vadd.f32 %v5329_v24, %v3121_v54 }
 0x454   : > { %v3411_v11 = vadd.f32 %v3356_v36, %v3157_v29 }
 0x455   : > { %v2962_v7 = vpop.f32.mrf.mxu3 }
 0x456   : > { %v3443_v19 = vpack.c.bf16 %v3411_v11, %v3411_v11  ;;  %v2963_v8 = vadd.f32 %v2962_v7, %v5230_v31  ;;  %v3369_v15 = vpop.f32.mrf.mxu1 }
 0x457   : > { %v3076_v14 = vpop.f32.mrf.mxu0 }
 0x458   : > { %3476 = vst.msk [vmem:[%s5339_s26 + $0x44] sm:$0xf] %vm3458_vm14, %v3443_v19  ;;  %v3122_v59 = vadd.f32 %v3069_v18, %v2963_v8  ;;  %v2660_v25 = vpop.permute.xlu0 %2659 }
 0x459   : > { %v2751_v16 = vsel %vm2715_vm11, %v2714_v47, %v2660_v25 }
 0x45a   : > { %3723 = vmatmul.msk.bf16.gmra.mxu0 %vm2768_vm12, %v2751_v16  ;;  %v3158_v5 = vadd.f32 %v5329_v24, %v3122_v59 }
 0x45c   : > { %v3412_v38 = vadd.f32 %v3359_v3, %v3158_v5 }
 0x45d   : > { %v2964_v31 = vpop.f32.mrf.mxu3 }
 0x45e   : > { %v3444_v46 = vpack.c.bf16 %v3412_v38, %v3412_v38  ;;  %v2965_v40 = vadd.f32 %v2964_v31, %v5232_v43  ;;  %v3371_v18 = vpop.f32.mrf.mxu1 }
 0x45f   : > { %v3079_v58 = vpop.f32.mrf.mxu0 }
 0x460   : > { %3477 = vst.msk [vmem:[%s5339_s26 + $0x48] sm:$0xf] %vm3458_vm14, %v3444_v46  ;;  %v3123_v52 = vadd.f32 %v3071_v27, %v2965_v40 }
 0x462   : > { %v3159_v17 = vadd.f32 %v5329_v24, %v3123_v52 }
 0x464   : > { %v3413_v53 = vadd.f32 %v3361_v39, %v3159_v17 }
 0x465   : > { %v2967_v12 = vpop.f32.mrf.mxu3 }
 0x466   : > { %v3445_v48 = vpack.c.bf16 %v3413_v53, %v3413_v53  ;;  %v2968_v44 = vadd.f32 %v2967_v12, %v5240_v6  ;;  %v3374_v27 = vpop.f32.mrf.mxu1 }
 0x467   : > { %v3081_v6 = vpop.f32.mrf.mxu0 }
 0x468   : > { %3478 = vst.msk [vmem:[%s5339_s26 + $0x4c] sm:$0xf] %vm3458_vm14, %v3445_v48  ;;  %v3124_v4 = vadd.f32 %v3074_v9, %v2968_v44 }
 0x46a   : > { %v3160_v43 = vadd.f32 %v5329_v24, %v3124_v4 }
 0x46c   : > { %v3414_v23 = vadd.f32 %v3364_v55, %v3160_v43 }
 0x46d   : > { %v2969_v36 = vpop.f32.mrf.mxu3 }
 0x46e   : > { %v3446_v32 = vpack.c.bf16 %v3414_v23, %v3414_v23  ;;  %v2970_v35 = vadd.f32 %v2969_v36, %v5242_v37  ;;  %v3376_v50 = vpop.f32.mrf.mxu1  ;;  %v5539_v36 = vld [vmem:[#allocation2_spill] sm:$0xff] }
 0x46f   : > { %v3084_v45 = vpop.f32.mrf.mxu0 }
 0x470   : > { %3479 = vst.msk [vmem:[%s5339_s26 + $0x50] sm:$0xf] %vm3458_vm14, %v3446_v32  ;;  %v3125_v13 = vadd.f32 %v3076_v14, %v2970_v35 }
 0x472   : > { %v3161_v51 = vadd.f32 %v5329_v24, %v3125_v13 }
 0x474   : > { %v3415_v22 = vadd.f32 %v3366_v56, %v3161_v51 }
 0x475   : > { %v2972_v20 = vpop.f32.mrf.mxu3 }
 0x476   : > { %v3447_v10 = vpack.c.bf16 %v3415_v22, %v3415_v22  ;;  %v2973_v3 = vadd.f32 %v2972_v20, %v5250_v63  ;;  %v3379_v55 = vpop.f32.mrf.mxu1 }
 0x477   : > { %v3086_v54 = vpop.f32.mrf.mxu0 }
 0x478   : > { %3480 = vst.msk [vmem:[%s5339_s26 + $0x54] sm:$0xf] %vm3458_vm14, %v3447_v10  ;;  %v3126_v26 = vadd.f32 %v3079_v58, %v2973_v3 }
 0x47a   : > { %v3162_v62 = vadd.f32 %v5329_v24, %v3126_v26 }
 0x47c   : > { %v3416_v37 = vadd.f32 %v3369_v15, %v3162_v62 }
 0x47d   : > { %v2974_v41 = vpop.f32.mrf.mxu3 }
 0x47e   : > { %v3448_v57 = vpack.c.bf16 %v3416_v37, %v3416_v37  ;;  %v2975_v30 = vadd.f32 %v2974_v41, %v5252_v42  ;;  %v3381_v40 = vpop.f32.mrf.mxu1 }
 0x47f   : > { %v3089_v0 = vpop.f32.mrf.mxu0 }
 0x480   : > { %3481 = vst.msk [vmem:[%s5339_s26 + $0x58] sm:$0xf] %vm3458_vm14, %v3448_v57  ;;  %v3127_v28 = vadd.f32 %v3081_v6, %v2975_v30  ;;  %v5541_v57 = vld [vmem:[#allocation4_spill] sm:$0xff] }
 0x482   : > { %v3163_v34 = vadd.f32 %v5329_v24, %v3127_v28 }
 0x484   : > { %v3417_v63 = vadd.f32 %v3371_v18, %v3163_v34  ;;  %v5540_v18 = vld [vmem:[#allocation3_spill] sm:$0xff] }
 0x485   : > { %v2977_v39 = vpop.f32.mrf.mxu3 }
 0x486   : > { %v3449_v21 = vpack.c.bf16 %v3417_v63, %v3417_v63  ;;  %v2978_v60 = vadd.f32 %v2977_v39, %v5260_v1  ;;  %v3384_v4 = vpop.f32.mrf.mxu1 }
 0x488   : > { %3482 = vst.msk [vmem:[%s5339_s26 + $0x5c] sm:$0xf] %vm3458_vm14, %v3449_v21  ;;  %v3128_v29 = vadd.f32 %v3084_v45, %v2978_v60 }
 0x48a   : > { %v3164_v42 = vadd.f32 %v5329_v24, %v3128_v29 }
 0x48c   : > { %v3418_v11 = vadd.f32 %v3374_v27, %v3164_v42 }
 0x48d   : > { %v2979_v9 = vpop.f32.mrf.mxu3 }
 0x48e   : > { %v3450_v7 = vpack.c.bf16 %v3418_v11, %v3418_v11  ;;  %v2980_v19 = vadd.f32 %v2979_v9, %v5262_v61  ;;  %v3091_v61 = vpop.f32.mrf.mxu0  ;;  %v3386_v51 = vpop.f32.mrf.mxu1 }
 0x490   : > { %3483 = vst.msk [vmem:[%s5339_s26 + $0x60] sm:$0xf] %vm3458_vm14, %v3450_v7  ;;  %v3129_v8 = vadd.f32 %v3086_v54, %v2980_v19 }
 0x492   : > { %v3165_v1 = vadd.f32 %v5329_v24, %v3129_v8 }
 0x494   : > { %v3419_v47 = vadd.f32 %v3376_v50, %v3165_v1 }
 0x495   : > { %v2982_v59 = vpop.f32.mrf.mxu3 }
 0x496   : > { %v3451_v25 = vpack.c.bf16 %v3419_v47, %v3419_v47  ;;  %v2983_v16 = vadd.f32 %v2982_v59, %v5270_v49  ;;  %v3094_v53 = vpop.f32.mrf.mxu0  ;;  %v3389_v62 = vpop.f32.mrf.mxu1 }
 0x498   : > { %3484 = vst.msk [vmem:[%s5339_s26 + $0x64] sm:$0xf] %vm3458_vm14, %v3451_v25  ;;  %v3130_v5 = vadd.f32 %v3089_v0, %v2983_v16 }
 0x49a   : > { %v3166_v38 = vadd.f32 %v5329_v24, %v3130_v5 }
 0x49c   : > { %v3420_v31 = vadd.f32 %v3379_v55, %v3166_v38 }
 0x49d   : > { %v2984_v46 = vpop.f32.mrf.mxu3 }
 0x49e   : > { %v3452_v14 = vpack.c.bf16 %v3420_v31, %v3420_v31  ;;  %v2985_v52 = vadd.f32 %v2984_v46, %v5272_v2  ;;  %v3096_v35 = vpop.f32.mrf.mxu0  ;;  %v3391_v39 = vpop.f32.mrf.mxu1 }
 0x4a0   : > { %3485 = vst.msk [vmem:[%s5339_s26 + $0x68] sm:$0xf] %vm3458_vm14, %v3452_v14  ;;  %v3131_v56 = vadd.f32 %v3091_v61, %v2985_v52 }
 0x4a2   : > { %v3167_v17 = vadd.f32 %v5329_v24, %v3131_v56 }
 0x4a4   : > { %v3421_v49 = vadd.f32 %v3381_v40, %v3167_v17 }
 0x4a5   : > { %v2987_v12 = vpop.f32.mrf.mxu3 }
 0x4a6   : > { %v3453_v48 = vpack.c.bf16 %v3421_v49, %v3421_v49  ;;  %v2988_v44 = vadd.f32 %v2987_v12, %v5280_v33 }
 0x4a8   : > { %3486 = vst.msk [vmem:[%s5339_s26 + $0x6c] sm:$0xf] %vm3458_vm14, %v3453_v48  ;;  %v3132_v58 = vadd.f32 %v3094_v53, %v2988_v44 }
 0x4aa   : > { %v3168_v43 = vadd.f32 %v5329_v24, %v3132_v58 }
 0x4ac   : > { %v3422_v2 = vadd.f32 %v3384_v4, %v3168_v43 }
 0x4ad   : > { %v2989_v15 = vpop.f32.mrf.mxu3 }
 0x4ae   : > { %v3454_v23 = vpack.c.bf16 %v3422_v2, %v3422_v2  ;;  %v2990_v32 = vadd.f32 %v2989_v15, %v5539_v36 }
 0x4b0   : > { %3487 = vst.msk [vmem:[%s5339_s26 + $0x70] sm:$0xf] %vm3458_vm14, %v3454_v23  ;;  %v3133_v13 = vadd.f32 %v3096_v35, %v2990_v32 }
 0x4b2   : > { %v3169_v33 = vadd.f32 %v5329_v24, %v3133_v13 }
 0x4b4   : > { %v3423_v6 = vadd.f32 %v3386_v51, %v3169_v33 }
 0x4b5   : > { %v2992_v20 = vpop.f32.mrf.mxu3 }
 0x4b6   : > { %v3455_v22 = vpack.c.bf16 %v3423_v6, %v3423_v6  ;;  %v2993_v10 = vadd.f32 %v2992_v20, %v5540_v18 }
 0x4b8   : > { %3488 = vst.msk [vmem:[%s5339_s26 + $0x74] sm:$0xf] %vm3458_vm14, %v3455_v22 }
 0x4bd   : > { %v2994_v45 = vpop.f32.mrf.mxu3 }
 0x4be   : > { %v2995_v30 = vadd.f32 %v2994_v45, %v5541_v57 }
 0x4d7   : > { %v3099_v3 = vpop.f32.mrf.mxu0 }
 0x4d8   : > { %v3134_v26 = vadd.f32 %v3099_v3, %v2993_v10 }
 0x4da   : > { %v3170_v37 = vadd.f32 %v5329_v24, %v3134_v26 }
 0x4dc   : > { %v3424_v41 = vadd.f32 %v3389_v62, %v3170_v37 }
 0x4de   : > { %v3456_v27 = vpack.c.bf16 %v3424_v41, %v3424_v41 }
 0x4df   : > { %v3101_v28 = vpop.f32.mrf.mxu0 }
 0x4e0   : > { %3489 = vst.msk [vmem:[%s5339_s26 + $0x78] sm:$0xf] %vm3458_vm14, %v3456_v27  ;;  %v3135_v34 = vadd.f32 %v3101_v28, %v2995_v30 }
 0x4e2   : > { %v3171_v63 = vadd.f32 %v5329_v24, %v3135_v34 }
 0x4e4   : > { %v3425_v21 = vadd.f32 %v3391_v39, %v3171_v63 }
 0x4e6   : > { %v3457_v60 = vpack.c.bf16 %v3425_v21, %v3425_v21 }
 0x4e8   : > { %3490 = vst.msk [vmem:[%s5339_s26 + $0x7c] sm:$0xf] %vm3458_vm14, %v3457_v60 }
 0x4e9 PF: > { %s19_s11 = sadd.s32 1, %s3911_s11   ;;  %s5542_s30 = smov %s3907_s10 }
 0x4ea   : > { %p16_p5 = scmp.ge.s32.totalorder %s19_s11, 4   ;;  %s5543_s10 = smov %s5545_s12 }
 0x4ec   :  { %18 = sbr.rel (!%p16_p5) target bundleno = 2 (0x2), region = 91 }

// kernel: tpu_custom_call.1
= control target key start
LH: loop header
LB: loop body
LE: loop exit
PB: predicated region body
PF: predicated region fallthrough
CT: control target
= control target key end

     0   :  { %s3966_s30 = smov 0   ;;  %s3968_s10 = smov 0   ;;  %s5522_s0 = inlined_call_operand.vmem [shape: bf16[2,20,16,4], index: 0, kind: input, shape index: {}]   ;;  %s5523_s1 = inlined_call_operand.vmem [shape: f32[1,4], index: 1, kind: input, shape index: {}]   ;;  %s5524_s2 = inlined_call_operand.vmem [shape: f32[1,4], index: 2, kind: input, shape index: {}]   ;;  %s5525_s3 = inlined_call_operand.vmem [shape: bf16[3,12,8], index: 3, kind: input, shape index: {}]   ;;  %s5526_s4 = inlined_call_operand.vmem [shape: f32[1,8], index: 4, kind: input, shape index: {}]   ;;  %s5527_s5 = inlined_call_operand.vmem [shape: f32[1,8], index: 5, kind: input, shape index: {}]   ;;  %s5528_s6 = inlined_call_operand.vmem [shape: bf16[3,24,8], index: 6, kind: input, shape index: {}]   ;;  %s5529_s7 = inlined_call_operand.vmem [shape: f32[1,8], index: 7, kind: input, shape index: {}]   ;;  %s5530_s8 = inlined_call_operand.vmem [shape: bf16[4,8], index: 8, kind: input, shape index: {}]   ;;  %s5531_s9 = inlined_call_operand.vmem [shape: bf16[2,16,16,8], index: 9, kind: output, shape index: {}]  }
   0x1   :  { %s3970_s11 = smov 0  }
   0x2 LB: > { %s31_s12 = sadd.s32 1, %s3907_s10  ;;  %p3584_p0 = scmp.ge.s32.totalorder %s3911_s11, 1  ;;  %s3911_s11 = sphi %s3970_s11, %s19_s11   ;;  %s3907_s10 = sphi %s3968_s10, %s5543_s10   ;;  %s3903_s30 = sphi %s3966_s30, %s5542_s30  }
   0x3   : > { %p33_p1 = scmp.ge.s32.totalorder %s31_s12, 2  ;;  %p301_p2 = scmp.lt.s32.totalorder %s3911_s11, 3 }
   0x5   : > { %s5545_s12 = smov (%p33_p1, %s31_s12), 0  ;;  %p302_p3 = pnand %p3584_p0, %p301_p2 }
   0x7   : > { %305 = sbr.rel (%p302_p3) target bundleno = 1257 (0x4e9), region = 56 }
   0xc   : > { %p342_p4 = scmp.lt.s32.totalorder %s3903_s30, 1  ;;  %v3995_v0 = vld [vmem:[%s5523_s1] ss:$0 sm:$0xff]  ;;  %vm1241_vm0 = vcmask 1047552   ;;  %vm1242_vm1 = vsmask.f32 7424 }
   0xd   : > { %v4003_v6 = vld [vmem:[%s5524_s2] ss:$0 sm:$0xff]  ;;  %s3913_s21 = smov 4   ;;  %vm4047_vm2 = vmand %vm1241_vm0, %vm1242_vm1  ;;  %s3914_s22 = smov 8   ;;  %vm1699_vm3 = vcmask 1045504   ;;  %vm1158_vm4 = vcmask 1040384  }
   0xe   : > { %s5547_s30 = smov (!%p342_p4, %s3903_s30), 1  ;;  %vm1159_vm5 = vsmask.f32 256  ;;  %vm1364_vm7 = vcmask 31744   ;;  %vm1425_vm8 = vcmask 64512   ;;  %vm1662_vm9 = vcmask 97280  }
   0xf   : > { %s3852_s13 = smul.u32 160, %s5547_s30  ;;  %vm4279_vm6 = vmand %vm1158_vm4, %vm1159_vm5  ;;  %s3915_s25 = smov 16   ;;  %vm2801_vm10 = vcmask 1043456   ;;  %vm2715_vm11 = vcmask 130048   ;;  %vm2768_vm12 = vcmask 195584   ;;  %vm3301_vm13 = vcmask 1041408  }
  0x10   : > { %s3806_s20 = sshll.u32 %s5547_s30, 7  ;;  %vm3458_vm14 = vcmask 60416  }
  0x11   : > { %s3990_s16 = scalar_lea.vmem %s5522_s0, %s3852_s13  ;;  %s5339_s26 = scalar_lea.vmem %s5531_s9, %s3806_s20 }
  0x12   : > { %v393_v1 = vld [vmem:[%s3990_s16 + $0x78] sm:$0xff]   ;;  %v395_v2 = vld [vmem:[%s3990_s16 + $0x80] sm:$0xff]   ;;  %v3846_v3 = vld [vmem:[%s3990_s16 + $0x90] sm:$0xff]  }
  0x13   : > { %v433_v4 = vunpack.c.l.bf16 %v393_v1  ;;  %v434_v5 = vunpack.c.h.bf16 %v393_v1  ;;  %v435_v7 = vunpack.c.l.bf16 %v395_v2  ;;  %v436_v8 = vunpack.c.h.bf16 %v395_v2  ;;  %v391_v9 = vld [vmem:[%s3990_s16 + $0x70] sm:$0xff]   ;;  %v397_v2 = vld [vmem:[%s3990_s16 + $0x88] sm:$0xff]  }
  0x14   : > { %v3839_v10 = vunpack.c.l.bf16 %v3846_v3  ;;  %v3840_v11 = vunpack.c.h.bf16 %v3846_v3  ;;  %v431_v12 = vunpack.c.l.bf16 %v391_v9  ;;  %v432_v13 = vunpack.c.h.bf16 %v391_v9  ;;  %v367_v46 = vld [vmem:[%s3990_s16 + $0x10] sm:$0xff]  }
  0x15   : > { %v477_v14 = vmul.f32 %v3995_v0, %v433_v4  ;;  %v478_v15 = vmul.f32 %v3995_v0, %v434_v5  ;;  %v479_v16 = vmul.f32 %v3995_v0, %v435_v7  ;;  %v480_v17 = vmul.f32 %v3995_v0, %v436_v8 }
  0x16   : > { %v483_v18 = vmul.f32 %v3995_v0, %v3839_v10  ;;  %v484_v19 = vmul.f32 %v3995_v0, %v3840_v11  ;;  %v475_v20 = vmul.f32 %v3995_v0, %v431_v12  ;;  %v476_v21 = vmul.f32 %v3995_v0, %v432_v13 }
  0x17   : > { %v521_v22 = vadd.f32 %v4003_v6, %v477_v14  ;;  %v522_v23 = vadd.f32 %v4003_v6, %v478_v15  ;;  %v523_v24 = vadd.f32 %v4003_v6, %v479_v16  ;;  %v524_v25 = vadd.f32 %v4003_v6, %v480_v17 }
  0x18   : > { %v527_v26 = vadd.f32 %v4003_v6, %v483_v18  ;;  %v528_v27 = vadd.f32 %v4003_v6, %v484_v19  ;;  %v519_v28 = vadd.f32 %v4003_v6, %v475_v20  ;;  %v520_v29 = vadd.f32 %v4003_v6, %v476_v21  ;;  %v3830_v20 = vld [vmem:[%s3990_s16] sm:$0xff]  }
  0x19   : > { %v561_v30 = vmax.f32 %v521_v22, 0.0  ;;  %v562_v31 = vmax.f32 %v522_v23, 0.0  ;;  %v563_v32 = vmax.f32 %v523_v24, 0.0  ;;  %v564_v33 = vmax.f32 %v524_v25, 0.0  ;;  %v3845_v25 = vld [vmem:[%s3990_s16 + $0x8] sm:$0xff]  }
  0x1a   : > { %v567_v34 = vmax.f32 %v527_v26, 0.0  ;;  %v568_v35 = vmax.f32 %v528_v27, 0.0  ;;  %v559_v36 = vmax.f32 %v519_v28, 0.0  ;;  %v560_v37 = vmax.f32 %v520_v29, 0.0 }
  0x1b   : > { %v888_v38 = vpack.c.bf16 %v561_v30, %v561_v30  ;;  %v889_v39 = vpack.c.bf16 %v562_v31, %v562_v31  ;;  %v890_v40 = vpack.c.bf16 %v563_v32, %v563_v32  ;;  %v891_v41 = vpack.c.bf16 %v564_v33, %v564_v33 }
  0x1c   : > { %v854_v42 = vmul.f32 0.0, %v567_v34  ;;  %v855_v43 = vmul.f32 0.0, %v568_v35  ;;  %v886_v44 = vpack.c.bf16 %v559_v36, %v559_v36  ;;  %v887_v45 = vpack.c.bf16 %v560_v37, %v560_v37 }
  0x1d   : > { %v968_v47 = vunpack.c.l.b16 %v888_v38  ;;  %v969_v48 = vunpack.c.l.b16 %v889_v39  ;;  %v970_v49 = vunpack.c.l.b16 %v890_v40  ;;  %v971_v50 = vunpack.c.l.b16 %v891_v41 }
  0x1e   : > { %v894_v51 = vpack.c.bf16 %v854_v42, %v854_v42  ;;  %v895_v52 = vpack.c.bf16 %v855_v43, %v855_v43  ;;  %v966_v53 = vunpack.c.l.b16 %v886_v44  ;;  %v967_v54 = vunpack.c.l.b16 %v887_v45 }
  0x1f   : > { %v4023_v55 = vpack.c.b16 %v969_v48, %v968_v47  ;;  %v4025_v56 = vpack.c.b16 %v971_v50, %v970_v49  ;;  %v407_v57 = vunpack.c.l.bf16 %v367_v46  ;;  %v408_v60 = vunpack.c.h.bf16 %v367_v46 }
  0x20   : > { %v974_v58 = vunpack.c.l.b16 %v894_v51  ;;  %v975_v59 = vunpack.c.l.b16 %v895_v52  ;;  %v4038_v4 = vpack.c.b16 %v967_v54, %v966_v53  ;;  %v437_v12 = vunpack.c.l.bf16 %v397_v2 }
  0x21   : > { %1294 = vrot.lane.b32.xlu0 %v4023_v55, %s3913_s21  ;;  %1296 = vrot.lane.b32.xlu1 %v4025_v56, %s3913_s21  ;;  %v1104_v61 = vshrl.u32 %v4023_v55, 16  ;;  %v1107_v62 = vshll.u32 %v4023_v55, 16  ;;  %v1111_v63 = vshrl.u32 %v4025_v56, 16  ;;  %v1114_v1 = vshll.u32 %v4025_v56, 16 }
  0x22   : > { %v4036_v3 = vpack.c.b16 %v975_v59, %v974_v58  ;;  %v451_v5 = vmul.f32 %v3995_v0, %v407_v57  ;;  %v452_v15 = vmul.f32 %v3995_v0, %v408_v60  ;;  %v1100_v18 = vshll.u32 %v4038_v4, 16 }
  0x23   : > { %v1211_v7 = vrot.slane %v1107_v62, 1  ;;  %v1213_v8 = vrot.slane %v1114_v1, 1  ;;  %v438_v19 = vunpack.c.h.bf16 %v397_v2  ;;  %v481_v26 = vmul.f32 %v3995_v0, %v437_v12 }
  0x24   : > { %v1125_v10 = vshrl.u32 %v4036_v3, 16  ;;  %v1128_v11 = vshll.u32 %v4036_v3, 16  ;;  %v495_v16 = vadd.f32 %v4003_v6, %v451_v5  ;;  %v496_v23 = vadd.f32 %v4003_v6, %v452_v15 }
  0x25   : > { %v1212_v13 = vor.u32 %v1211_v7, %v1104_v61  ;;  %v1214_v14 = vor.u32 %v1213_v8, %v1111_v63  ;;  %v482_v27 = vmul.f32 %v3995_v0, %v438_v19  ;;  %v3831_v30 = vunpack.c.l.bf16 %v3830_v20 }
  0x26   : > { %v1217_v17 = vrot.slane %v1128_v11, 1  ;;  %v535_v24 = vmax.f32 %v495_v16, 0.0  ;;  %v536_v29 = vmax.f32 %v496_v23, 0.0  ;;  %v3832_v31 = vunpack.c.h.bf16 %v3830_v20  ;;  %v369_v20 = vld [vmem:[%s3990_s16 + $0x18] sm:$0xff]  }
  0x27   : > { %v1259_v21 = vsel %vm4047_vm2, %v1212_v13, 0  ;;  %v1260_v22 = vsel %vm4047_vm2, %v1214_v14, 0  ;;  %v1097_v32 = vshrl.u32 %v4038_v4, 16  ;;  %v525_v33 = vadd.f32 %v4003_v6, %v481_v26 }
  0x28   : > { %v1218_v28 = vor.u32 %v1217_v17, %v1125_v10  ;;  %v526_v34 = vadd.f32 %v4003_v6, %v482_v27  ;;  %v3835_v35 = vunpack.c.l.bf16 %v3845_v25  ;;  %v1209_v36 = vrot.slane %v1100_v18, 1 }
  0x29   : > { %1354 = vrot.lane.b32.xlu0 %v1259_v21, %s3914_s22  ;;  %1356 = vrot.lane.b32.xlu1 %v1260_v22, %s3914_s22  ;;  %v862_v37 = vpack.c.bf16 %v535_v24, %v535_v24  ;;  %v447_v38 = vmul.f32 %v3995_v0, %v3831_v30  ;;  %v448_v39 = vmul.f32 %v3995_v0, %v3832_v31  ;;  %v565_v40 = vmax.f32 %v525_v33, 0.0 }
  0x2a   : > { %v566_v41 = vmax.f32 %v526_v34, 0.0  ;;  %v3836_v42 = vunpack.c.h.bf16 %v3845_v25  ;;  %v449_v43 = vmul.f32 %v3995_v0, %v3835_v35  ;;  %v1262_v44 = vsel %vm4047_vm2, %v1218_v28, 0  ;;  %v371_v25 = vld [vmem:[%s3990_s16 + $0x20] sm:$0xff]  }
  0x2b   : > { %v863_v45 = vpack.c.bf16 %v536_v29, %v536_v29  ;;  %v491_v46 = vadd.f32 %v4003_v6, %v447_v38  ;;  %v492_v47 = vadd.f32 %v4003_v6, %v448_v39  ;;  %v892_v48 = vpack.c.bf16 %v565_v40, %v565_v40 }
  0x2c   : > { %v893_v49 = vpack.c.bf16 %v566_v41, %v566_v41  ;;  %v450_v50 = vmul.f32 %v3995_v0, %v3836_v42  ;;  %v493_v51 = vadd.f32 %v4003_v6, %v449_v43  ;;  %v942_v60 = vunpack.c.l.b16 %v862_v37 }
  0x2d   : > { %v531_v52 = vmax.f32 %v491_v46, 0.0  ;;  %v532_v53 = vmax.f32 %v492_v47, 0.0  ;;  %v972_v54 = vunpack.c.l.b16 %v892_v48  ;;  %v943_v2 = vunpack.c.l.b16 %v863_v45 }
  0x2e   : > { %v973_v57 = vunpack.c.l.b16 %v893_v49  ;;  %v494_v58 = vadd.f32 %v4003_v6, %v450_v50  ;;  %v533_v59 = vmax.f32 %v493_v51, 0.0  ;;  %v1210_v8 = vor.u32 %v1209_v36, %v1097_v32  ;;  %v373_v51 = vld [vmem:[%s3990_s16 + $0x28] sm:$0xff]  }
  0x2f   : > { %v818_v5 = vmul.f32 0.0, %v531_v52  ;;  %v819_v7 = vmul.f32 0.0, %v532_v53  ;;  %v4102_v21 = vpack.c.b16 %v943_v2, %v942_v60  ;;  %v409_v24 = vunpack.c.l.bf16 %v369_v20 }
  0x30   : > { %v4095_v12 = vpack.c.b16 %v973_v57, %v972_v54  ;;  %v534_v13 = vmax.f32 %v494_v58, 0.0  ;;  %v820_v14 = vmul.f32 0.0, %v533_v59  ;;  %v1258_v26 = vsel %vm4047_vm2, %v1210_v8, 0 }
  0x31   : > { %1300 = vrot.lane.b32.xlu0 %v4036_v3, %s3913_s21  ;;  %1360 = vrot.lane.b32.xlu1 %v1262_v44, %s3914_s22  ;;  %v858_v22 = vpack.c.bf16 %v818_v5, %v818_v5  ;;  %v859_v23 = vpack.c.bf16 %v819_v7, %v819_v7  ;;  %v410_v30 = vunpack.c.h.bf16 %v369_v20  ;;  %v453_v31 = vmul.f32 %v3995_v0, %v409_v24 }
  0x32   : > { %1298 = vrot.lane.b32.xlu2 %v4095_v12, %s3913_s21  ;;  %v821_v15 = vmul.f32 0.0, %v534_v13  ;;  %v860_v16 = vpack.c.bf16 %v820_v14, %v820_v14  ;;  %v1118_v17 = vshrl.u32 %v4095_v12, 16  ;;  %v1121_v19 = vshll.u32 %v4095_v12, 16 }
  0x33   : > { %v411_v35 = vunpack.c.l.bf16 %v371_v25  ;;  %v412_v36 = vunpack.c.h.bf16 %v371_v25  ;;  %v938_v37 = vunpack.c.l.b16 %v858_v22  ;;  %v939_v38 = vunpack.c.l.b16 %v859_v23 }
  0x34   : > { %v861_v27 = vpack.c.bf16 %v821_v15, %v821_v15  ;;  %v940_v28 = vunpack.c.l.b16 %v860_v16  ;;  %v1215_v29 = vrot.slane %v1121_v19, 1  ;;  %v454_v39 = vmul.f32 %v3995_v0, %v410_v30 }
  0x35   : > { %v497_v40 = vadd.f32 %v4003_v6, %v453_v31  ;;  %v455_v43 = vmul.f32 %v3995_v0, %v411_v35  ;;  %v456_v44 = vmul.f32 %v3995_v0, %v412_v36  ;;  %v1016_v48 = vshll.u32 %v4102_v21, 16 }
  0x36   : > { %v941_v33 = vunpack.c.l.b16 %v861_v27  ;;  %v1216_v34 = vor.u32 %v1215_v29, %v1118_v17  ;;  %v498_v45 = vadd.f32 %v4003_v6, %v454_v39  ;;  %v4130_v52 = vpack.c.b16 %v939_v38, %v938_v37 }
  0x37   : > { %v537_v46 = vmax.f32 %v497_v40, 0.0  ;;  %v499_v49 = vadd.f32 %v4003_v6, %v455_v43  ;;  %v500_v50 = vadd.f32 %v4003_v6, %v456_v44  ;;  %v413_v57 = vunpack.c.l.bf16 %v373_v51 }
  0x38   : > { %v4117_v41 = vpack.c.b16 %v941_v33, %v940_v28  ;;  %v1261_v42 = vsel %vm4047_vm2, %v1216_v34, 0  ;;  %v538_v53 = vmax.f32 %v498_v45, 0.0  ;;  %v414_v7 = vunpack.c.h.bf16 %v373_v51 }
  0x39   : > { %1352 = vrot.lane.b32.xlu0 %v1258_v26, %s3914_s22  ;;  %1268 = vrot.lane.b32.xlu1 %v4102_v21, %s3913_s21  ;;  %v864_v54 = vpack.c.bf16 %v537_v46, %v537_v46  ;;  %v539_v60 = vmax.f32 %v499_v49, 0.0  ;;  %v540_v2 = vmax.f32 %v500_v50, 0.0  ;;  %v1013_v8 = vshrl.u32 %v4102_v21, 16 }
  0x3a   : > { %1358 = vrot.lane.b32.xlu2 %v1261_v42, %s3914_s22  ;;  %v1009_v47 = vshll.u32 %v4117_v41, 16  ;;  %v1006_v58 = vshrl.u32 %v4117_v41, 16  ;;  %v865_v5 = vpack.c.bf16 %v538_v53, %v538_v53  ;;  %v457_v15 = vmul.f32 %v3995_v0, %v413_v57 }
  0x3b   : > { %v866_v13 = vpack.c.bf16 %v539_v60, %v539_v60  ;;  %v867_v14 = vpack.c.bf16 %v540_v2, %v540_v2  ;;  %v1185_v16 = vrot.slane %v1016_v48, 1  ;;  %v944_v20 = vunpack.c.l.b16 %v864_v54 }
  0x3c   : > { %v1183_v59 = vrot.slane %v1009_v47, 1  ;;  %v945_v22 = vunpack.c.l.b16 %v865_v5  ;;  %v458_v23 = vmul.f32 %v3995_v0, %v414_v7  ;;  %v501_v27 = vadd.f32 %v4003_v6, %v457_v15 }
  0x3d   : > { %v946_v25 = vunpack.c.l.b16 %v866_v13  ;;  %v947_v26 = vunpack.c.l.b16 %v867_v14  ;;  %v1186_v31 = vor.u32 %v1185_v16, %v1013_v8  ;;  %v1002_v33 = vshll.u32 %v4130_v52, 16 }
  0x3e   : > { %v1184_v24 = vor.u32 %v1183_v59, %v1006_v58  ;;  %v502_v28 = vadd.f32 %v4003_v6, %v458_v23  ;;  %v541_v30 = vmax.f32 %v501_v27, 0.0  ;;  %v4155_v34 = vpack.c.b16 %v945_v22, %v944_v20  ;;  %v375_v22 = vld [vmem:[%s3990_s16 + $0x30] sm:$0xff]  }
  0x3f   : > { %v4150_v29 = vpack.c.b16 %v947_v26, %v946_v25  ;;  %v1246_v44 = vsel %vm4047_vm2, %v1186_v31, 0  ;;  %v999_v45 = vshrl.u32 %v4130_v52, 16  ;;  %v1181_v46 = vrot.slane %v1002_v33, 1 }
  0x40   : > { %v542_v35 = vmax.f32 %v502_v28, 0.0  ;;  %v1245_v36 = vsel %vm4047_vm2, %v1184_v24, 0  ;;  %v868_v39 = vpack.c.bf16 %v541_v30, %v541_v30  ;;  %v1023_v54 = vshll.u32 %v4155_v34, 16 }
  0x41   : > { %1264 = vrot.lane.b32.xlu0 %v4130_v52, %s3913_s21  ;;  %1266 = vrot.lane.b32.xlu1 %v4117_v41, %s3913_s21  ;;  %v1027_v37 = vshrl.u32 %v4150_v29, 16  ;;  %v1030_v38 = vshll.u32 %v4150_v29, 16  ;;  %v1182_v53 = vor.u32 %v1181_v46, %v999_v45  ;;  %v1020_v7 = vshrl.u32 %v4155_v34, 16  ;;  %v3824_v46 = vld [vmem:[%s5525_s3 + $0x8] sm:$0x30] }
  0x42   : > { %1292 = vrot.lane.b32.xlu2 %v4038_v4, %s3913_s21  ;;  %v869_v40 = vpack.c.bf16 %v542_v35, %v542_v35  ;;  %v948_v43 = vunpack.c.l.b16 %v868_v39  ;;  %v1187_v13 = vrot.slane %v1023_v54, 1  ;;  %v415_v23 = vunpack.c.l.bf16 %v375_v22 }
  0x43   : > { %v1189_v42 = vrot.slane %v1030_v38, 1  ;;  %v1244_v5 = vsel %vm4047_vm2, %v1182_v53, 0  ;;  %v416_v24 = vunpack.c.h.bf16 %v375_v22  ;;  %v1120_v35 = vrot.slane %v1118_v17, 7 }
  0x44   : > { %v949_v49 = vunpack.c.l.b16 %v869_v40  ;;  %v1188_v15 = vor.u32 %v1187_v13, %v1020_v7  ;;  %v459_v25 = vmul.f32 %v3995_v0, %v415_v23  ;;  %v377_v40 = vld [vmem:[%s3990_s16 + $0x38] sm:$0xff]  }
  0x45   : > { %v1190_v50 = vor.u32 %v1189_v42, %v1027_v37  ;;  %v460_v26 = vmul.f32 %v3995_v0, %v416_v24  ;;  %v417_v17 = vunpack.c.l.bf16 %v377_v40  ;;  %v418_v53 = vunpack.c.h.bf16 %v377_v40 }
  0x46   : > { %v4173_v51 = vpack.c.b16 %v949_v49, %v948_v43  ;;  %v1247_v20 = vsel %vm4047_vm2, %v1188_v15, 0  ;;  %v503_v27 = vadd.f32 %v4003_v6, %v459_v25 }
  0x47   : > { %v1248_v59 = vsel %vm4047_vm2, %v1190_v50, 0  ;;  %v504_v28 = vadd.f32 %v4003_v6, %v460_v26  ;;  %v4222_v50 = vor.u32 %v1121_v19, %v1120_v35  ;;  %v462_v13 = vmul.f32 %v3995_v0, %v418_v53 }
  0x48   : > { %v1037_v57 = vshll.u32 %v4173_v51, 16  ;;  %v1034_v60 = vshrl.u32 %v4173_v51, 16  ;;  %v543_v30 = vmax.f32 %v503_v27, 0.0 }
  0x49   : > { %1326 = vrot.lane.b32.xlu0 %v1245_v36, %s3914_s22  ;;  %1270 = vrot.lane.b32.xlu1 %v4155_v34, %s3913_s21  ;;  %v544_v31 = vmax.f32 %v504_v28, 0.0  ;;  %v506_v12 = vadd.f32 %v4003_v6, %v462_v13 }
  0x4a   : > { %1328 = vrot.lane.b32.xlu2 %v1246_v44, %s3914_s22  ;;  %v1191_v2 = vrot.slane %v1037_v57, 1  ;;  %v870_v36 = vpack.c.bf16 %v543_v30, %v543_v30  ;;  %v3592_v44 = vld [vmem:[%s5525_s3 + $0x8] sm:$0xf] }
  0x4b   : > { %v871_v39 = vpack.c.bf16 %v544_v31, %v544_v31  ;;  %v3593_v49 = vor.u32 %v3824_v46, %v3592_v44  ;;  %v546_v15 = vmax.f32 %v506_v12, 0.0  ;;  %v379_v31 = vld [vmem:[%s3990_s16 + $0x40] sm:$0xff]  }
  0x4c   : > { %v1192_v14 = vor.u32 %v1191_v2, %v1034_v60  ;;  %v950_v42 = vunpack.c.l.b16 %v870_v36  ;;  %v419_v36 = vunpack.c.l.bf16 %v379_v31 }
  0x4d   : > { %v951_v43 = vunpack.c.l.b16 %v871_v39  ;;  %v1701_v2 = vsel %vm1699_vm3, %v3593_v49, 0  ;;  %v873_v23 = vpack.c.bf16 %v546_v15, %v546_v15  ;;  %v420_v39 = vunpack.c.h.bf16 %v379_v31 }
  0x4e   : > { %v1249_v16 = vsel %vm4047_vm2, %v1192_v14, 0  ;;  %3848 = vmatpush.bf16.msra.mxu2 %v1701_v2  ;;  %1710 = vmatpush.bf16.msra.mxu0 %v1701_v2 }
  0x4f   : > { %v953_v26 = vunpack.c.l.b16 %v873_v23  ;;  %v1106_v23 = vrot.slane %v1104_v61, 7 }
  0x51   : > { %1272 = vrot.lane.b32.xlu0 %v4150_v29, %s3913_s21  ;;  %1332 = vrot.lane.b32.xlu1 %v1248_v59, %s3914_s22  ;;  %v4224_v59 = vpack.c.b16 %v951_v43, %v950_v42  ;;  %v463_v42 = vmul.f32 %v3995_v0, %v419_v36  ;;  %v464_v43 = vmul.f32 %v3995_v0, %v420_v39 }
  0x52   : > { %1324 = vrot.lane.b32.xlu2 %v1244_v5, %s3914_s22  ;;  %v461_v5 = vmul.f32 %v3995_v0, %v417_v17  ;;  %v1109_v36 = vor.u32 %v1107_v62, %v1106_v23  ;;  %v381_v62 = vld [vmem:[%s3990_s16 + $0x48] sm:$0xff]  }
  0x53   : > { %v507_v46 = vadd.f32 %v4003_v6, %v463_v42  ;;  %v508_v49 = vadd.f32 %v4003_v6, %v464_v43  ;;  %v1044_v53 = vshll.u32 %v4224_v59, 16  ;;  %v1041_v13 = vshrl.u32 %v4224_v59, 16 }
  0x54   : > { %v505_v14 = vadd.f32 %v4003_v6, %v461_v5 }
  0x55   : > { %v547_v2 = vmax.f32 %v507_v46, 0.0  ;;  %v548_v5 = vmax.f32 %v508_v49, 0.0  ;;  %v421_v46 = vunpack.c.l.bf16 %v381_v62  ;;  %v422_v49 = vunpack.c.h.bf16 %v381_v62  ;;  %v383_v62 = vld [vmem:[%s3990_s16 + $0x50] sm:$0xff]  }
  0x56   : > { %v545_v19 = vmax.f32 %v505_v14, 0.0  ;;  %v1193_v14 = vrot.slane %v1044_v53, 1 }
  0x57   : > { %v874_v12 = vpack.c.bf16 %v547_v2, %v547_v2 }
  0x58   : > { %v872_v22 = vpack.c.bf16 %v545_v19, %v545_v19  ;;  %v875_v19 = vpack.c.bf16 %v548_v5, %v548_v5 }
  0x59   : > { %1334 = vrot.lane.b32.xlu0 %v1249_v16, %s3914_s22  ;;  %1276 = vrot.lane.b32.xlu1 %v4224_v59, %s3913_s21  ;;  %v3614_v16 = vld [vmem:[%s5525_s3] sm:$0xf] }
  0x5a   : > { %1330 = vrot.lane.b32.xlu2 %v1247_v20, %s3914_s22  ;;  %v3823_v20 = vld [vmem:[%s5525_s3] sm:$0x30]  ;;  %v952_v25 = vunpack.c.l.b16 %v872_v22  ;;  %v955_v22 = vunpack.c.l.b16 %v875_v19  ;;  %v466_v19 = vmul.f32 %v3995_v0, %v422_v49  ;;  %v423_v49 = vunpack.c.l.bf16 %v383_v62 }
  0x5b   : > { %v3615_v24 = vor.u32 %v3823_v20, %v3614_v16  ;;  %v1194_v16 = vor.u32 %v1193_v14, %v1041_v13  ;;  %v954_v20 = vunpack.c.l.b16 %v874_v12  ;;  %v465_v12 = vmul.f32 %v3995_v0, %v421_v46 }
  0x5c   : > { %v4240_v28 = vpack.c.b16 %v953_v26, %v952_v25  ;;  %v510_v23 = vadd.f32 %v4003_v6, %v466_v19  ;;  %v467_v19 = vmul.f32 %v3995_v0, %v423_v49 }
  0x5d   : > { %v1810_v27 = vsel %vm1699_vm3, %v3615_v24, 0  ;;  %v1250_v24 = vsel %vm4047_vm2, %v1194_v16, 0  ;;  %v4270_v25 = vpack.c.b16 %v955_v22, %v954_v20  ;;  %v1113_v16 = vrot.slane %v1111_v63, 7 }
  0x5e   : > { %3849 = vmatpush.bf16.msrb.mxu2 %v1810_v27  ;;  %1819 = vmatpush.bf16.msra.mxu1 %v1810_v27  ;;  %v1051_v30 = vshll.u32 %v4240_v28, 16  ;;  %v1048_v35 = vshrl.u32 %v4240_v28, 16  ;;  %v509_v22 = vadd.f32 %v4003_v6, %v465_v12 }
  0x5f   : > { %v1058_v26 = vshll.u32 %v4270_v25, 16  ;;  %v1055_v39 = vshrl.u32 %v4270_v25, 16 }
  0x60   : > { %v1195_v40 = vrot.slane %v1051_v30, 1 }
  0x61   : > { %1278 = vrot.lane.b32.xlu0 %v4240_v28, %s3913_s21  ;;  %v1197_v61 = vrot.slane %v1058_v26, 1 }
  0x62   : > { %1274 = vrot.lane.b32.xlu2 %v4173_v51, %s3913_s21  ;;  %v1196_v44 = vor.u32 %v1195_v40, %v1048_v35  ;;  %v1043_v51 = vrot.slane %v1041_v13, 7 }
  0x63   : > { %v1198_v43 = vor.u32 %v1197_v61, %v1055_v39 }
  0x64   : > { %v1251_v17 = vsel %vm4047_vm2, %v1196_v44, 0  ;;  %v1176_v44 = vsel %vm4279_vm6, 0, %v1109_v36  ;;  %v1116_v36 = vor.u32 %v1114_v1, %v1113_v16  ;;  %v511_v16 = vadd.f32 %v4003_v6, %v467_v19 }
  0x65   : > { %1338 = vrot.lane.b32.xlu1 %v1251_v17, %s3914_s22  ;;  %v1252_v55 = vsel %vm4047_vm2, %v1198_v43, 0 }
  0x69   : > { %1340 = vrot.lane.b32.xlu0 %v1252_v55, %s3914_s22 }
  0x6a   : > { %1336 = vrot.lane.b32.xlu2 %v1250_v24, %s3914_s22  ;;  %v549_v24 = vmax.f32 %v509_v22, 0.0  ;;  %v1001_v22 = vrot.slane %v999_v45, 7 }
  0x6c   : > { %v876_v61 = vpack.c.bf16 %v549_v24, %v549_v24  ;;  %v1004_v45 = vor.u32 %v1002_v33, %v1001_v22 }
  0x6e   : > { %v956_v46 = vunpack.c.l.b16 %v876_v61 }
  0x72   : > { %1280 = vrot.lane.b32.xlu2 %v4270_v25, %s3913_s21 }
  0x8c   : > { %v4262_v15 = vpop.permute.xlu2 %1298 }
  0x93   : > { %v1295_v27 = vpop.permute.xlu0 %1294  ;;  %v1297_v31 = vpop.permute.xlu1 %1296 }
  0x94   : > { %v4283_v42 = vpop.permute.xlu2 %1358  ;;  %v1412_v17 = vsel %vm1364_vm7, %v1176_v44, %v1295_v27  ;;  %v550_v27 = vmax.f32 %v510_v23, 0.0 }
  0x96   : > { %v877_v43 = vpack.c.bf16 %v550_v27, %v550_v27  ;;  %v551_v27 = vmax.f32 %v511_v16, 0.0 }
  0x98   : > { %v957_v63 = vunpack.c.l.b16 %v877_v43 }
  0x9a   : > { %v4318_v12 = vpack.c.b16 %v957_v63, %v956_v46  ;;  %v878_v46 = vpack.c.bf16 %v551_v27, %v551_v27  ;;  %v1008_v63 = vrot.slane %v1006_v58, 7  ;;  %v385_v58 = vld [vmem:[%s3990_s16 + $0x58] sm:$0xff]  }
  0x9b   : > { %v1355_v2 = vpop.permute.xlu0 %1354  ;;  %v1357_v5 = vpop.permute.xlu1 %1356 }
  0x9c   : > { %v4297_v14 = vsel %vm1425_vm8, %v1412_v17, %v1355_v2  ;;  %v4305_v20 = vpop.permute.xlu2 %1292  ;;  %v424_v17 = vunpack.c.h.bf16 %v383_v62  ;;  %v1177_v2 = vsel %vm4279_vm6, 0, %v1116_v36  ;;  %1282 = vrot.lane.b32.xlu1 %v4318_v12, %s3913_s21  ;;  %v958_v49 = vunpack.c.l.b16 %v878_v46 }
  0x9d   : > { %3608 = vmatmul.msk.bf16.vlgmr.msra.gmra.mxu2 %vm1662_vm9, %v4297_v14  ;;  %v1415_v23 = vsel %vm1364_vm7, %v1177_v2, %v1297_v31  ;;  %v1011_v19 = vor.u32 %v1009_v47, %v1008_v63  ;;  %v1178_v47 = vsel %vm4279_vm6, 0, %v4222_v50 }
  0x9e   : > { %v468_v56 = vmul.f32 %v3995_v0, %v424_v17  ;;  %v4334_v43 = vsel %vm1425_vm8, %v1415_v23, %v1357_v5  ;;  %v1161_v5 = vsel %vm4279_vm6, 0, %v1004_v45  ;;  %v425_v23 = vunpack.c.l.bf16 %v385_v58 }
  0x9f   : > { %v1162_v46 = vsel %vm4279_vm6, 0, %v1011_v19  ;;  %v1418_v50 = vsel %vm1364_vm7, %v1178_v47, %v4262_v15 }
  0xa0   : > { %v512_v24 = vadd.f32 %v4003_v6, %v468_v56  ;;  %v469_v45 = vmul.f32 %v3995_v0, %v425_v23  ;;  %v1015_v23 = vrot.slane %v1013_v8, 7  ;;  %v3825_v8 = vld [vmem:[%s5525_s3 + $0x10] sm:$0x30] }
  0xa2   : > { %v552_v61 = vmax.f32 %v512_v24, 0.0  ;;  %v426_v24 = vunpack.c.h.bf16 %v385_v58 }
  0xa3   : > { %v4311_v44 = vpop.permute.xlu0 %1300  ;;  %v4313_v55 = vpop.permute.xlu1 %1360 }
  0xa4   : > { %v4322_v1 = vpop.permute.xlu2 %1328  ;;  %v879_v31 = vpack.c.bf16 %v552_v61, %v552_v61 }
  0xa6   : > { %v959_v17 = vunpack.c.l.b16 %v879_v31  ;;  %v470_v31 = vmul.f32 %v3995_v0, %v426_v24 }
  0xa8   : > { %v4346_v2 = vpack.c.b16 %v959_v17, %v958_v49  ;;  %v513_v49 = vadd.f32 %v4003_v6, %v469_v45  ;;  %v514_v17 = vadd.f32 %v4003_v6, %v470_v31 }
  0xaa   : > { %1284 = vrot.lane.b32.xlu0 %v4346_v2, %s3913_s21  ;;  %v1069_v52 = vshrl.u32 %v4346_v2, 16  ;;  %v1072_v33 = vshll.u32 %v4346_v2, 16  ;;  %v554_v58 = vmax.f32 %v514_v17, 0.0  ;;  %v1018_v17 = vor.u32 %v1016_v48, %v1015_v23 }
  0xab   : > { %v4331_v36 = vpop.permute.xlu0 %1352  ;;  %v4336_v62 = vpop.permute.xlu1 %1268 }
  0xac   : > { %v1325_v56 = vpop.permute.xlu2 %1324  ;;  %v1201_v41 = vrot.slane %v1072_v33, 1 }
  0xad   : > { %3609 = vmatmul.msk.bf16.gmra.mxu2 %vm1662_vm9, %v4334_v43 }
  0xae   : > { %v1202_v63 = vor.u32 %v1201_v41, %v1069_v52  ;;  %v1062_v41 = vshrl.u32 %v4318_v12, 16 }
  0xb0   : > { %v1254_v19 = vsel %vm4047_vm2, %v1202_v63, 0 }
  0xb1   : > { %1344 = vrot.lane.b32.xlu1 %v1254_v19, %s3914_s22 }
  0xb3   : > { %v1265_v16 = vpop.permute.xlu0 %1264  ;;  %v1267_v61 = vpop.permute.xlu1 %1266 }
  0xb4   : > { %v1367_v22 = vsel %vm1364_vm7, %v1161_v5, %v1265_v16  ;;  %v1370_v5 = vsel %vm1364_vm7, %v1162_v46, %v1267_v61  ;;  %v553_v16 = vmax.f32 %v513_v49, 0.0  ;;  %v881_v61 = vpack.c.bf16 %v554_v58, %v554_v58 }
  0xb5   : > { %v1427_v27 = vsel %vm1425_vm8, %v1367_v22, %v1325_v56  ;;  %v1065_v56 = vshll.u32 %v4318_v12, 16  ;;  %v1127_v22 = vrot.slane %v1125_v10, 7  ;;  %v3638_v10 = vld [vmem:[%s5525_s3 + $0x10] sm:$0xf]  ;;  %v1071_v12 = vrot.slane %v1069_v52, 7 }
  0xb6   : > { %3616 = vmatmul.msk.bf16.vlgmr.msra.gmra.mxu1 %vm1662_vm9, %v1427_v27  ;;  %v4385_v27 = vsel %vm1425_vm8, %v1418_v50, %v4283_v42  ;;  %v880_v42 = vpack.c.bf16 %v553_v16, %v553_v16  ;;  %v3639_v46 = vor.u32 %v3825_v8, %v3638_v10  ;;  %v961_v63 = vunpack.c.l.b16 %v881_v61 }
  0xb7   : > { %v1199_v47 = vrot.slane %v1065_v56, 1  ;;  %v1130_v49 = vor.u32 %v1128_v11, %v1127_v22  ;;  %v1163_v11 = vsel %vm4279_vm6, 0, %v1018_v17  ;;  %v1099_v8 = vrot.slane %v1097_v32, 7 }
  0xb8   : > { %v960_v31 = vunpack.c.l.b16 %v880_v42  ;;  %v1922_v50 = vsel %vm1699_vm3, %v3639_v46, 0  ;;  %v1373_v22 = vsel %vm1364_vm7, %v1163_v11, %v4336_v62  ;;  %v1022_v42 = vrot.slane %v1020_v7, 7 }
  0xb9   : > { %v1200_v45 = vor.u32 %v1199_v47, %v1062_v41  ;;  %1931 = vmatpush.bf16.msra.mxu2 %v1922_v50  ;;  %v1179_v3 = vsel %vm4279_vm6, 0, %v1130_v49  ;;  %v387_v47 = vld [vmem:[%s3990_s16 + $0x60] sm:$0xff]   ;;  %v4433_v10 = vsel %vm1425_vm8, %v1373_v22, %v4322_v1  ;;  %v1102_v32 = vor.u32 %v1100_v18, %v1099_v8 }
  0xba   : > { %v4409_v19 = vpack.c.b16 %v961_v63, %v960_v31  ;;  %v1421_v48 = vsel %vm1364_vm7, %v1179_v3, %v4311_v44  ;;  %v427_v62 = vunpack.c.l.bf16 %v387_v47  ;;  %v1025_v7 = vor.u32 %v1023_v54, %v1022_v42 }
  0xbb   : > { %v1327_v24 = vpop.permute.xlu0 %1326  ;;  %v4437_v44 = vsel %vm1425_vm8, %v1421_v48, %v4313_v55  ;;  %v1175_v17 = vsel %vm4279_vm6, 0, %v1102_v32  ;;  %v1271_v3 = vpop.permute.xlu1 %1270 }
  0xbc   : > { %v1429_v15 = vsel %vm1425_vm8, %v1370_v5, %v1327_v24  ;;  %v1253_v5 = vsel %vm4047_vm2, %v1200_v45, 0  ;;  %v1076_v16 = vshrl.u32 %v4409_v19, 16  ;;  %v1079_v58 = vshll.u32 %v4409_v19, 16 }
  0xbd   : > { %3594 = vmatmul.msk.bf16.vlgmr.msra.gmra.mxu0 %vm1662_vm9, %v1429_v15  ;;  %3610 = vmatmul.msk.bf16.gmra.mxu2 %vm1662_vm9, %v4385_v27  ;;  %v471_v61 = vmul.f32 %v3995_v0, %v427_v62  ;;  %v1164_v50 = vsel %vm4279_vm6, 0, %v1025_v7  ;;  %v1409_v22 = vsel %vm1364_vm7, %v1175_v17, %v4305_v20  ;;  %v1029_v20 = vrot.slane %v1027_v37, 7 }
  0xbe   : > { %1342 = vrot.lane.b32.xlu2 %v1253_v5, %s3914_s22  ;;  %v1203_v21 = vrot.slane %v1079_v58, 1  ;;  %v389_v5 = vld [vmem:[%s3990_s16 + $0x68] sm:$0xff]  }
  0xbf   : > { %v515_v55 = vadd.f32 %v4003_v6, %v471_v61  ;;  %v429_v48 = vunpack.c.l.bf16 %v389_v5  ;;  %v430_v4 = vunpack.c.h.bf16 %v389_v5  ;;  %v1036_v5 = vrot.slane %v1034_v60, 7 }
  0xc0   : > { %v1204_v23 = vor.u32 %v1203_v21, %v1076_v16 }
  0xc1   : > { %v555_v45 = vmax.f32 %v515_v55, 0.0  ;;  %v473_v34 = vmul.f32 %v3995_v0, %v429_v48  ;;  %v474_v54 = vmul.f32 %v3995_v0, %v430_v4  ;;  %v1039_v48 = vor.u32 %v1037_v57, %v1036_v5 }
  0xc2   : > { %v1255_v24 = vsel %vm4047_vm2, %v1204_v23, 0  ;;  %v1376_v23 = vsel %vm1364_vm7, %v1164_v50, %v1271_v3  ;;  %v1046_v57 = vor.u32 %v1044_v53, %v1043_v51 }
  0xc3   : > { %1346 = vrot.lane.b32.xlu0 %v1255_v24, %s3914_s22  ;;  %v882_v63 = vpack.c.bf16 %v555_v45, %v555_v45  ;;  %v1331_v24 = vpop.permute.xlu2 %1330  ;;  %v518_v62 = vadd.f32 %v4003_v6, %v474_v54  ;;  %v1273_v45 = vpop.permute.xlu0 %1272  ;;  %v1166_v4 = vsel %vm4279_vm6, 0, %v1039_v48 }
  0xc4   : > { %v4479_v8 = vsel %vm1425_vm8, %v1376_v23, %v1331_v24  ;;  %v1167_v24 = vsel %vm4279_vm6, 0, %v1046_v57 }
  0xc5   : > { %v962_v11 = vunpack.c.l.b16 %v882_v63  ;;  %v558_v42 = vmax.f32 %v518_v62, 0.0  ;;  %v1333_v63 = vpop.permute.xlu1 %1332 }
  0xc6   : > { %3617 = vmatmul.msk.bf16.gmra.mxu1 %vm1662_vm9, %v1429_v15  ;;  %1286 = vrot.lane.b32.xlu2 %v4409_v19, %s3913_s21  ;;  %v428_v15 = vunpack.c.h.bf16 %v387_v47  ;;  %v517_v47 = vadd.f32 %v4003_v6, %v473_v34 }
  0xc8   : > { %v472_v1 = vmul.f32 %v3995_v0, %v428_v15  ;;  %v4476_v15 = vsel %vm1425_vm8, %v1409_v22, %v4331_v36  ;;  %v557_v0 = vmax.f32 %v517_v47, 0.0  ;;  %v1032_v36 = vor.u32 %v1030_v38, %v1029_v20 }
  0xca   : > { %v516_v46 = vadd.f32 %v4003_v6, %v472_v1  ;;  %v884_v61 = vpack.c.bf16 %v557_v0, %v557_v0  ;;  %v885_v1 = vpack.c.bf16 %v558_v42, %v558_v42  ;;  %v1165_v7 = vsel %vm4279_vm6, 0, %v1032_v36 }
  0xcb   : > { %v1379_v38 = vsel %vm1364_vm7, %v1165_v7, %v1273_v45  ;;  %v1275_v34 = vpop.permute.xlu2 %1274  ;;  %v1335_v22 = vpop.permute.xlu0 %1334  ;;  %v1050_v42 = vrot.slane %v1048_v35, 7 }
  0xcc   : > { %v556_v31 = vmax.f32 %v516_v46, 0.0  ;;  %v964_v6 = vunpack.c.l.b16 %v884_v61  ;;  %v965_v55 = vunpack.c.l.b16 %v885_v1  ;;  %v4508_v17 = vsel %vm1425_vm8, %v1379_v38, %v1333_v63 }
  0xcd   : > { %3595 = vmatmul.msk.bf16.gmra.mxu0 %vm1662_vm9, %v4433_v10  ;;  %3611 = vmatmul.msk.bf16.gmra.mxu2 %vm1662_vm9, %v4437_v44  ;;  %v1382_v54 = vsel %vm1364_vm7, %v1166_v4, %v1275_v34  ;;  %v1277_v47 = vpop.permute.xlu1 %1276  ;;  %v1053_v59 = vor.u32 %v1051_v30, %v1050_v42 }
  0xce   : > { %v883_v49 = vpack.c.bf16 %v556_v31, %v556_v31  ;;  %v4489_v46 = vpack.c.b16 %v965_v55, %v964_v6  ;;  %v4533_v23 = vsel %vm1425_vm8, %v1382_v54, %v1335_v22  ;;  %v1385_v62 = vsel %vm1364_vm7, %v1167_v24, %v1277_v47 }
  0xcf   : > { %v1168_v53 = vsel %vm4279_vm6, 0, %v1053_v59  ;;  %v1057_v6 = vrot.slane %v1055_v39, 7 }
  0xd0   : > { %v963_v21 = vunpack.c.l.b16 %v883_v49  ;;  %1290 = vrot.lane.b32.xlu0 %v4489_v46, %s3913_s21  ;;  %v1090_v37 = vshrl.u32 %v4489_v46, 16  ;;  %v1093_v32 = vshll.u32 %v4489_v46, 16 }
  0xd1   : > { %v1060_v30 = vor.u32 %v1058_v26, %v1057_v6 }
  0xd2   : > { %v4463_v18 = vpack.c.b16 %v963_v21, %v962_v11  ;;  %v1207_v31 = vrot.slane %v1093_v32, 1 }
  0xd3   : > { %v1337_v0 = vpop.permute.xlu2 %1336  ;;  %v1279_v20 = vpop.permute.xlu0 %1278  ;;  %v1169_v55 = vsel %vm4279_vm6, 0, %v1060_v30 }
  0xd4   : > { %1288 = vrot.lane.b32.xlu1 %v4463_v18, %s3913_s21  ;;  %v1208_v29 = vor.u32 %v1207_v31, %v1090_v37  ;;  %v1086_v50 = vshll.u32 %v4463_v18, 16  ;;  %v1083_v3 = vshrl.u32 %v4463_v18, 16  ;;  %v4549_v13 = vsel %vm1425_vm8, %v1385_v62, %v1337_v0 }
  0xd5   : > { %v1388_v61 = vsel %vm1364_vm7, %v1168_v53, %v1279_v20  ;;  %v1092_v18 = vrot.slane %v1090_v37, 7 }
  0xd6   : > { %3618 = vmatmul.msk.bf16.gmra.mxu1 %vm1662_vm9, %v4433_v10  ;;  %v1257_v49 = vsel %vm4047_vm2, %v1208_v29, 0  ;;  %v1205_v11 = vrot.slane %v1086_v50, 1 }
  0xd7   : > { %v1339_v1 = vpop.permute.xlu1 %1338 }
  0xd8   : > { %v1206_v21 = vor.u32 %v1205_v11, %v1083_v3  ;;  %v4565_v35 = vsel %vm1425_vm8, %v1388_v61, %v1339_v1 }
  0xda   : > { %v1256_v60 = vsel %vm4047_vm2, %v1206_v21, 0 }
  0xdb   : > { %1348 = vrot.lane.b32.xlu2 %v1256_v60, %s3914_s22  ;;  %v1281_v36 = vpop.permute.xlu2 %1280  ;;  %v1341_v7 = vpop.permute.xlu0 %1340  ;;  %v1074_v60 = vor.u32 %v1072_v33, %v1071_v12  ;;  %v1078_v33 = vrot.slane %v1076_v16, 7 }
  0xdc   : > { %1350 = vrot.lane.b32.xlu1 %v1257_v49, %s3914_s22  ;;  %v1391_v39 = vsel %vm1364_vm7, %v1169_v55, %v1281_v36 }
  0xdd   : > { %3596 = vmatmul.msk.bf16.gmra.mxu0 %vm1662_vm9, %v4479_v8  ;;  %3630 = vmatmul.msk.bf16.vlgmr.msrb.gmra.mxu2 %vm1662_vm9, %v4476_v15  ;;  %v4585_v31 = vsel %vm1425_vm8, %v1391_v39, %v1341_v7  ;;  %v1171_v54 = vsel %vm4279_vm6, 0, %v1074_v60  ;;  %v1081_v42 = vor.u32 %v1079_v58, %v1078_v33  ;;  %v1085_v58 = vrot.slane %v1083_v3, 7 }
  0xdf   : > { %v1172_v20 = vsel %vm4279_vm6, 0, %v1081_v42  ;;  %v1088_v39 = vor.u32 %v1086_v50, %v1085_v58 }
  0xe6   : > { %3619 = vmatmul.msk.bf16.gmra.mxu1 %vm1662_vm9, %v4479_v8 }
  0xed   : > { %3597 = vmatmul.msk.bf16.gmra.mxu0 %vm1662_vm9, %v4508_v17  ;;  %3631 = vmatmul.msk.bf16.gmra.mxu2 %vm1662_vm9, %v4297_v14 }
  0xf6   : > { %3620 = vmatmul.msk.bf16.gmra.mxu1 %vm1662_vm9, %v4508_v17 }
  0xfd   : > { %3598 = vmatmul.msk.bf16.gmra.mxu0 %vm1662_vm9, %v4533_v23  ;;  %3632 = vmatmul.msk.bf16.gmra.mxu2 %vm1662_vm9, %v4334_v43 }
 0x106   : > { %3621 = vmatmul.msk.bf16.gmra.mxu1 %vm1662_vm9, %v4533_v23 }
 0x10d   : > { %3599 = vmatmul.msk.bf16.gmra.mxu0 %vm1662_vm9, %v4549_v13  ;;  %3633 = vmatmul.msk.bf16.gmra.mxu2 %vm1662_vm9, %v4385_v27 }
 0x10e   : > { %v1283_v63 = vpop.permute.xlu1 %1282 }
 0x116   : > { %3622 = vmatmul.msk.bf16.gmra.mxu1 %vm1662_vm9, %v4549_v13 }
 0x118   : > { %v1343_v49 = vpop.permute.xlu2 %1342 }
 0x11c   : > { %v1285_v22 = vpop.permute.xlu0 %1284 }
 0x11d   : > { %3600 = vmatmul.msk.bf16.gmra.mxu0 %vm1662_vm9, %v4565_v35  ;;  %3640 = vmatmul.msk.bf16.vlgmr.msra.gmra.mxu2 %vm1662_vm9, %v4433_v10  ;;  %v1064_v10 = vrot.slane %v1062_v41, 7  ;;  %v1397_v51 = vsel %vm1364_vm7, %v1171_v54, %v1285_v22 }
 0x11f   : > { %v1067_v26 = vor.u32 %v1065_v56, %v1064_v10  ;;  %v1173_v10 = vsel %vm4279_vm6, 0, %v1088_v39 }
 0x120   : > { %v4573_v28 = vpop.f32.mrf.mxu2  ;;  %v1287_v61 = vpop.permute.xlu2 %1286 }
 0x121   : > { %v1170_v38 = vsel %vm4279_vm6, 0, %v1067_v26  ;;  %v1400_v16 = vsel %vm1364_vm7, %v1172_v20, %v1287_v61 }
 0x122   : > { %v1394_v41 = vsel %vm1364_vm7, %v1170_v38, %v1283_v63 }
 0x123   : > { %v1345_v57 = vpop.permute.xlu1 %1344 }
 0x124   : > { %v4627_v47 = vsel %vm1425_vm8, %v1397_v51, %v1345_v57 }
 0x126   : > { %3623 = vmatmul.msk.bf16.gmra.mxu1 %vm1662_vm9, %v4565_v35 }
 0x128   : > { %v4582_v45 = vpop.f32.mrf.mxu2 }
 0x12d   : > { %3601 = vmatmul.msk.bf16.gmra.mxu0 %vm1662_vm9, %v4585_v31  ;;  %3641 = vmatmul.msk.bf16.gmra.mxu2 %vm1662_vm9, %v4479_v8  ;;  %v4605_v8 = vsel %vm1425_vm8, %v1394_v41, %v1343_v49 }
 0x130   : > { %v4593_v25 = vpop.f32.mrf.mxu2 }
 0x133   : > { %v1821_v29 = vpop.f32.mrf.mxu1 }
 0x135   : > { %v1347_v1 = vpop.permute.xlu0 %1346 }
 0x136   : > { %3624 = vmatmul.msk.bf16.gmra.mxu1 %vm1662_vm9, %v4585_v31  ;;  %v1449_v55 = vsel %vm1425_vm8, %v1400_v16, %v1347_v1 }
 0x138   : > { %v4602_v5 = vpop.f32.mrf.mxu2 }
 0x13a   : > { %v1712_v11 = vpop.f32.mrf.mxu0 }
 0x13b   : > { %v4607_v21 = vadd.f32 %v1821_v29, %v1712_v11  ;;  %v1823_v56 = vpop.f32.mrf.mxu1  ;;  %v1349_v29 = vpop.permute.xlu2 %1348 }
 0x13d   : > { %3602 = vmatmul.msk.bf16.gmra.mxu0 %vm1662_vm9, %v4605_v8  ;;  %3642 = vmatmul.msk.bf16.gmra.mxu2 %vm1662_vm9, %v4508_v17 }
 0x140   : > { %v4615_v48 = vpop.f32.mrf.mxu2 }
 0x142   : > { %v1714_v4 = vpop.f32.mrf.mxu0  ;;  %v1291_v49 = vpop.permute.xlu0 %1290 }
 0x143   : > { %v4619_v34 = vadd.f32 %v1823_v56, %v1714_v4  ;;  %v1826_v52 = vpop.f32.mrf.mxu1 }
 0x146   : > { %3625 = vmatmul.msk.bf16.gmra.mxu1 %vm1662_vm9, %v4605_v8  ;;  %v1289_v26 = vpop.permute.xlu1 %1288 }
 0x147   : > { %v1403_v3 = vsel %vm1364_vm7, %v1173_v10, %v1289_v26 }
 0x148   : > { %v1794_v17 = vpop.f32.mrf.mxu2 }
 0x14a   : > { %v1717_v24 = vpop.f32.mrf.mxu0 }
 0x14b   : > { %v4629_v2 = vadd.f32 %v1826_v52, %v1717_v24  ;;  %v1828_v0 = vpop.f32.mrf.mxu1  ;;  %v4715_v52 = vld [vmem:[%s5526_s4] ss:$0 sm:$0xff] }
 0x14c   : > { %v4723_v24 = vld [vmem:[%s5527_s5] ss:$0 sm:$0xff] }
 0x14d   : > { %3603 = vmatmul.msk.bf16.gmra.mxu0 %vm1662_vm9, %v4627_v47  ;;  %3643 = vmatmul.msk.bf16.gmra.mxu2 %vm1662_vm9, %v4533_v23 }
 0x14e   : > { %v1351_v11 = vpop.permute.xlu1 %1350 }
 0x150   : > { %v1797_v62 = vpop.f32.mrf.mxu2 }
 0x152   : > { %v1719_v59 = vpop.f32.mrf.mxu0 }
 0x153   : > { %v4639_v53 = vadd.f32 %v1828_v0, %v1719_v59  ;;  %v1831_v30 = vpop.f32.mrf.mxu1 }
 0x156   : > { %3626 = vmatmul.msk.bf16.gmra.mxu1 %vm1662_vm9, %v4627_v47 }
 0x158   : > { %v1799_v6 = vpop.f32.mrf.mxu2 }
 0x15a   : > { %v1722_v23 = vpop.f32.mrf.mxu0 }
 0x15b   : > { %v4647_v19 = vadd.f32 %v1831_v30, %v1722_v23  ;;  %v1833_v54 = vpop.f32.mrf.mxu1 }
 0x15d   : > { %3604 = vmatmul.msk.bf16.gmra.mxu0 %vm1662_vm9, %v1449_v55  ;;  %3644 = vmatmul.msk.bf16.gmra.mxu2 %vm1662_vm9, %v4549_v13  ;;  %v4667_v13 = vsel %vm1425_vm8, %v1403_v3, %v1349_v29 }
 0x160   : > { %v1891_v36 = vpop.f32.mrf.mxu2 }
 0x161   : > { %v4657_v7 = vadd.f32 %v1891_v36, %v4573_v28  ;;  %v1095_v28 = vor.u32 %v1093_v32, %v1092_v18 }
 0x166   : > { %3627 = vmatmul.msk.bf16.gmra.mxu1 %vm1662_vm9, %v1449_v55 }
 0x168   : > { %v1893_v38 = vpop.f32.mrf.mxu2 }
 0x169   : > { %v4664_v63 = vadd.f32 %v1893_v38, %v4582_v45  ;;  %v1174_v45 = vsel %vm4279_vm6, 0, %v1095_v28 }
 0x16a   : > { %v1406_v37 = vsel %vm1364_vm7, %v1174_v45, %v1291_v49 }
 0x16b   : > { %v4689_v46 = vsel %vm1425_vm8, %v1406_v37, %v1351_v11 }
 0x16d   : > { %3605 = vmatmul.msk.bf16.gmra.mxu0 %vm1662_vm9, %v4667_v13  ;;  %3645 = vmatmul.msk.bf16.gmra.mxu2 %vm1662_vm9, %v4565_v35 }
 0x170   : > { %v1896_v50 = vpop.f32.mrf.mxu2 }
 0x171   : > { %v4678_v41 = vadd.f32 %v1896_v50, %v4593_v25 }
 0x176   : > { %3628 = vmatmul.msk.bf16.gmra.mxu1 %vm1662_vm9, %v4667_v13 }
 0x178   : > { %v1898_v12 = vpop.f32.mrf.mxu2 }
 0x179   : > { %v4686_v35 = vadd.f32 %v1898_v12, %v4602_v5 }
 0x17d   : > { %3606 = vmatmul.msk.bf16.gmra.mxu0 %vm1662_vm9, %v4689_v46  ;;  %3646 = vmatmul.msk.bf16.gmra.mxu2 %vm1662_vm9, %v4585_v31  ;;  %v1724_v31 = vpop.f32.mrf.mxu0 }
 0x180   : > { %v1901_v32 = vpop.f32.mrf.mxu2 }
 0x181   : > { %v4696_v25 = vadd.f32 %v1901_v32, %v4615_v48 }
 0x185   : > { %v4717_v57 = vpop.f32.mrf.mxu0 }
 0x186   : > { %3629 = vmatmul.msk.bf16.gmra.mxu1 %vm1662_vm9, %v4689_v46 }
 0x188   : > { %v1903_v56 = vpop.f32.mrf.mxu2 }
 0x189   : > { %v4700_v60 = vadd.f32 %v1903_v56, %v1794_v17 }
 0x18d   : > { %3607 = vmatmul.msk.bf16.gmra.mxu0 %vm1662_vm9, %v4476_v15  ;;  %3647 = vmatmul.msk.bf16.gmra.mxu2 %vm1662_vm9, %v4605_v8  ;;  %v1836_v8 = vpop.f32.mrf.mxu1  ;;  %v4728_v59 = vpop.f32.mrf.mxu0 }
 0x190   : > { %v1906_v5 = vpop.f32.mrf.mxu2 }
 0x191   : > { %v4706_v4 = vadd.f32 %v1906_v5, %v1797_v62 }
 0x195   : > { %v4730_v20 = vpop.f32.mrf.mxu1  ;;  %v4737_v39 = vpop.f32.mrf.mxu0 }
 0x198   : > { %v1908_v22 = vpop.f32.mrf.mxu2 }
 0x199   : > { %v4708_v48 = vadd.f32 %v1908_v22, %v1799_v6 }
 0x19d   : > { %3648 = vmatmul.msk.bf16.gmra.mxu2 %vm1662_vm9, %v4627_v47  ;;  %v4739_v10 = vpop.f32.mrf.mxu1 }
 0x1a0   : > { %v1933_v51 = vpop.f32.mrf.mxu2 }
 0x1a1   : > { %v2023_v17 = vadd.f32 %v1933_v51, %v4607_v21 }
 0x1a3   : > { %v2063_v33 = vmul.f32 %v4715_v52, %v2023_v17 }
 0x1a5   : > { %v2103_v47 = vadd.f32 %v4723_v24, %v2063_v33  ;;  %v1843_v12 = vpop.f32.mrf.mxu1 }
 0x1a7   : > { %v2139_v0 = vmax.f32 %v2103_v47, 0.0 }
 0x1a8   : > { %v1935_v62 = vpop.f32.mrf.mxu2 }
 0x1a9   : > { %v2024_v42 = vadd.f32 %v1935_v62, %v4619_v34  ;;  %v2175_v21 = vmul.f32 0.0, %v2139_v0  ;;  %v1834_v0 = vadd.f32 %v1833_v54, %v1724_v31 }
 0x1ab   : > { %v2064_v61 = vmul.f32 %v4715_v52, %v2024_v42  ;;  %v2211_v23 = vpack.c.bf16 %v2175_v21, %v2175_v21 }
 0x1ad   : > { %v2104_v16 = vadd.f32 %v4723_v24, %v2064_v61  ;;  %3649 = vmatmul.msk.bf16.gmra.mxu2 %vm1662_vm9, %v1449_v55  ;;  %v2283_v26 = vunpack.c.l.b16 %v2211_v23 }
 0x1af   : > { %v2140_v1 = vmax.f32 %v2104_v16, 0.0  ;;  %v4765_v16 = vpop.f32.mrf.mxu1 }
 0x1b0   : > { %v1938_v6 = vpop.f32.mrf.mxu2 }
 0x1b1   : > { %v2176_v30 = vmul.f32 0.0, %v2140_v1  ;;  %v2025_v58 = vadd.f32 %v1938_v6, %v4629_v2 }
 0x1b3   : > { %v2065_v36 = vmul.f32 %v4715_v52, %v2025_v58  ;;  %v2212_v34 = vpack.c.bf16 %v2176_v30, %v2176_v30  ;;  %v1837_v58 = vadd.f32 %v1836_v8, %v4717_v57 }
 0x1b5   : > { %v2284_v3 = vunpack.c.l.b16 %v2212_v34  ;;  %v2105_v29 = vadd.f32 %v4723_v24, %v2065_v36 }
 0x1b7   : > { %v4742_v38 = vpack.c.b16 %v2284_v3, %v2283_v26  ;;  %v2141_v28 = vmax.f32 %v2105_v29, 0.0 }
 0x1b8   : > { %v1940_v55 = vpop.f32.mrf.mxu2 }
 0x1b9   : > { %v2026_v18 = vadd.f32 %v1940_v55, %v4639_v53  ;;  %v2338_v50 = vshrl.u32 %v4742_v38, 16  ;;  %v2341_v45 = vshll.u32 %v4742_v38, 16  ;;  %v1734_v53 = vpop.f32.mrf.mxu0  ;;  %v2213_v32 = vpack.c.bf16 %v2141_v28, %v2141_v28 }
 0x1bb   : > { %v2066_v2 = vmul.f32 %v4715_v52, %v2026_v18  ;;  %v2340_v49 = vrot.slane %v2338_v50, 7  ;;  %v2285_v33 = vunpack.c.l.b16 %v2213_v32  ;;  %v1848_v18 = vpop.f32.mrf.mxu1  ;;  %v1839_v32 = vadd.f32 %v4730_v20, %v4728_v59 }
 0x1bd   : > { %v2106_v37 = vadd.f32 %v4723_v24, %v2066_v2  ;;  %3650 = vmatmul.msk.bf16.gmra.mxu2 %vm1662_vm9, %v4667_v13  ;;  %v4755_v11 = vor.u32 %v2341_v45, %v2340_v49 }
 0x1bf   : > { %v2142_v56 = vmax.f32 %v2106_v37, 0.0 }
 0x1c0   : > { %v1943_v5 = vpop.f32.mrf.mxu2 }
 0x1c1   : > { %v2027_v22 = vadd.f32 %v1943_v5, %v4647_v19  ;;  %v2214_v51 = vpack.c.bf16 %v2142_v56, %v2142_v56  ;;  %v4763_v21 = vpop.f32.mrf.mxu0 }
 0x1c3   : > { %v2067_v17 = vmul.f32 %v4715_v52, %v2027_v22  ;;  %v2286_v47 = vunpack.c.l.b16 %v2214_v51  ;;  %v4796_v59 = vpop.f32.mrf.mxu1 }
 0x1c5   : > { %v4759_v62 = vpack.c.b16 %v2286_v47, %v2285_v33  ;;  %v2107_v13 = vadd.f32 %v4723_v24, %v2067_v17 }
 0x1c7   : > { %v2345_v42 = vshrl.u32 %v4759_v62, 16  ;;  %v2348_v6 = vshll.u32 %v4759_v62, 16  ;;  %v2143_v23 = vmax.f32 %v2107_v13, 0.0 }
 0x1c8   : > { %v1945_v61 = vpop.f32.mrf.mxu2 }
 0x1c9   : > { %v2028_v1 = vadd.f32 %v1945_v61, %v1834_v0  ;;  %v2347_v19 = vrot.slane %v2345_v42, 7  ;;  %v2215_v36 = vpack.c.bf16 %v2143_v23, %v2143_v23  ;;  %v1739_v55 = vpop.f32.mrf.mxu0  ;;  %v1842_v0 = vadd.f32 %v4739_v10, %v4737_v39 }
 0x1cb   : > { %v2068_v30 = vmul.f32 %v4715_v52, %v2028_v1  ;;  %v4773_v31 = vor.u32 %v2348_v6, %v2347_v19  ;;  %v2287_v28 = vunpack.c.l.b16 %v2215_v36 }
 0x1cd   : > { %v2108_v54 = vadd.f32 %v4723_v24, %v2068_v30  ;;  %3651 = vmatmul.msk.bf16.gmra.mxu2 %vm1662_vm9, %v4689_v46 }
 0x1cf   : > { %v2144_v34 = vmax.f32 %v2108_v54, 0.0 }
 0x1d0   : > { %v1948_v26 = vpop.f32.mrf.mxu2 }
 0x1d1   : > { %v2216_v3 = vpack.c.bf16 %v2144_v34, %v2144_v34  ;;  %v2029_v29 = vadd.f32 %v1948_v26, %v1837_v58  ;;  %v4794_v47 = vpop.f32.mrf.mxu0  ;;  %v1844_v34 = vadd.f32 %v1843_v12, %v1734_v53 }
 0x1d3   : > { %v2288_v2 = vunpack.c.l.b16 %v2216_v3  ;;  %v2069_v49 = vmul.f32 %v4715_v52, %v2029_v29  ;;  %v1853_v3 = vpop.f32.mrf.mxu1 }
 0x1d5   : > { %v4780_v37 = vpack.c.b16 %v2288_v2, %v2287_v28  ;;  %v2109_v46 = vadd.f32 %v4723_v24, %v2069_v49 }
 0x1d7   : > { %v2352_v57 = vshrl.u32 %v4780_v37, 16  ;;  %v2355_v22 = vshll.u32 %v4780_v37, 16  ;;  %v2145_v51 = vmax.f32 %v2109_v46, 0.0 }
 0x1d8   : > { %v1950_v8 = vpop.f32.mrf.mxu2 }
 0x1d9   : > { %v2030_v56 = vadd.f32 %v1950_v8, %v1839_v32  ;;  %v2354_v5 = vrot.slane %v2352_v57, 7  ;;  %v2217_v13 = vpack.c.bf16 %v2145_v51, %v2145_v51  ;;  %v1744_v26 = vpop.f32.mrf.mxu0 }
 0x1db   : > { %v2070_v17 = vmul.f32 %v4715_v52, %v2030_v56  ;;  %v4792_v33 = vor.u32 %v2355_v22, %v2354_v5  ;;  %v2289_v54 = vunpack.c.l.b16 %v2217_v13  ;;  %v1847_v5 = vadd.f32 %v4765_v16, %v4763_v21  ;;  %v1856_v13 = vpop.f32.mrf.mxu1 }
 0x1dd   : > { %v2110_v20 = vadd.f32 %v4723_v24, %v2070_v17  ;;  %3652 = vmatmul.msk.bf16.gmra.mxu2 %vm1662_vm9, %v4476_v15 }
 0x1df   : > { %v2146_v61 = vmax.f32 %v2110_v20, 0.0 }
 0x1e0   : > { %v1953_v1 = vpop.f32.mrf.mxu2 }
 0x1e1   : > { %v2031_v19 = vadd.f32 %v1953_v1, %v1842_v0  ;;  %v2218_v23 = vpack.c.bf16 %v2146_v61, %v2146_v61  ;;  %v1747_v0 = vpop.f32.mrf.mxu0 }
 0x1e3   : > { %v2071_v30 = vmul.f32 %v4715_v52, %v2031_v19  ;;  %v2290_v58 = vunpack.c.l.b16 %v2218_v23 }
 0x1e5   : > { %v2322_v36 = vpack.c.b16 %v2290_v58, %v2289_v54  ;;  %v2111_v29 = vadd.f32 %v4723_v24, %v2071_v30  ;;  %v1849_v54 = vadd.f32 %v1848_v18, %v1739_v55 }
 0x1e7   : > { %2577 = vrot.lane.b32.xlu2 %v2322_v36, %s3914_s22  ;;  %v2359_v15 = vshrl.u32 %v2322_v36, 16  ;;  %v2362_v28 = vshll.u32 %v2322_v36, 16  ;;  %v2147_v32 = vmax.f32 %v2111_v29, 0.0 }
 0x1e8   : > { %v1955_v39 = vpop.f32.mrf.mxu2 }
 0x1e9   : > { %v2032_v10 = vadd.f32 %v1955_v39, %v1844_v34  ;;  %v2505_v2 = vrot.slane %v2362_v28, 1  ;;  %v2361_v49 = vrot.slane %v2359_v15, 7  ;;  %v2219_v51 = vpack.c.bf16 %v2147_v32, %v2147_v32  ;;  %v1858_v39 = vpop.f32.mrf.mxu1 }
 0x1eb   : > { %v2072_v46 = vmul.f32 %v4715_v52, %v2032_v10  ;;  %v2506_v8 = vor.u32 %v2505_v2, %v2359_v15  ;;  %v4807_v56 = vor.u32 %v2362_v28, %v2361_v49  ;;  %v2291_v23 = vunpack.c.l.b16 %v2219_v51  ;;  %v1749_v28 = vpop.f32.mrf.mxu0 }
 0x1ed   : > { %v2112_v53 = vadd.f32 %v4723_v24, %v2072_v46  ;;  %3653 = vmatmul.msk.bf16.gmra.mxu2 %vm1662_vm9, %v4297_v14  ;;  %v2556_v12 = vsel %vm4047_vm2, %v2506_v8, 0  ;;  %v1852_v46 = vadd.f32 %v4796_v59, %v4794_v47 }
 0x1ee   : > { %2631 = vrot.lane.b32.xlu0 %v2556_v12, %s3915_s25 }
 0x1ef   : > { %v2148_v17 = vmax.f32 %v2112_v53, 0.0 }
 0x1f0   : > { %v1958_v20 = vpop.f32.mrf.mxu2 }
 0x1f1   : > { %v2033_v61 = vadd.f32 %v1958_v20, %v1847_v5  ;;  %v2220_v1 = vpack.c.bf16 %v2148_v17, %v2148_v17 }
 0x1f3   : > { %v2073_v19 = vmul.f32 %v4715_v52, %v2033_v61  ;;  %v2292_v14 = vunpack.c.l.b16 %v2220_v1  ;;  %v1752_v1 = vpop.f32.mrf.mxu0 }
 0x1f5   : > { %v2323_v30 = vpack.c.b16 %v2292_v14, %v2291_v23  ;;  %v2113_v58 = vadd.f32 %v4723_v24, %v2073_v19  ;;  %v1861_v19 = vpop.f32.mrf.mxu1  ;;  %v1854_v23 = vadd.f32 %v1853_v3, %v1744_v26  ;;  %v1857_v3 = vadd.f32 %v1856_v13, %v1747_v0 }
 0x1f7   : > { %2579 = vrot.lane.b32.xlu1 %v2323_v30, %s3914_s22  ;;  %v2366_v36 = vshrl.u32 %v2323_v30, 16  ;;  %v2369_v34 = vshll.u32 %v2323_v30, 16  ;;  %v2149_v10 = vmax.f32 %v2113_v58, 0.0 }
 0x1f8   : > { %v1960_v21 = vpop.f32.mrf.mxu2 }
 0x1f9   : > { %v2034_v16 = vadd.f32 %v1960_v21, %v1849_v54  ;;  %v2368_v29 = vrot.slane %v2366_v36, 7  ;;  %v2507_v15 = vrot.slane %v2369_v34, 1  ;;  %v2221_v8 = vpack.c.bf16 %v2149_v10, %v2149_v10 }
 0x1fb   : > { %v2074_v2 = vmul.f32 %v4715_v52, %v2034_v16  ;;  %v2508_v49 = vor.u32 %v2507_v15, %v2366_v36  ;;  %v4821_v32 = vor.u32 %v2369_v34, %v2368_v29  ;;  %v2293_v20 = vunpack.c.l.b16 %v2221_v8  ;;  %v1754_v10 = vpop.f32.mrf.mxu0 }
 0x1fd   : > { %v2114_v55 = vadd.f32 %v4723_v24, %v2074_v2  ;;  %3654 = vmatmul.msk.bf16.gmra.mxu2 %vm1662_vm9, %v4334_v43  ;;  %v2557_v18 = vsel %vm4047_vm2, %v2508_v49, 0  ;;  %v1863_v2 = vpop.f32.mrf.mxu1 }
 0x1fe   : > { %2633 = vrot.lane.b32.xlu2 %v2557_v18, %s3915_s25 }
 0x1ff   : > { %v2150_v53 = vmax.f32 %v2114_v55, 0.0 }
 0x200   : > { %v1963_v12 = vpop.f32.mrf.mxu2 }
 0x201   : > { %v2035_v5 = vadd.f32 %v1963_v12, %v1852_v46  ;;  %v2222_v51 = vpack.c.bf16 %v2150_v53, %v2150_v53 }
 0x203   : > { %v2075_v17 = vmul.f32 %v4715_v52, %v2035_v5  ;;  %v2294_v61 = vunpack.c.l.b16 %v2222_v51  ;;  %v1757_v13 = vpop.f32.mrf.mxu0 }
 0x205   : > { %v2324_v43 = vpack.c.b16 %v2294_v61, %v2293_v20  ;;  %v2115_v14 = vadd.f32 %v4723_v24, %v2075_v17  ;;  %v1859_v17 = vadd.f32 %v1858_v39, %v1749_v28 }
 0x207   : > { %2581 = vrot.lane.b32.xlu0 %v2324_v43, %s3914_s22  ;;  %v2373_v30 = vshrl.u32 %v2324_v43, 16  ;;  %v2376_v54 = vshll.u32 %v2324_v43, 16  ;;  %v2151_v34 = vmax.f32 %v2115_v14, 0.0  ;;  %v1866_v43 = vpop.f32.mrf.mxu1 }
 0x208   : > { %v1965_v47 = vpop.f32.mrf.mxu2 }
 0x209   : > { %v2036_v59 = vadd.f32 %v1965_v47, %v1854_v23  ;;  %v2375_v58 = vrot.slane %v2373_v30, 7  ;;  %v2509_v36 = vrot.slane %v2376_v54, 1  ;;  %v2223_v49 = vpack.c.bf16 %v2151_v34, %v2151_v34 }
 0x20b   : > { %v2076_v21 = vmul.f32 %v4715_v52, %v2036_v59  ;;  %v2510_v16 = vor.u32 %v2509_v36, %v2373_v30  ;;  %v4835_v29 = vor.u32 %v2376_v54, %v2375_v58  ;;  %v2295_v12 = vunpack.c.l.b16 %v2223_v49 }
 0x20c   : > { %v1862_v36 = vadd.f32 %v1861_v19, %v1752_v1 }
 0x20d   : > { %v2116_v15 = vadd.f32 %v4723_v24, %v2076_v21  ;;  %3655 = vmatmul.msk.bf16.gmra.mxu2 %vm1662_vm9, %v4385_v27  ;;  %v2558_v26 = vsel %vm4047_vm2, %v2510_v16, 0 }
 0x20e   : > { %2635 = vrot.lane.b32.xlu1 %v2558_v26, %s3915_s25 }
 0x20f   : > { %v2152_v55 = vmax.f32 %v2116_v15, 0.0  ;;  %v1868_v49 = vpop.f32.mrf.mxu1 }
 0x210   : > { %v1968_v18 = vpop.f32.mrf.mxu2 }
 0x211   : > { %v2037_v46 = vadd.f32 %v1968_v18, %v1857_v3  ;;  %v2224_v8 = vpack.c.bf16 %v2152_v55, %v2152_v55  ;;  %v1759_v3 = vpop.f32.mrf.mxu0 }
 0x213   : > { %v2077_v53 = vmul.f32 %v4715_v52, %v2037_v46  ;;  %v2296_v5 = vunpack.c.l.b16 %v2224_v8 }
 0x215   : > { %v2325_v51 = vpack.c.b16 %v2296_v5, %v2295_v12  ;;  %v2117_v27 = vadd.f32 %v4723_v24, %v2077_v53  ;;  %v1864_v53 = vadd.f32 %v1863_v2, %v1754_v10 }
 0x217   : > { %2583 = vrot.lane.b32.xlu2 %v2325_v51, %s3914_s22  ;;  %v2380_v20 = vshrl.u32 %v2325_v51, 16  ;;  %v2383_v61 = vshll.u32 %v2325_v51, 16  ;;  %v2153_v54 = vmax.f32 %v2117_v27, 0.0 }
 0x218   : > { %v1970_v0 = vpop.f32.mrf.mxu2 }
 0x219   : > { %v2038_v23 = vadd.f32 %v1970_v0, %v1859_v17  ;;  %v2382_v14 = vrot.slane %v2380_v20, 7  ;;  %v2511_v30 = vrot.slane %v2383_v61, 1  ;;  %v2225_v34 = vpack.c.bf16 %v2153_v54, %v2153_v54 }
 0x21b   : > { %v2078_v47 = vmul.f32 %v4715_v52, %v2038_v23  ;;  %v2512_v59 = vor.u32 %v2511_v30, %v2380_v20  ;;  %v4847_v58 = vor.u32 %v2383_v61, %v2382_v14  ;;  %v2297_v18 = vunpack.c.l.b16 %v2225_v34  ;;  %v1762_v23 = vpop.f32.mrf.mxu0  ;;  %v1871_v14 = vpop.f32.mrf.mxu1 }
 0x21c   : > { %v1867_v30 = vadd.f32 %v1866_v43, %v1757_v13 }
 0x21d   : > { %v2118_v28 = vadd.f32 %v4723_v24, %v2078_v47  ;;  %3656 = vmatmul.msk.bf16.gmra.mxu2 %vm1662_vm9, %v4437_v44  ;;  %v2559_v39 = vsel %vm4047_vm2, %v2512_v59, 0 }
 0x21e   : > { %2637 = vrot.lane.b32.xlu0 %v2559_v39, %s3915_s25 }
 0x21f   : > { %v2154_v21 = vmax.f32 %v2118_v28, 0.0 }
 0x220   : > { %v1973_v16 = vpop.f32.mrf.mxu2 }
 0x221   : > { %v2039_v15 = vadd.f32 %v1973_v16, %v1862_v36  ;;  %v2226_v26 = vpack.c.bf16 %v2154_v21, %v2154_v21 }
 0x223   : > { %v2079_v55 = vmul.f32 %v4715_v52, %v2039_v15  ;;  %v2298_v46 = vunpack.c.l.b16 %v2226_v26  ;;  %v1869_v15 = vadd.f32 %v1868_v49, %v1759_v3  ;;  %v3660_v26 = vld [vmem:[%s5528_s6 + $0x14] sm:$0xf] }
 0x225   : > { %v2326_v8 = vpack.c.b16 %v2298_v46, %v2297_v18  ;;  %v2119_v44 = vadd.f32 %v4723_v24, %v2079_v55  ;;  %v1764_v55 = vpop.f32.mrf.mxu0  ;;  %v1873_v18 = vpop.f32.mrf.mxu1 }
 0x227   : > { %2585 = vrot.lane.b32.xlu1 %v2326_v8, %s3914_s22  ;;  %v2387_v12 = vshrl.u32 %v2326_v8, 16  ;;  %v2390_v5 = vshll.u32 %v2326_v8, 16  ;;  %v2155_v27 = vmax.f32 %v2119_v44, 0.0  ;;  %v2764_v8 = vunpack.c.l.b16 %v3660_v26 }
 0x228   : > { %v1975_v1 = vpop.f32.mrf.mxu2 }
 0x229   : > { %v2040_v19 = vadd.f32 %v1975_v1, %v1864_v53  ;;  %v2389_v51 = vrot.slane %v2387_v12, 7  ;;  %v2513_v17 = vrot.slane %v2390_v5, 1  ;;  %v2227_v54 = vpack.c.bf16 %v2155_v27, %v2155_v27 }
 0x22a   : > { %v2766_v1 = vpack.c.b16 %v2764_v8, %v2764_v8 }
 0x22b   : > { %v2080_v20 = vmul.f32 %v4715_v52, %v2040_v19  ;;  %v2514_v61 = vor.u32 %v2513_v17, %v2387_v12  ;;  %v4859_v0 = vor.u32 %v2390_v5, %v2389_v51  ;;  %v2299_v34 = vunpack.c.l.b16 %v2227_v54 }
 0x22c   : > { %v2803_v17 = vsel %vm2801_vm10, %v2766_v1, 0 }
 0x22d   : > { %v2120_v10 = vadd.f32 %v4723_v24, %v2080_v20  ;;  %v2560_v2 = vsel %vm4047_vm2, %v2514_v61, 0  ;;  %3850 = vmatpush.bf16.msra.mxu3 %v2803_v17  ;;  %2811 = vmatpush.bf16.msrb.mxu2 %v2803_v17  ;;  %v3827_v61 = vld [vmem:[%s5528_s6 + $0xc] sm:$0xff] }
 0x22e   : > { %2639 = vrot.lane.b32.xlu2 %v2560_v2, %s3915_s25 }
 0x22f   : > { %v2156_v47 = vmax.f32 %v2120_v10, 0.0  ;;  %v1872_v10 = vadd.f32 %v1871_v14, %v1762_v23 }
 0x230   : > { %v1978_v59 = vpop.f32.mrf.mxu2 }
 0x231   : > { %v2228_v28 = vpack.c.bf16 %v2156_v47, %v2156_v47  ;;  %v2041_v39 = vadd.f32 %v1978_v59, %v1867_v30  ;;  %v1767_v47 = vpop.f32.mrf.mxu0  ;;  %v1876_v59 = vpop.f32.mrf.mxu1  ;;  %3851 = vmatpush.bf16.msra.mxu3 %v3827_v61  ;;  %2812 = vmatpush.bf16.msrb.mxu2 %v3827_v61 }
 0x233   : > { %v2081_v36 = vmul.f32 %v4715_v52, %v2041_v39  ;;  %v2300_v21 = vunpack.c.l.b16 %v2228_v28 }
 0x235   : > { %v2327_v16 = vpack.c.b16 %v2300_v21, %v2299_v34  ;;  %v2121_v46 = vadd.f32 %v4723_v24, %v2081_v36 }
 0x237   : > { %2587 = vrot.lane.b32.xlu0 %v2327_v16, %s3914_s22  ;;  %v2394_v13 = vshrl.u32 %v2327_v16, 16  ;;  %v2397_v43 = vshll.u32 %v2327_v16, 16  ;;  %v2157_v3 = vmax.f32 %v2121_v46, 0.0 }
 0x238   : > { %v1980_v53 = vpop.f32.mrf.mxu2 }
 0x239   : > { %v2042_v44 = vadd.f32 %v1980_v53, %v1869_v15  ;;  %v2396_v12 = vrot.slane %v2394_v13, 7  ;;  %v2515_v5 = vrot.slane %v2397_v43, 1  ;;  %v2229_v2 = vpack.c.bf16 %v2157_v3, %v2157_v3  ;;  %v1769_v53 = vpop.f32.mrf.mxu0 }
 0x23a   : > { %v1874_v15 = vadd.f32 %v1873_v18, %v1764_v55 }
 0x23b   : > { %v2082_v49 = vmul.f32 %v4715_v52, %v2042_v44  ;;  %v2516_v19 = vor.u32 %v2515_v5, %v2394_v13  ;;  %v4872_v51 = vor.u32 %v2397_v43, %v2396_v12  ;;  %v2301_v34 = vunpack.c.l.b16 %v2229_v2  ;;  %v1878_v44 = vpop.f32.mrf.mxu1 }
 0x23d   : > { %v2122_v27 = vadd.f32 %v4723_v24, %v2082_v49  ;;  %v2561_v20 = vsel %vm4047_vm2, %v2516_v19, 0  ;;  %v1877_v49 = vadd.f32 %v1876_v59, %v1767_v47 }
 0x23e   : > { %2641 = vrot.lane.b32.xlu1 %v2561_v20, %s3915_s25 }
 0x23f   : > { %v2158_v30 = vmax.f32 %v2122_v27, 0.0 }
 0x240   : > { %v1983_v54 = vpop.f32.mrf.mxu2 }
 0x241   : > { %v2230_v28 = vpack.c.bf16 %v2158_v30, %v2158_v30  ;;  %v2043_v39 = vadd.f32 %v1983_v54, %v1872_v10  ;;  %v1772_v54 = vpop.f32.mrf.mxu0 }
 0x243   : > { %v2083_v36 = vmul.f32 %v4715_v52, %v2043_v39  ;;  %v2302_v21 = vunpack.c.l.b16 %v2230_v28  ;;  %v1881_v28 = vpop.f32.mrf.mxu1 }
 0x245   : > { %v2328_v16 = vpack.c.b16 %v2302_v21, %v2301_v34  ;;  %v2123_v26 = vadd.f32 %v4723_v24, %v2083_v36  ;;  %v1879_v36 = vadd.f32 %v1878_v44, %v1769_v53  ;;  %v2484_v44 = vsel %vm4279_vm6, 0, %v4807_v56 }
 0x247   : > { %2589 = vrot.lane.b32.xlu2 %v2328_v16, %s3914_s22  ;;  %v2401_v23 = vshrl.u32 %v2328_v16, 16  ;;  %v2404_v14 = vshll.u32 %v2328_v16, 16  ;;  %v2159_v12 = vmax.f32 %v2123_v26, 0.0 }
 0x248   : > { %v1985_v46 = vpop.f32.mrf.mxu2 }
 0x249   : > { %v2044_v13 = vadd.f32 %v1985_v46, %v1874_v15  ;;  %v2403_v43 = vrot.slane %v2401_v23, 7  ;;  %v2517_v8 = vrot.slane %v2404_v14, 1  ;;  %v2231_v19 = vpack.c.bf16 %v2159_v12, %v2159_v12 }
 0x24a   : > { %v1882_v12 = vadd.f32 %v1881_v28, %v1772_v54 }
 0x24b   : > { %v2084_v5 = vmul.f32 %v4715_v52, %v2044_v13  ;;  %v2518_v1 = vor.u32 %v2517_v8, %v2401_v23  ;;  %v4886_v3 = vor.u32 %v2404_v14, %v2403_v43  ;;  %v2303_v2 = vunpack.c.l.b16 %v2231_v19  ;;  %v2578_v43 = vpop.permute.xlu2 %2577 }
 0x24d   : > { %v2124_v55 = vadd.f32 %v4723_v24, %v2084_v5  ;;  %v2562_v18 = vsel %vm4047_vm2, %v2518_v1, 0  ;;  %v1774_v5 = vpop.f32.mrf.mxu0  ;;  %v1883_v1 = vpop.f32.mrf.mxu1 }
 0x24e   : > { %2643 = vrot.lane.b32.xlu0 %v2562_v18, %s3915_s25  ;;  %v1884_v54 = vadd.f32 %v1883_v1, %v1774_v5  ;;  %v2485_v5 = vsel %vm4279_vm6, 0, %v4821_v32  ;;  %v3703_v32 = vld [vmem:[%s5528_s6 + $0x20] sm:$0xf] }
 0x24f   : > { %v2160_v17 = vmax.f32 %v2124_v55, 0.0 }
 0x250   : > { %v1988_v27 = vpop.f32.mrf.mxu2 }
 0x251   : > { %v2232_v20 = vpack.c.bf16 %v2160_v17, %v2160_v17  ;;  %v2045_v61 = vadd.f32 %v1988_v27, %v1877_v49  ;;  %v2672_v49 = vsel %vm1425_vm8, %v2484_v44, %v2578_v43 }
 0x253   : > { %v2085_v10 = vmul.f32 %v4715_v52, %v2045_v61  ;;  %v2304_v30 = vunpack.c.l.b16 %v2232_v20 }
 0x255   : > { %v2329_v39 = vpack.c.b16 %v2304_v30, %v2303_v2  ;;  %v2125_v34 = vadd.f32 %v4723_v24, %v2085_v10 }
 0x257   : > { %2591 = vrot.lane.b32.xlu1 %v2329_v39, %s3914_s22  ;;  %v2408_v21 = vshrl.u32 %v2329_v39, 16  ;;  %v2411_v16 = vshll.u32 %v2329_v39, 16  ;;  %v2161_v23 = vmax.f32 %v2125_v34, 0.0 }
 0x258   : > { %v1990_v47 = vpop.f32.mrf.mxu2 }
 0x259   : > { %v2046_v59 = vadd.f32 %v1990_v47, %v1879_v36  ;;  %v2410_v15 = vrot.slane %v2408_v21, 7  ;;  %v2519_v26 = vrot.slane %v2411_v16, 1  ;;  %v2233_v55 = vpack.c.bf16 %v2161_v23, %v2161_v23 }
 0x25b   : > { %v2086_v14 = vmul.f32 %v4715_v52, %v2046_v59  ;;  %v2520_v46 = vor.u32 %v2519_v26, %v2408_v21  ;;  %v4896_v13 = vor.u32 %v2411_v16, %v2410_v15  ;;  %v2305_v10 = vunpack.c.l.b16 %v2233_v55  ;;  %v2754_v59 = vld [vmem:[%s5528_s6 + $0x8] sm:$0xf]  ;;  %v1777_v15 = vpop.f32.mrf.mxu0  ;;  %v1886_v26 = vpop.f32.mrf.mxu1 }
 0x25c   : > { %v2899_v23 = vunpack.c.l.b16 %v2754_v59 }
 0x25d   : > { %v2126_v8 = vadd.f32 %v4723_v24, %v2086_v14  ;;  %v2563_v53 = vsel %vm4047_vm2, %v2520_v46, 0 }
 0x25e   : > { %2645 = vrot.lane.b32.xlu2 %v2563_v53, %s3915_s25  ;;  %v2901_v53 = vpack.c.b16 %v2899_v23, %v2899_v23 }
 0x25f   : > { %v2162_v18 = vmax.f32 %v2126_v8, 0.0 }
 0x260   : > { %v1993_v19 = vpop.f32.mrf.mxu2  ;;  %v2632_v17 = vpop.permute.xlu0 %2631 }
 0x261   : > { %v2234_v27 = vpack.c.bf16 %v2162_v18, %v2162_v18  ;;  %v2047_v20 = vadd.f32 %v1993_v19, %v1882_v12  ;;  %v4907_v61 = vsel %vm2715_vm11, %v2672_v49, %v2632_v17  ;;  %v2906_v18 = vsel %vm2801_vm10, %v2901_v53, 0 }
 0x262   : > { %3667 = vmatmul.msk.bf16.vlgmr.msra.gmra.mxu3 %vm2768_vm12, %v4907_v61  ;;  %v1887_v49 = vadd.f32 %v1886_v26, %v1777_v15 }
 0x263   : > { %v2087_v56 = vmul.f32 %v4715_v52, %v2047_v20  ;;  %v2306_v2 = vunpack.c.l.b16 %v2234_v27  ;;  %2914 = vmatpush.bf16.msrb.mxu3 %v2906_v18  ;;  %v2634_v27 = vpop.permute.xlu2 %2633 }
 0x265   : > { %v2330_v30 = vpack.c.b16 %v2306_v2, %v2305_v10  ;;  %v2127_v28 = vadd.f32 %v4723_v24, %v2087_v56 }
 0x267   : > { %2593 = vrot.lane.b32.xlu0 %v2330_v30, %s3914_s22  ;;  %v2415_v39 = vshrl.u32 %v2330_v30, 16  ;;  %v2418_v36 = vshll.u32 %v2330_v30, 16  ;;  %v2163_v14 = vmax.f32 %v2127_v28, 0.0  ;;  %v3172_v30 = vld [vmem:[%s5530_s8] sm:$0x3] }
 0x268   : > { %v1995_v34 = vpop.f32.mrf.mxu2  ;;  %v3303_v28 = vsel %vm3301_vm13, %v3172_v30, 0 }
 0x269   : > { %v2048_v21 = vadd.f32 %v1995_v34, %v1884_v54  ;;  %v2417_v16 = vrot.slane %v2415_v39, 7  ;;  %v2521_v47 = vrot.slane %v2418_v36, 1  ;;  %v2580_v43 = vpop.permute.xlu1 %2579  ;;  %v2235_v19 = vpack.c.bf16 %v2163_v14, %v2163_v14  ;;  %3312 = vmatpush.bf16.msrb.mxu1 %v3303_v28 }
 0x26a   : > { %v2675_v55 = vsel %vm1425_vm8, %v2485_v5, %v2580_v43  ;;  %v3006_v54 = vunpack.c.l.b16 %v3703_v32 }
 0x26b   : > { %v2088_v46 = vmul.f32 %v4715_v52, %v2048_v21  ;;  %v2522_v8 = vor.u32 %v2521_v47, %v2415_v39  ;;  %v4918_v44 = vor.u32 %v2418_v36, %v2417_v16  ;;  %v4930_v2 = vsel %vm2715_vm11, %v2675_v55, %v2634_v27  ;;  %v1779_v21 = vpop.f32.mrf.mxu0  ;;  %v1888_v16 = vpop.f32.mrf.mxu1 }
 0x26c   : > { %v2307_v36 = vunpack.c.l.b16 %v2235_v19  ;;  %v3008_v47 = vpack.c.b16 %v3006_v54, %v3006_v54  ;;  %v1889_v26 = vadd.f32 %v1888_v16, %v1779_v21 }
 0x26d   : > { %v2128_v12 = vadd.f32 %v4723_v24, %v2088_v46  ;;  %v2564_v1 = vsel %vm4047_vm2, %v2522_v8, 0 }
 0x26e   : > { %2647 = vrot.lane.b32.xlu1 %v2564_v1, %s3915_s25  ;;  %v3013_v15 = vsel %vm2801_vm10, %v3008_v47, 0 }
 0x26f   : > { %v2164_v17 = vmax.f32 %v2128_v12, 0.0  ;;  %3021 = vmatpush.bf16.msrb.mxu0 %v3013_v15 }
 0x270   : > { %v1998_v20 = vpop.f32.mrf.mxu2 }
 0x271   : > { %v2236_v56 = vpack.c.bf16 %v2164_v17, %v2164_v17  ;;  %v2049_v10 = vadd.f32 %v1998_v20, %v1887_v49 }
 0x272   : > { %3668 = vmatmul.msk.bf16.gmra.mxu3 %vm2768_vm12, %v4930_v2 }
 0x273   : > { %v2089_v39 = vmul.f32 %v4715_v52, %v2049_v10  ;;  %v2308_v34 = vunpack.c.l.b16 %v2236_v56  ;;  %v2486_v56 = vsel %vm4279_vm6, 0, %v4835_v29 }
 0x275   : > { %v2331_v59 = vpack.c.b16 %v2308_v34, %v2307_v36  ;;  %v2129_v23 = vadd.f32 %v4723_v24, %v2089_v39 }
 0x277   : > { %2595 = vrot.lane.b32.xlu2 %v2331_v59, %s3914_s22  ;;  %v2422_v14 = vshrl.u32 %v2331_v59, 16  ;;  %v2425_v46 = vshll.u32 %v2331_v59, 16  ;;  %v2165_v5 = vmax.f32 %v2129_v23, 0.0 }
 0x278   : > { %v2000_v43 = vpop.f32.mrf.mxu2 }
 0x279   : > { %v2050_v8 = vadd.f32 %v2000_v43, %v1889_v26  ;;  %v2424_v53 = vrot.slane %v2422_v14, 7  ;;  %v2523_v12 = vrot.slane %v2425_v46, 1  ;;  %v2582_v19 = vpop.permute.xlu0 %2581  ;;  %v2237_v27 = vpack.c.bf16 %v2165_v5, %v2165_v5 }
 0x27a   : > { %v2678_v10 = vsel %vm1425_vm8, %v2486_v56, %v2582_v19 }
 0x27b   : > { %v2090_v1 = vmul.f32 %v4715_v52, %v2050_v8  ;;  %v2524_v55 = vor.u32 %v2523_v12, %v2422_v14  ;;  %v4945_v18 = vor.u32 %v2425_v46, %v2424_v53  ;;  %v2309_v34 = vunpack.c.l.b16 %v2237_v27  ;;  %v2584_v53 = vpop.permute.xlu2 %2583 }
 0x27d   : > { %v2130_v49 = vadd.f32 %v4723_v24, %v2090_v1  ;;  %v2565_v17 = vsel %vm4047_vm2, %v2524_v55, 0 }
 0x27e   : > { %2649 = vrot.lane.b32.xlu0 %v2565_v17, %s3915_s25 }
 0x27f   : > { %v2166_v20 = vmax.f32 %v2130_v49, 0.0 }
 0x280   : > { %v2003_v32 = vpop.f32.mrf.mxu2  ;;  %v2636_v30 = vpop.permute.xlu1 %2635 }
 0x281   : > { %v2238_v54 = vpack.c.bf16 %v2166_v20, %v2166_v20  ;;  %v2051_v28 = vadd.f32 %v2003_v32, %v4657_v7  ;;  %v4957_v39 = vsel %vm2715_vm11, %v2678_v10, %v2636_v30 }
 0x282   : > { %3669 = vmatmul.msk.bf16.gmra.mxu3 %vm2768_vm12, %v4957_v39 }
 0x283   : > { %v2091_v36 = vmul.f32 %v4715_v52, %v2051_v28  ;;  %v2310_v21 = vunpack.c.l.b16 %v2238_v54 }
 0x285   : > { %v2332_v16 = vpack.c.b16 %v2310_v21, %v2309_v34  ;;  %v2131_v29 = vadd.f32 %v4723_v24, %v2091_v36 }
 0x287   : > { %2597 = vrot.lane.b32.xlu1 %v2332_v16, %s3914_s22  ;;  %v2429_v47 = vshrl.u32 %v2332_v16, 16  ;;  %v2432_v59 = vshll.u32 %v2332_v16, 16  ;;  %v2167_v14 = vmax.f32 %v2131_v29, 0.0 }
 0x288   : > { %v2005_v15 = vpop.f32.mrf.mxu2 }
 0x289   : > { %v2052_v7 = vadd.f32 %v2005_v15, %v4664_v63  ;;  %v2431_v26 = vrot.slane %v2429_v47, 7  ;;  %v2525_v23 = vrot.slane %v2432_v59, 1  ;;  %v2487_v63 = vsel %vm4279_vm6, 0, %v4847_v58 }
 0x28a   : > { %v2239_v1 = vpack.c.bf16 %v2167_v14, %v2167_v14  ;;  %v2681_v49 = vsel %vm1425_vm8, %v2487_v63, %v2584_v53 }
 0x28b   : > { %v2092_v46 = vmul.f32 %v4715_v52, %v2052_v7  ;;  %v2526_v43 = vor.u32 %v2525_v23, %v2429_v47  ;;  %v4966_v8 = vor.u32 %v2432_v59, %v2431_v26  ;;  %v2488_v23 = vsel %vm4279_vm6, 0, %v4859_v0 }
 0x28c   : > { %v2311_v32 = vunpack.c.l.b16 %v2239_v1 }
 0x28d   : > { %v2132_v12 = vadd.f32 %v4723_v24, %v2092_v46  ;;  %v2566_v5 = vsel %vm4047_vm2, %v2526_v43, 0  ;;  %v3847_v46 = vld [vmem:[%s3990_s16 + $0x98] sm:$0xff]  }
 0x28e   : > { %2651 = vrot.lane.b32.xlu2 %v2566_v5, %s3915_s25  ;;  %v3843_v63 = vunpack.c.l.bf16 %v3847_v46  ;;  %v3844_v1 = vunpack.c.h.bf16 %v3847_v46 }
 0x28f   : > { %v2168_v55 = vmax.f32 %v2132_v12, 0.0  ;;  %v2640_v12 = vpop.permute.xlu2 %2639 }
 0x290   : > { %v2008_v19 = vpop.f32.mrf.mxu2  ;;  %v2638_v17 = vpop.permute.xlu0 %2637 }
 0x291   : > { %v2240_v27 = vpack.c.bf16 %v2168_v55, %v2168_v55  ;;  %v2053_v20 = vadd.f32 %v2008_v19, %v4678_v41  ;;  %v4978_v56 = vsel %vm2715_vm11, %v2681_v49, %v2638_v17 }
 0x292   : > { %3670 = vmatmul.msk.bf16.gmra.mxu3 %vm2768_vm12, %v4978_v56 }
 0x293   : > { %v2093_v10 = vmul.f32 %v4715_v52, %v2053_v20  ;;  %v2312_v30 = vunpack.c.l.b16 %v2240_v27  ;;  %v3885_v20 = vld [vmem:[%s5523_s1] ss:$0 sm:$0xff] }
 0x295   : > { %v2333_v58 = vpack.c.b16 %v2312_v30, %v2311_v32  ;;  %v2133_v54 = vadd.f32 %v4723_v24, %v2093_v10  ;;  %v485_v10 = vmul.f32 %v3885_v20, %v3843_v63  ;;  %v486_v32 = vmul.f32 %v3885_v20, %v3844_v1 }
 0x297   : > { %2599 = vrot.lane.b32.xlu0 %v2333_v58, %s3914_s22  ;;  %v2436_v28 = vshrl.u32 %v2333_v58, 16  ;;  %v2439_v36 = vshll.u32 %v2333_v58, 16  ;;  %v2169_v29 = vmax.f32 %v2133_v54, 0.0 }
 0x298   : > { %v2010_v34 = vpop.f32.mrf.mxu2 }
 0x299   : > { %v2054_v41 = vadd.f32 %v2010_v34, %v4686_v35  ;;  %v2438_v21 = vrot.slane %v2436_v28, 7  ;;  %v2527_v16 = vrot.slane %v2439_v36, 1  ;;  %v2586_v59 = vpop.permute.xlu1 %2585  ;;  %v2241_v43 = vpack.c.bf16 %v2169_v29, %v2169_v29 }
 0x29a   : > { %v2684_v35 = vsel %vm1425_vm8, %v2488_v23, %v2586_v59 }
 0x29b   : > { %v2094_v47 = vmul.f32 %v4715_v52, %v2054_v41  ;;  %v2528_v15 = vor.u32 %v2527_v16, %v2436_v28  ;;  %v4987_v7 = vor.u32 %v2439_v36, %v2438_v21  ;;  %v5000_v19 = vsel %vm2715_vm11, %v2684_v35, %v2640_v12 }
 0x29c   : > { %v2313_v17 = vunpack.c.l.b16 %v2241_v43  ;;  %v2489_v12 = vsel %vm4279_vm6, 0, %v4872_v51  ;;  %v2503_v51 = vrot.slane %v2355_v22, 1 }
 0x29d   : > { %v2134_v26 = vadd.f32 %v4723_v24, %v2094_v47  ;;  %v2567_v14 = vsel %vm4047_vm2, %v2528_v15, 0 }
 0x29e   : > { %2653 = vrot.lane.b32.xlu1 %v2567_v14, %s3915_s25  ;;  %v5025_v14 = vld [vmem:[%s5527_s5] ss:$0 sm:$0xff] }
 0x29f   : > { %v2170_v53 = vmax.f32 %v2134_v26, 0.0 }
 0x2a0   : > { %v2013_v5 = vpop.f32.mrf.mxu2 }
 0x2a1   : > { %v2242_v55 = vpack.c.bf16 %v2170_v53, %v2170_v53  ;;  %v2055_v49 = vadd.f32 %v2013_v5, %v4696_v25 }
 0x2a2   : > { %3671 = vmatmul.msk.bf16.gmra.mxu3 %vm2768_vm12, %v5000_v19 }
 0x2a3   : > { %v2095_v0 = vmul.f32 %v4715_v52, %v2055_v49  ;;  %v2314_v27 = vunpack.c.l.b16 %v2242_v55  ;;  %v3886_v52 = vld [vmem:[%s5524_s2] ss:$0 sm:$0xff] }
 0x2a4   : > { %v529_v36 = vadd.f32 %v3886_v52, %v485_v10  ;;  %v530_v34 = vadd.f32 %v3886_v52, %v486_v32 }
 0x2a5   : > { %v2334_v30 = vpack.c.b16 %v2314_v27, %v2313_v17  ;;  %v2135_v58 = vadd.f32 %v4723_v24, %v2095_v0  ;;  %v5017_v24 = vld [vmem:[%s5526_s4] ss:$0 sm:$0xff] }
 0x2a6   : > { %v569_v15 = vmax.f32 %v529_v36, 0.0  ;;  %v570_v26 = vmax.f32 %v530_v34, 0.0  ;;  %v2504_v34 = vor.u32 %v2503_v51, %v2352_v57  ;;  %v2493_v51 = vsel %vm4279_vm6, 0, %v4945_v18 }
 0x2a7   : > { %2601 = vrot.lane.b32.xlu2 %v2334_v30, %s3914_s22  ;;  %v2443_v25 = vshrl.u32 %v2334_v30, 16  ;;  %v2446_v54 = vshll.u32 %v2334_v30, 16  ;;  %v2171_v29 = vmax.f32 %v2135_v58, 0.0  ;;  %v2499_v30 = vrot.slane %v2341_v45, 1  ;;  %v2590_v45 = vpop.permute.xlu2 %2589 }
 0x2a8   : > { %v2015_v28 = vpop.f32.mrf.mxu2  ;;  %v856_v1 = vmul.f32 0.0, %v569_v15  ;;  %v857_v55 = vmul.f32 0.0, %v570_v26 }
 0x2a9   : > { %v2056_v41 = vadd.f32 %v2015_v28, %v4700_v60  ;;  %v2445_v21 = vrot.slane %v2443_v25, 7  ;;  %v2529_v16 = vrot.slane %v2446_v54, 1  ;;  %v2588_v46 = vpop.permute.xlu0 %2587  ;;  %v2243_v43 = vpack.c.bf16 %v2171_v29, %v2171_v29 }
 0x2aa   : > { %v2687_v5 = vsel %vm1425_vm8, %v2489_v12, %v2588_v46  ;;  %v896_v20 = vpack.c.bf16 %v856_v1, %v856_v1  ;;  %v897_v10 = vpack.c.bf16 %v857_v55, %v857_v55  ;;  %v2500_v22 = vor.u32 %v2499_v30, %v2338_v50 }
 0x2ab   : > { %v2096_v47 = vmul.f32 %v5017_v24, %v2056_v41  ;;  %v2530_v59 = vor.u32 %v2529_v16, %v2443_v25  ;;  %v5020_v23 = vor.u32 %v2446_v54, %v2445_v21  ;;  %v2315_v17 = vunpack.c.l.b16 %v2243_v43 }
 0x2ac   : > { %v976_v54 = vunpack.c.l.b16 %v896_v20  ;;  %v977_v28 = vunpack.c.l.b16 %v897_v10  ;;  %v2490_v50 = vsel %vm4279_vm6, 0, %v4886_v3  ;;  %v2501_v3 = vrot.slane %v2348_v6, 1 }
 0x2ad   : > { %v2136_v60 = vadd.f32 %v5025_v14, %v2096_v47  ;;  %v2568_v35 = vsel %vm4047_vm2, %v2530_v59, 0  ;;  %v2555_v47 = vsel %vm4047_vm2, %v2504_v34, 0  ;;  %v2690_v57 = vsel %vm1425_vm8, %v2490_v50, %v2590_v45 }
 0x2ae   : > { %2655 = vrot.lane.b32.xlu0 %v2568_v35, %s3915_s25  ;;  %v5053_v16 = vpack.c.b16 %v977_v28, %v976_v54  ;;  %v2502_v43 = vor.u32 %v2501_v3, %v2345_v42  ;;  %v2491_v6 = vsel %vm4279_vm6, 0, %v4896_v13  ;;  %v3826_v42 = vld [vmem:[%s5528_s6] sm:$0xff]  ;;  %v3828_v13 = vld [vmem:[%s5528_s6 + $0x18] sm:$0xff]  ;;  %v2492_v55 = vsel %vm4279_vm6, 0, %v4918_v44 }
 0x2af   : > { %v2172_v53 = vmax.f32 %v2136_v60, 0.0  ;;  %2915 = vmatpush.bf16.msrb.mxu3 %v3826_v42  ;;  %3022 = vmatpush.bf16.msrb.mxu0 %v3828_v13  ;;  %v2494_v28 = vsel %vm4279_vm6, 0, %v4966_v8  ;;  %v2495_v8 = vsel %vm4279_vm6, 0, %v4987_v7  ;;  %v2483_v13 = vsel %vm4279_vm6, 0, %v4792_v33 }
 0x2b0   : > { %v2642_v63 = vpop.permute.xlu1 %2641  ;;  %v1135_v15 = vshll.u32 %v5053_v16, 16  ;;  %v1132_v60 = vshrl.u32 %v5053_v16, 16 }
 0x2b1   : > { %v2244_v49 = vpack.c.bf16 %v2172_v53, %v2172_v53  ;;  %v5036_v0 = vsel %vm2715_vm11, %v2687_v5, %v2642_v63 }
 0x2b2   : > { %3672 = vmatmul.msk.bf16.gmra.mxu3 %vm2768_vm12, %v5036_v0  ;;  %v1219_v46 = vrot.slane %v1135_v15, 1  ;;  %v1134_v33 = vrot.slane %v1132_v60, 7 }
 0x2b3   : > { %v2316_v27 = vunpack.c.l.b16 %v2244_v49 }
 0x2b4   : > { %v1220_v35 = vor.u32 %v1219_v46, %v1132_v60  ;;  %v2496_v46 = vsel %vm4279_vm6, 0, %v5020_v23 }
 0x2b5   : > { %v2335_v32 = vpack.c.b16 %v2316_v27, %v2315_v17 }
 0x2b6   : > { %2571 = vrot.lane.b32.xlu0 %v4742_v38, %s3914_s22  ;;  %v2553_v38 = vsel %vm4047_vm2, %v2500_v22, 0  ;;  %v1263_v12 = vsel %vm4047_vm2, %v1220_v35, 0 }
 0x2b7   : > { %2603 = vrot.lane.b32.xlu1 %v2335_v32, %s3914_s22  ;;  %v2450_v58 = vshrl.u32 %v2335_v32, 16  ;;  %v2453_v25 = vshll.u32 %v2335_v32, 16 }
 0x2b8   : > { %v2646_v63 = vpop.permute.xlu2 %2645 }
 0x2b9   : > { %v2452_v52 = vrot.slane %v2450_v58, 7  ;;  %v2531_v36 = vrot.slane %v2453_v25, 1 }
 0x2bb   : > { %v2532_v41 = vor.u32 %v2531_v36, %v2450_v58  ;;  %v5051_v21 = vor.u32 %v2453_v25, %v2452_v52 }
 0x2bd   : > { %v2569_v29 = vsel %vm4047_vm2, %v2532_v41, 0 }
 0x2be   : > { %2657 = vrot.lane.b32.xlu2 %v2569_v29, %s3915_s25  ;;  %2629 = vrot.lane.b32.xlu0 %v2555_v47, %s3915_s25 }
 0x2bf   : > { %2625 = vrot.lane.b32.xlu1 %v2553_v38, %s3915_s25 }
 0x2c0   : > { %v2644_v59 = vpop.permute.xlu0 %2643 }
 0x2c1   : > { %v5070_v26 = vsel %vm2715_vm11, %v2690_v57, %v2644_v59 }
 0x2c2   : > { %3673 = vmatmul.msk.bf16.gmra.mxu3 %vm2768_vm12, %v5070_v26 }
 0x2c6   : > { %2575 = vrot.lane.b32.xlu2 %v4780_v37, %s3914_s22  ;;  %1302 = vrot.lane.b32.xlu0 %v5053_v16, %s3913_s21  ;;  %v2554_v37 = vsel %vm4047_vm2, %v2502_v43, 0 }
 0x2c7   : > { %2573 = vrot.lane.b32.xlu1 %v4759_v62, %s3914_s22 }
 0x2c9   : > { %v2592_v53 = vpop.permute.xlu1 %2591 }
 0x2ca   : > { %v2693_v5 = vsel %vm1425_vm8, %v2491_v6, %v2592_v53 }
 0x2cb   : > { %v5100_v62 = vsel %vm2715_vm11, %v2693_v5, %v2646_v63  ;;  %v2497_v5 = vsel %vm4279_vm6, 0, %v5051_v21  ;;  %v3807_v63 = vld [vmem:[%s3990_s16 + $0x10] sm:$0xff] }
 0x2cc   : > { %3788 = vmatmul.msk.bf16.vlgmr.msrb.gmra.mxu1 %vm1364_vm7, %v3807_v63 }
 0x2ce   : > { %2627 = vrot.lane.b32.xlu2 %v2554_v37, %s3915_s25 }
 0x2cf   : > { %1362 = vrot.lane.b32.xlu1 %v1263_v12, %s3914_s22 }
 0x2d1   : > { %v2596_v10 = vpop.permute.xlu2 %2595 }
 0x2d2   : > { %3674 = vmatmul.msk.bf16.gmra.mxu3 %vm2768_vm12, %v5100_v62  ;;  %v2699_v44 = vsel %vm1425_vm8, %v2493_v51, %v2596_v10  ;;  %v1137_v51 = vor.u32 %v1135_v15, %v1134_v33 }
 0x2d9   : > { %v2594_v1 = vpop.permute.xlu0 %2593 }
 0x2da   : > { %v2696_v49 = vsel %vm1425_vm8, %v2492_v55, %v2594_v1 }
 0x2e0   : > { %v2648_v17 = vpop.permute.xlu1 %2647 }
 0x2e1   : > { %v5115_v27 = vsel %vm2715_vm11, %v2696_v49, %v2648_v17 }
 0x2e2   : > { %3675 = vmatmul.msk.bf16.gmra.mxu3 %vm2768_vm12, %v5115_v27 }
 0x2e5   : > { %v5119_v20 = vpop.f32.mrf.mxu3 }
 0x2e8   : > { %v2652_v36 = vpop.permute.xlu2 %2651 }
 0x2ed   : > { %v5121_v32 = vpop.f32.mrf.mxu3 }
 0x2f0   : > { %v2650_v30 = vpop.permute.xlu0 %2649 }
 0x2f1   : > { %v5128_v58 = vsel %vm2715_vm11, %v2699_v44, %v2650_v30  ;;  %v1180_v30 = vsel %vm4279_vm6, 0, %v1137_v51 }
 0x2f2   : > { %3676 = vmatmul.msk.bf16.gmra.mxu3 %vm2768_vm12, %v5128_v58 }
 0x2f5   : > { %v5132_v25 = vpop.f32.mrf.mxu3 }
 0x2f9   : > { %v2598_v54 = vpop.permute.xlu1 %2597 }
 0x2fa   : > { %v2702_v18 = vsel %vm1425_vm8, %v2494_v28, %v2598_v54 }
 0x2fb   : > { %v5141_v34 = vsel %vm2715_vm11, %v2702_v18, %v2652_v36  ;;  %v3808_v18 = vld [vmem:[%s3990_s16 + $0x18] sm:$0xff]  ;;  %v2481_v36 = vsel %vm4279_vm6, 0, %v4755_v11 }
 0x2fc   : > { %3789 = vmatmul.msk.bf16.gmra.mxu1 %vm1364_vm7, %v3808_v18 }
 0x2fd   : > { %v5137_v52 = vpop.f32.mrf.mxu3 }
 0x301   : > { %v2602_v57 = vpop.permute.xlu2 %2601 }
 0x302   : > { %3677 = vmatmul.msk.bf16.gmra.mxu3 %vm2768_vm12, %v5141_v34  ;;  %v2708_v7 = vsel %vm1425_vm8, %v2496_v46, %v2602_v57  ;;  %v3809_v57 = vld [vmem:[%s3990_s16 + $0x20] sm:$0xff] }
 0x305   : > { %v5145_v22 = vpop.f32.mrf.mxu3 }
 0x309   : > { %v2600_v41 = vpop.permute.xlu0 %2599 }
 0x30a   : > { %v2705_v29 = vsel %vm1425_vm8, %v2495_v8, %v2600_v41 }
 0x30c   : > { %3790 = vmatmul.msk.bf16.gmra.mxu1 %vm1364_vm7, %v3809_v57 }
 0x30d   : > { %v5147_v45 = vpop.f32.mrf.mxu3 }
 0x310   : > { %v2654_v47 = vpop.permute.xlu1 %2653 }
 0x311   : > { %v5154_v38 = vsel %vm2715_vm11, %v2705_v29, %v2654_v47  ;;  %v2482_v29 = vsel %vm4279_vm6, 0, %v4773_v31 }
 0x312   : > { %3678 = vmatmul.msk.bf16.gmra.mxu3 %vm2768_vm12, %v5154_v38 }
 0x315   : > { %v5158_v50 = vpop.f32.mrf.mxu3 }
 0x318   : > { %v2658_v43 = vpop.permute.xlu2 %2657 }
 0x31d   : > { %v5160_v59 = vpop.f32.mrf.mxu3 }
 0x320   : > { %v2656_v3 = vpop.permute.xlu0 %2655  ;;  %v2576_v37 = vpop.permute.xlu2 %2575 }
 0x321   : > { %v5167_v35 = vsel %vm2715_vm11, %v2708_v7, %v2656_v3  ;;  %v2669_v1 = vsel %vm1425_vm8, %v2483_v13, %v2576_v37  ;;  %v3812_v13 = vld [vmem:[%s3990_s16 + $0x38] sm:$0xff] }
 0x322   : > { %3679 = vmatmul.msk.bf16.gmra.mxu3 %vm2768_vm12, %v5167_v35 }
 0x325   : > { %v5171_v53 = vpop.f32.mrf.mxu3 }
 0x328   : > { %v2572_v12 = vpop.permute.xlu0 %2571  ;;  %v2628_v7 = vpop.permute.xlu2 %2627 }
 0x329   : > { %v2604_v6 = vpop.permute.xlu1 %2603  ;;  %v2663_v16 = vsel %vm1425_vm8, %v2481_v36, %v2572_v12  ;;  %v3810_v12 = vld [vmem:[%s3990_s16 + $0x28] sm:$0xff] }
 0x32a   : > { %v2711_v42 = vsel %vm1425_vm8, %v2497_v5, %v2604_v6  ;;  %3791 = vmatmul.msk.bf16.gmra.mxu1 %vm1364_vm7, %v3810_v12  ;;  %v3811_v5 = vld [vmem:[%s3990_s16 + $0x30] sm:$0xff] }
 0x32b   : > { %v5187_v21 = vsel %vm2715_vm11, %v2711_v42, %v2658_v43 }
 0x32d   : > { %v5176_v23 = vpop.f32.mrf.mxu3 }
 0x330   : > { %v2630_v55 = vpop.permute.xlu0 %2629 }
 0x331   : > { %v2721_v49 = vsel %vm2715_vm11, %v2669_v1, %v2630_v55  ;;  %v2626_v17 = vpop.permute.xlu1 %2625  ;;  %v3813_v55 = vld [vmem:[%s3990_s16 + $0x40] sm:$0xff] }
 0x332   : > { %3680 = vmatmul.msk.bf16.gmra.mxu3 %vm2768_vm12, %v5187_v21  ;;  %3708 = vmatmul.msk.bf16.vlgmr.msrb.gmra.mxu0 %vm2768_vm12, %v2721_v49  ;;  %v2717_v15 = vsel %vm2715_vm11, %v2663_v16, %v2626_v17  ;;  %v3814_v17 = vld [vmem:[%s3990_s16 + $0x48] sm:$0xff]  ;;  %v3816_v16 = vld [vmem:[%s3990_s16 + $0x58] sm:$0xff] }
 0x335   : > { %v5194_v10 = vpop.f32.mrf.mxu3 }
 0x338   : > { %v1303_v54 = vpop.permute.xlu0 %1302 }
 0x339   : > { %v2574_v44 = vpop.permute.xlu1 %2573  ;;  %v1424_v60 = vsel %vm1364_vm7, %v1180_v30, %v1303_v54 }
 0x33a   : > { %v2666_v46 = vsel %vm1425_vm8, %v2482_v29, %v2574_v44  ;;  %3792 = vmatmul.msk.bf16.gmra.mxu1 %vm1364_vm7, %v3811_v5  ;;  %v3815_v44 = vld [vmem:[%s3990_s16 + $0x50] sm:$0xff]  ;;  %v3817_v5 = vld [vmem:[%s3990_s16 + $0x60] sm:$0xff] }
 0x33b   : > { %v2719_v3 = vsel %vm2715_vm11, %v2666_v46, %v2628_v7 }
 0x33d   : > { %v5200_v28 = vpop.f32.mrf.mxu3 }
 0x341   : > { %v1363_v41 = vpop.permute.xlu1 %1362 }
 0x342   : > { %v1465_v8 = vsel %vm1425_vm8, %v1424_v60, %v1363_v41  ;;  %3685 = vmatmul.msk.bf16.vlgmr.msrb.gmra.mxu3 %vm2768_vm12, %v2717_v15  ;;  %3709 = vmatmul.msk.bf16.gmra.mxu0 %vm2768_vm12, %v4907_v61 }
 0x343   : > { %3657 = vmatmul.msk.bf16.gmra.mxu2 %vm1662_vm9, %v1465_v8 }
 0x345   : > { %v5215_v11 = vpop.f32.mrf.mxu3 }
 0x34a   : > { %3793 = vmatmul.msk.bf16.gmra.mxu1 %vm1364_vm7, %v3812_v13 }
 0x34d   : > { %v5220_v47 = vpop.f32.mrf.mxu3 }
 0x352   : > { %3686 = vmatmul.msk.bf16.gmra.mxu3 %vm2768_vm12, %v2719_v3  ;;  %3710 = vmatmul.msk.bf16.gmra.mxu0 %vm2768_vm12, %v4930_v2 }
 0x353   : > { %3665 = vmatmul.msk.bf16.vlgmr.msrb.gmra.mxu2 %vm2768_vm12, %v2719_v3 }
 0x355   : > { %v5230_v31 = vpop.f32.mrf.mxu3 }
 0x35a   : > { %3794 = vmatmul.msk.bf16.gmra.mxu1 %vm1364_vm7, %v3813_v55 }
 0x35d   : > { %v5232_v43 = vpop.f32.mrf.mxu3 }
 0x362   : > { %3687 = vmatmul.msk.bf16.gmra.mxu3 %vm2768_vm12, %v2721_v49  ;;  %3711 = vmatmul.msk.bf16.gmra.mxu0 %vm2768_vm12, %v4957_v39 }
 0x363   : > { %3666 = vmatmul.msk.bf16.gmra.mxu2 %vm2768_vm12, %v2721_v49 }
 0x365   : > { %v5240_v6 = vpop.f32.mrf.mxu3 }
 0x36a   : > { %3795 = vmatmul.msk.bf16.gmra.mxu1 %vm1364_vm7, %v3814_v17 }
 0x36d   : > { %v5242_v37 = vpop.f32.mrf.mxu3 }
 0x372   : > { %3688 = vmatmul.msk.bf16.gmra.mxu3 %vm2768_vm12, %v4907_v61  ;;  %3712 = vmatmul.msk.bf16.gmra.mxu0 %vm2768_vm12, %v4978_v56 }
 0x375   : > { %v5250_v63 = vpop.f32.mrf.mxu3 }
 0x37a   : > { %3796 = vmatmul.msk.bf16.gmra.mxu1 %vm1364_vm7, %v3815_v44 }
 0x37d   : > { %v5252_v42 = vpop.f32.mrf.mxu3 }
 0x382   : > { %3689 = vmatmul.msk.bf16.gmra.mxu3 %vm2768_vm12, %v4930_v2  ;;  %3713 = vmatmul.msk.bf16.gmra.mxu0 %vm2768_vm12, %v5000_v19 }
 0x385   : > { %v5260_v1 = vpop.f32.mrf.mxu3 }
 0x38a   : > { %3797 = vmatmul.msk.bf16.gmra.mxu1 %vm1364_vm7, %v3816_v16 }
 0x38d   : > { %v5262_v61 = vpop.f32.mrf.mxu3 }
 0x392   : > { %3690 = vmatmul.msk.bf16.gmra.mxu3 %vm2768_vm12, %v4957_v39  ;;  %3714 = vmatmul.msk.bf16.gmra.mxu0 %vm2768_vm12, %v5036_v0  ;;  %v3314_v39 = vpop.f32.mrf.mxu1 }
 0x395   : > { %v5270_v49 = vpop.f32.mrf.mxu3 }
 0x39a   : > { %v5290_v54 = vpop.f32.mrf.mxu1  ;;  %3798 = vmatmul.msk.bf16.gmra.mxu1 %vm1364_vm7, %v3817_v5 }
 0x39d   : > { %v5272_v2 = vpop.f32.mrf.mxu3 }
 0x3a2   : > { %3691 = vmatmul.msk.bf16.gmra.mxu3 %vm2768_vm12, %v4978_v56  ;;  %3715 = vmatmul.msk.bf16.gmra.mxu0 %vm2768_vm12, %v5070_v26  ;;  %v5294_v36 = vpop.f32.mrf.mxu1 }
 0x3a5   : > { %v5280_v33 = vpop.f32.mrf.mxu3 }
 0x3ad   : > { %v5282_v51 = vpop.f32.mrf.mxu3 }
 0x3ae   : > { %5536 = vst [vmem:[#allocation2_spill] sm:$0xff] %v5282_v51 }
 0x3af   : > { %v3024_v30 = vpop.f32.mrf.mxu0 }
 0x3b2   : > { %3692 = vmatmul.msk.bf16.gmra.mxu3 %vm2768_vm12, %v5000_v19  ;;  %3716 = vmatmul.msk.bf16.gmra.mxu0 %vm2768_vm12, %v5100_v62  ;;  %v5306_v19 = vpop.f32.mrf.mxu1 }
 0x3b5   : > { %v5292_v56 = vpop.f32.mrf.mxu3 }
 0x3b6   : > { %5537 = vst [vmem:[#allocation3_spill] sm:$0xff] %v5292_v56 }
 0x3b7   : > { %v3026_v18 = vpop.f32.mrf.mxu0 }
 0x3ba   : > { %v5313_v3 = vpop.f32.mrf.mxu1 }
 0x3bd   : > { %v5296_v60 = vpop.f32.mrf.mxu3 }
 0x3be   : > { %5538 = vst [vmem:[#allocation4_spill] sm:$0xff] %v5296_v60 }
 0x3bf   : > { %v5299_v15 = vpop.f32.mrf.mxu0 }
 0x3c2   : > { %3693 = vmatmul.msk.bf16.gmra.mxu3 %vm2768_vm12, %v5036_v0  ;;  %3717 = vmatmul.msk.bf16.gmra.mxu0 %vm2768_vm12, %v5115_v27 }
 0x3c5   : > { %v2917_v41 = vpop.f32.mrf.mxu3 }
 0x3c6   : > { %v2018_v8 = vpop.f32.mrf.mxu2 }
 0x3c7   : > { %v2057_v29 = vadd.f32 %v2018_v8, %v4706_v4  ;;  %v5309_v57 = vpop.f32.mrf.mxu0  ;;  %v5324_v8 = vpop.f32.mrf.mxu1 }
 0x3c9   : > { %v2097_v46 = vmul.f32 %v5017_v24, %v2057_v29 }
 0x3cb   : > { %v2137_v7 = vadd.f32 %v5025_v14, %v2097_v46 }
 0x3cd   : > { %v2919_v12 = vpop.f32.mrf.mxu3  ;;  %v2173_v13 = vmax.f32 %v2137_v7, 0.0 }
 0x3ce   : > { %v2020_v0 = vpop.f32.mrf.mxu2 }
 0x3cf   : > { %v2058_v55 = vadd.f32 %v2020_v0, %v4708_v48  ;;  %v3034_v17 = vpop.f32.mrf.mxu0  ;;  %v2209_v4 = vmul.f32 0.0, %v2173_v13 }
 0x3d1   : > { %v2098_v44 = vmul.f32 %v5017_v24, %v2058_v55  ;;  %v2245_v7 = vpack.c.bf16 %v2209_v4, %v2209_v4  ;;  %v5329_v24 = vld [vmem:[%s5529_s7] ss:$0 sm:$0xff] }
 0x3d2   : > { %3694 = vmatmul.msk.bf16.gmra.mxu3 %vm2768_vm12, %v5070_v26  ;;  %3718 = vmatmul.msk.bf16.gmra.mxu0 %vm2768_vm12, %v5128_v58 }
 0x3d3   : > { %v2138_v16 = vadd.f32 %v5025_v14, %v2098_v44  ;;  %v2317_v13 = vunpack.c.l.b16 %v2245_v7 }
 0x3d5   : > { %v2174_v29 = vmax.f32 %v2138_v16, 0.0  ;;  %v2922_v46 = vpop.f32.mrf.mxu3  ;;  %v5333_v16 = vpop.f32.mrf.mxu1 }
 0x3d6   : > { %v2814_v48 = vpop.f32.mrf.mxu2 }
 0x3d7   : > { %v2210_v5 = vmul.f32 0.0, %v2174_v29  ;;  %v2918_v0 = vadd.f32 %v2917_v41, %v2814_v48  ;;  %v3036_v26 = vpop.f32.mrf.mxu0  ;;  %v3818_v29 = vld [vmem:[%s3990_s16 + $0x68] sm:$0xff] }
 0x3d8   : > { %3799 = vmatmul.msk.bf16.gmra.mxu1 %vm1364_vm7, %v3818_v29 }
 0x3d9   : > { %v2246_v55 = vpack.c.bf16 %v2210_v5, %v2210_v5  ;;  %v3104_v60 = vadd.f32 %v3024_v30, %v2918_v0 }
 0x3db   : > { %v3140_v14 = vadd.f32 %v5329_v24, %v3104_v60  ;;  %v2318_v44 = vunpack.c.l.b16 %v2246_v55 }
 0x3dd   : > { %v3394_v56 = vadd.f32 %v3314_v39, %v3140_v14  ;;  %v2924_v51 = vpop.f32.mrf.mxu3  ;;  %v2336_v4 = vpack.c.b16 %v2318_v44, %v2317_v13  ;;  %v3331_v13 = vpop.f32.mrf.mxu1 }
 0x3de   : > { %v2816_v41 = vpop.f32.mrf.mxu2 }
 0x3df   : > { %v3426_v30 = vpack.c.bf16 %v3394_v56, %v3394_v56  ;;  %v2920_v48 = vadd.f32 %v2919_v12, %v2816_v41  ;;  %v3039_v5 = vpop.f32.mrf.mxu0  ;;  %2605 = vrot.lane.b32.xlu2 %v2336_v4, %s3914_s22  ;;  %v2457_v60 = vshrl.u32 %v2336_v4, 16  ;;  %v2460_v7 = vshll.u32 %v2336_v4, 16 }
 0x3e1   : > { %3459 = vst.msk [vmem:[%s5339_s26] sm:$0xf] %vm3458_vm14, %v3426_v30  ;;  %v3105_v39 = vadd.f32 %v3026_v18, %v2920_v48  ;;  %v2533_v0 = vrot.slane %v2460_v7, 1  ;;  %v2459_v55 = vrot.slane %v2457_v60, 7 }
 0x3e2   : > { %3695 = vmatmul.msk.bf16.gmra.mxu3 %vm2768_vm12, %v5100_v62  ;;  %3719 = vmatmul.msk.bf16.gmra.mxu0 %vm2768_vm12, %v5141_v34 }
 0x3e3   : > { %v3141_v56 = vadd.f32 %v5329_v24, %v3105_v39  ;;  %v2534_v12 = vor.u32 %v2533_v0, %v2457_v60  ;;  %v5350_v14 = vor.u32 %v2460_v7, %v2459_v55 }
 0x3e5   : > { %v3395_v44 = vadd.f32 %v5290_v54, %v3141_v56  ;;  %v2927_v4 = vpop.f32.mrf.mxu3  ;;  %v2570_v18 = vsel %vm4047_vm2, %v2534_v12, 0  ;;  %v3819_v56 = vld [vmem:[%s3990_s16 + $0x70] sm:$0xff] }
 0x3e6   : > { %v2928_v29 = vadd.f32 %v2927_v4, %v5119_v20  ;;  %v2819_v62 = vpop.f32.mrf.mxu2  ;;  %2659 = vrot.lane.b32.xlu0 %v2570_v18, %s3915_s25  ;;  %v3334_v20 = vpop.f32.mrf.mxu1 }
 0x3e7   : > { %v3427_v41 = vpack.c.bf16 %v3395_v44, %v3395_v44  ;;  %v2923_v30 = vadd.f32 %v2922_v46, %v2819_v62  ;;  %v3041_v48 = vpop.f32.mrf.mxu0 }
 0x3e8   : > { %v3108_v39 = vadd.f32 %v3034_v17, %v2928_v29  ;;  %3800 = vmatmul.msk.bf16.gmra.mxu1 %vm1364_vm7, %v3819_v56 }
 0x3e9   : > { %3460 = vst.msk [vmem:[%s5339_s26 + $0x4] sm:$0xf] %vm3458_vm14, %v3427_v41  ;;  %v3106_v60 = vadd.f32 %v5299_v15, %v2923_v30 }
 0x3ea   : > { %v3144_v54 = vadd.f32 %v5329_v24, %v3108_v39 }
 0x3eb   : > { %v3142_v9 = vadd.f32 %v5329_v24, %v3106_v60 }
 0x3ec   : > { %v3398_v7 = vadd.f32 %v5313_v3, %v3144_v54 }
 0x3ed   : > { %v3396_v0 = vadd.f32 %v5294_v36, %v3142_v9  ;;  %v2929_v55 = vpop.f32.mrf.mxu3 }
 0x3ee   : > { %v3430_v46 = vpack.c.bf16 %v3398_v7, %v3398_v7  ;;  %v2930_v17 = vadd.f32 %v2929_v55, %v5121_v32  ;;  %v2821_v12 = vpop.f32.mrf.mxu2  ;;  %v3336_v29 = vpop.f32.mrf.mxu1  ;;  %v3820_v7 = vld [vmem:[%s3990_s16 + $0x78] sm:$0xff] }
 0x3ef   : > { %v3428_v44 = vpack.c.bf16 %v3396_v0, %v3396_v0  ;;  %v2925_v4 = vadd.f32 %v2924_v51, %v2821_v12  ;;  %v3044_v18 = vpop.f32.mrf.mxu0 }
 0x3f0   : > { %3463 = vst.msk [vmem:[%s5339_s26 + $0x10] sm:$0xf] %vm3458_vm14, %v3430_v46  ;;  %v3109_v15 = vadd.f32 %v3036_v26, %v2930_v17 }
 0x3f1   : > { %3461 = vst.msk [vmem:[%s5339_s26 + $0x8] sm:$0xf] %vm3458_vm14, %v3428_v44  ;;  %v3107_v36 = vadd.f32 %v5309_v57, %v2925_v4 }
 0x3f2   : > { %3696 = vmatmul.msk.bf16.gmra.mxu3 %vm2768_vm12, %v5115_v27  ;;  %3720 = vmatmul.msk.bf16.gmra.mxu0 %vm2768_vm12, %v5154_v38  ;;  %v3145_v32 = vadd.f32 %v5329_v24, %v3109_v15 }
 0x3f3   : > { %v3143_v51 = vadd.f32 %v5329_v24, %v3107_v36  ;;  %v3821_v36 = vld [vmem:[%s3990_s16 + $0x80] sm:$0xff] }
 0x3f4   : > { %v3399_v3 = vadd.f32 %v5324_v8, %v3145_v32 }
 0x3f5   : > { %v3397_v26 = vadd.f32 %v5306_v19, %v3143_v51  ;;  %v2932_v62 = vpop.f32.mrf.mxu3 }
 0x3f6   : > { %v3431_v41 = vpack.c.bf16 %v3399_v3, %v3399_v3  ;;  %v2933_v57 = vadd.f32 %v2932_v62, %v5132_v25  ;;  %v3339_v8 = vpop.f32.mrf.mxu1 }
 0x3f7   : > { %v3429_v30 = vpack.c.bf16 %v3397_v26, %v3397_v26  ;;  %v3046_v27 = vpop.f32.mrf.mxu0 }
 0x3f8   : > { %3464 = vst.msk [vmem:[%s5339_s26 + $0x14] sm:$0xf] %vm3458_vm14, %v3431_v41  ;;  %v3110_v39 = vadd.f32 %v3039_v5, %v2933_v57  ;;  %3801 = vmatmul.msk.bf16.gmra.mxu1 %vm1364_vm7, %v3820_v7 }
 0x3f9   : > { %3462 = vst.msk [vmem:[%s5339_s26 + $0xc] sm:$0xf] %vm3458_vm14, %v3429_v30 }
 0x3fa   : > { %v3146_v60 = vadd.f32 %v5329_v24, %v3110_v39 }
 0x3fc   : > { %v3400_v54 = vadd.f32 %v5333_v16, %v3146_v60 }
 0x3fd   : > { %v2934_v9 = vpop.f32.mrf.mxu3 }
 0x3fe   : > { %v3432_v19 = vpack.c.bf16 %v3400_v54, %v3400_v54  ;;  %v2935_v0 = vadd.f32 %v2934_v9, %v5137_v52  ;;  %v3341_v56 = vpop.f32.mrf.mxu1 }
 0x3ff   : > { %v3049_v55 = vpop.f32.mrf.mxu0 }
 0x400   : > { %3465 = vst.msk [vmem:[%s5339_s26 + $0x18] sm:$0xf] %vm3458_vm14, %v3432_v19  ;;  %v3111_v25 = vadd.f32 %v3041_v48, %v2935_v0 }
 0x402   : > { %3697 = vmatmul.msk.bf16.gmra.mxu3 %vm2768_vm12, %v5128_v58  ;;  %3721 = vmatmul.msk.bf16.gmra.mxu0 %vm2768_vm12, %v5167_v35  ;;  %v3147_v16 = vadd.f32 %v5329_v24, %v3111_v25 }
 0x404   : > { %v3401_v5 = vadd.f32 %v3331_v13, %v3147_v16 }
 0x405   : > { %v2937_v46 = vpop.f32.mrf.mxu3 }
 0x406   : > { %v3433_v52 = vpack.c.bf16 %v3401_v5, %v3401_v5  ;;  %v2938_v17 = vadd.f32 %v2937_v46, %v5145_v22  ;;  %v3344_v58 = vpop.f32.mrf.mxu1 }
 0x407   : > { %v3051_v12 = vpop.f32.mrf.mxu0 }
 0x408   : > { %3466 = vst.msk [vmem:[%s5339_s26 + $0x1c] sm:$0xf] %vm3458_vm14, %v3433_v52  ;;  %v3112_v48 = vadd.f32 %v3044_v18, %v2938_v17  ;;  %3802 = vmatmul.msk.bf16.gmra.mxu1 %vm1364_vm7, %v3821_v36 }
 0x40a   : > { %v3148_v44 = vadd.f32 %v5329_v24, %v3112_v48 }
 0x40c   : > { %v3402_v4 = vadd.f32 %v3334_v20, %v3148_v44  ;;  %v3822_v44 = vld [vmem:[%s3990_s16 + $0x88] sm:$0xff] }
 0x40d   : > { %v2939_v15 = vpop.f32.mrf.mxu3 }
 0x40e   : > { %v3434_v32 = vpack.c.bf16 %v3402_v4, %v3402_v4  ;;  %v2940_v13 = vadd.f32 %v2939_v15, %v5147_v45  ;;  %v3346_v3 = vpop.f32.mrf.mxu1 }
 0x40f   : > { %v3054_v51 = vpop.f32.mrf.mxu0 }
 0x410   : > { %3467 = vst.msk [vmem:[%s5339_s26 + $0x20] sm:$0xf] %vm3458_vm14, %v3434_v32  ;;  %v3113_v22 = vadd.f32 %v3046_v27, %v2940_v13 }
 0x412   : > { %3698 = vmatmul.msk.bf16.gmra.mxu3 %vm2768_vm12, %v5141_v34  ;;  %3722 = vmatmul.msk.bf16.gmra.mxu0 %vm2768_vm12, %v5187_v21  ;;  %v3149_v20 = vadd.f32 %v5329_v24, %v3113_v22 }
 0x414   : > { %v3403_v18 = vadd.f32 %v3336_v29, %v3149_v20 }
 0x415   : > { %v2942_v26 = vpop.f32.mrf.mxu3 }
 0x416   : > { %v3435_v62 = vpack.c.bf16 %v3403_v18, %v3403_v18  ;;  %v2943_v45 = vadd.f32 %v2942_v26, %v5158_v50  ;;  %v3349_v34 = vpop.f32.mrf.mxu1 }
 0x417   : > { %v3056_v41 = vpop.f32.mrf.mxu0 }
 0x418   : > { %3468 = vst.msk [vmem:[%s5339_s26 + $0x24] sm:$0xf] %vm3458_vm14, %v3435_v62  ;;  %v3114_v57 = vadd.f32 %v3049_v55, %v2943_v45  ;;  %3803 = vmatmul.msk.bf16.gmra.mxu1 %vm1364_vm7, %v3822_v44 }
 0x41a   : > { %v3150_v30 = vadd.f32 %v5329_v24, %v3114_v57 }
 0x41c   : > { %v3404_v27 = vadd.f32 %v3339_v8, %v3150_v30 }
 0x41d   : > { %v2944_v39 = vpop.f32.mrf.mxu3 }
 0x41e   : > { %v3436_v21 = vpack.c.bf16 %v3404_v27, %v3404_v27  ;;  %v2945_v60 = vadd.f32 %v2944_v39, %v5160_v59  ;;  %v3351_v19 = vpop.f32.mrf.mxu1 }
 0x41f   : > { %v3059_v54 = vpop.f32.mrf.mxu0 }
 0x420   : > { %3469 = vst.msk [vmem:[%s5339_s26 + $0x28] sm:$0xf] %vm3458_vm14, %v3436_v21  ;;  %v3115_v29 = vadd.f32 %v3051_v12, %v2945_v60 }
 0x422   : > { %3699 = vmatmul.msk.bf16.gmra.mxu3 %vm2768_vm12, %v5154_v38  ;;  %v3151_v50 = vadd.f32 %v5329_v24, %v3115_v29 }
 0x424   : > { %v3405_v9 = vadd.f32 %v3341_v56, %v3151_v50 }
 0x425   : > { %v2947_v7 = vpop.f32.mrf.mxu3 }
 0x426   : > { %v3437_v8 = vpack.c.bf16 %v3405_v9, %v3405_v9  ;;  %v2948_v0 = vadd.f32 %v2947_v7, %v5171_v53  ;;  %v3354_v56 = vpop.f32.mrf.mxu1 }
 0x427   : > { %v3061_v55 = vpop.f32.mrf.mxu0 }
 0x428   : > { %3470 = vst.msk [vmem:[%s5339_s26 + $0x2c] sm:$0xf] %vm3458_vm14, %v3437_v8  ;;  %v3116_v59 = vadd.f32 %v3054_v51, %v2948_v0  ;;  %v2498_v0 = vsel %vm4279_vm6, 0, %v5350_v14 }
 0x42a   : > { %v3152_v25 = vadd.f32 %v5329_v24, %v3116_v59 }
 0x42c   : > { %v3406_v16 = vadd.f32 %v3344_v58, %v3152_v25 }
 0x42d   : > { %v2949_v5 = vpop.f32.mrf.mxu3 }
 0x42e   : > { %v3438_v38 = vpack.c.bf16 %v3406_v16, %v3406_v16  ;;  %v2950_v46 = vadd.f32 %v2949_v5, %v5176_v23  ;;  %v3356_v36 = vpop.f32.mrf.mxu1 }
 0x42f   : > { %v3064_v52 = vpop.f32.mrf.mxu0 }
 0x430   : > { %3471 = vst.msk [vmem:[%s5339_s26 + $0x30] sm:$0xf] %vm3458_vm14, %v3438_v38  ;;  %v3117_v17 = vadd.f32 %v3056_v41, %v2950_v46 }
 0x432   : > { %3700 = vmatmul.msk.bf16.gmra.mxu3 %vm2768_vm12, %v5167_v35  ;;  %v3153_v53 = vadd.f32 %v5329_v24, %v3117_v17 }
 0x434   : > { %v3407_v12 = vadd.f32 %v3346_v3, %v3153_v53 }
 0x435   : > { %v2952_v48 = vpop.f32.mrf.mxu3 }
 0x436   : > { %v3439_v4 = vpack.c.bf16 %v3407_v12, %v3407_v12  ;;  %v2953_v58 = vadd.f32 %v2952_v48, %v5194_v10  ;;  %v3359_v3 = vpop.f32.mrf.mxu1 }
 0x437   : > { %v3066_v15 = vpop.f32.mrf.mxu0 }
 0x438   : > { %3472 = vst.msk [vmem:[%s5339_s26 + $0x34] sm:$0xf] %vm3458_vm14, %v3439_v4  ;;  %v3118_v23 = vadd.f32 %v3059_v54, %v2953_v58 }
 0x439   : > { %v2606_v50 = vpop.permute.xlu2 %2605 }
 0x43a   : > { %v3154_v32 = vadd.f32 %v5329_v24, %v3118_v23 }
 0x43c   : > { %v3408_v35 = vadd.f32 %v3349_v34, %v3154_v32 }
 0x43d   : > { %v2954_v13 = vpop.f32.mrf.mxu3 }
 0x43e   : > { %v3440_v51 = vpack.c.bf16 %v3408_v35, %v3408_v35  ;;  %v2955_v22 = vadd.f32 %v2954_v13, %v5200_v28  ;;  %v3361_v39 = vpop.f32.mrf.mxu1 }
 0x43f   : > { %v3069_v18 = vpop.f32.mrf.mxu0 }
 0x440   : > { %3473 = vst.msk [vmem:[%s5339_s26 + $0x38] sm:$0xf] %vm3458_vm14, %v3440_v51  ;;  %v3119_v20 = vadd.f32 %v3061_v55, %v2955_v22 }
 0x442   : > { %v3155_v10 = vadd.f32 %v5329_v24, %v3119_v20 }
 0x444   : > { %v3409_v26 = vadd.f32 %v3351_v19, %v3155_v10 }
 0x445   : > { %v2957_v62 = vpop.f32.mrf.mxu3 }
 0x446   : > { %v3441_v45 = vpack.c.bf16 %v3409_v26, %v3409_v26  ;;  %v2958_v41 = vadd.f32 %v2957_v62, %v5215_v11  ;;  %v3364_v55 = vpop.f32.mrf.mxu1 }
 0x447   : > { %v3071_v27 = vpop.f32.mrf.mxu0 }
 0x448   : > { %3474 = vst.msk [vmem:[%s5339_s26 + $0x3c] sm:$0xf] %vm3458_vm14, %v3441_v45  ;;  %v3120_v57 = vadd.f32 %v3064_v52, %v2958_v41 }
 0x44a   : > { %v3156_v30 = vadd.f32 %v5329_v24, %v3120_v57 }
 0x44c   : > { %v3410_v28 = vadd.f32 %v3354_v56, %v3156_v30 }
 0x44d   : > { %v2959_v34 = vpop.f32.mrf.mxu3 }
 0x44e   : > { %v3442_v21 = vpack.c.bf16 %v3410_v28, %v3410_v28  ;;  %v2960_v60 = vadd.f32 %v2959_v34, %v5220_v47  ;;  %v2714_v47 = vsel %vm1425_vm8, %v2498_v0, %v2606_v50  ;;  %v3366_v56 = vpop.f32.mrf.mxu1 }
 0x44f   : > { %v3074_v9 = vpop.f32.mrf.mxu0 }
 0x450   : > { %3475 = vst.msk [vmem:[%s5339_s26 + $0x40] sm:$0xf] %vm3458_vm14, %v3442_v21  ;;  %v3121_v54 = vadd.f32 %v3066_v15, %v2960_v60 }
 0x452   : > { %v3157_v29 = vadd.f32 %v5329_v24, %v3121_v54 }
 0x454   : > { %v3411_v11 = vadd.f32 %v3356_v36, %v3157_v29 }
 0x455   : > { %v2962_v7 = vpop.f32.mrf.mxu3 }
 0x456   : > { %v3443_v19 = vpack.c.bf16 %v3411_v11, %v3411_v11  ;;  %v2963_v8 = vadd.f32 %v2962_v7, %v5230_v31  ;;  %v3369_v15 = vpop.f32.mrf.mxu1 }
 0x457   : > { %v3076_v14 = vpop.f32.mrf.mxu0 }
 0x458   : > { %3476 = vst.msk [vmem:[%s5339_s26 + $0x44] sm:$0xf] %vm3458_vm14, %v3443_v19  ;;  %v3122_v59 = vadd.f32 %v3069_v18, %v2963_v8  ;;  %v2660_v25 = vpop.permute.xlu0 %2659 }
 0x459   : > { %v2751_v16 = vsel %vm2715_vm11, %v2714_v47, %v2660_v25 }
 0x45a   : > { %3723 = vmatmul.msk.bf16.gmra.mxu0 %vm2768_vm12, %v2751_v16  ;;  %v3158_v5 = vadd.f32 %v5329_v24, %v3122_v59 }
 0x45c   : > { %v3412_v38 = vadd.f32 %v3359_v3, %v3158_v5 }
 0x45d   : > { %v2964_v31 = vpop.f32.mrf.mxu3 }
 0x45e   : > { %v3444_v46 = vpack.c.bf16 %v3412_v38, %v3412_v38  ;;  %v2965_v40 = vadd.f32 %v2964_v31, %v5232_v43  ;;  %v3371_v18 = vpop.f32.mrf.mxu1 }
 0x45f   : > { %v3079_v58 = vpop.f32.mrf.mxu0 }
 0x460   : > { %3477 = vst.msk [vmem:[%s5339_s26 + $0x48] sm:$0xf] %vm3458_vm14, %v3444_v46  ;;  %v3123_v52 = vadd.f32 %v3071_v27, %v2965_v40 }
 0x462   : > { %v3159_v17 = vadd.f32 %v5329_v24, %v3123_v52 }
 0x464   : > { %v3413_v53 = vadd.f32 %v3361_v39, %v3159_v17 }
 0x465   : > { %v2967_v12 = vpop.f32.mrf.mxu3 }
 0x466   : > { %v3445_v48 = vpack.c.bf16 %v3413_v53, %v3413_v53  ;;  %v2968_v44 = vadd.f32 %v2967_v12, %v5240_v6  ;;  %v3374_v27 = vpop.f32.mrf.mxu1 }
 0x467   : > { %v3081_v6 = vpop.f32.mrf.mxu0 }
 0x468   : > { %3478 = vst.msk [vmem:[%s5339_s26 + $0x4c] sm:$0xf] %vm3458_vm14, %v3445_v48  ;;  %v3124_v4 = vadd.f32 %v3074_v9, %v2968_v44 }
 0x46a   : > { %v3160_v43 = vadd.f32 %v5329_v24, %v3124_v4 }
 0x46c   : > { %v3414_v23 = vadd.f32 %v3364_v55, %v3160_v43 }
 0x46d   : > { %v2969_v36 = vpop.f32.mrf.mxu3 }
 0x46e   : > { %v3446_v32 = vpack.c.bf16 %v3414_v23, %v3414_v23  ;;  %v2970_v35 = vadd.f32 %v2969_v36, %v5242_v37  ;;  %v3376_v50 = vpop.f32.mrf.mxu1  ;;  %v5539_v36 = vld [vmem:[#allocation2_spill] sm:$0xff] }
 0x46f   : > { %v3084_v45 = vpop.f32.mrf.mxu0 }
 0x470   : > { %3479 = vst.msk [vmem:[%s5339_s26 + $0x50] sm:$0xf] %vm3458_vm14, %v3446_v32  ;;  %v3125_v13 = vadd.f32 %v3076_v14, %v2970_v35 }
 0x472   : > { %v3161_v51 = vadd.f32 %v5329_v24, %v3125_v13 }
 0x474   : > { %v3415_v22 = vadd.f32 %v3366_v56, %v3161_v51 }
 0x475   : > { %v2972_v20 = vpop.f32.mrf.mxu3 }
 0x476   : > { %v3447_v10 = vpack.c.bf16 %v3415_v22, %v3415_v22  ;;  %v2973_v3 = vadd.f32 %v2972_v20, %v5250_v63  ;;  %v3379_v55 = vpop.f32.mrf.mxu1 }
 0x477   : > { %v3086_v54 = vpop.f32.mrf.mxu0 }
 0x478   : > { %3480 = vst.msk [vmem:[%s5339_s26 + $0x54] sm:$0xf] %vm3458_vm14, %v3447_v10  ;;  %v3126_v26 = vadd.f32 %v3079_v58, %v2973_v3 }
 0x47a   : > { %v3162_v62 = vadd.f32 %v5329_v24, %v3126_v26 }
 0x47c   : > { %v3416_v37 = vadd.f32 %v3369_v15, %v3162_v62 }
 0x47d   : > { %v2974_v41 = vpop.f32.mrf.mxu3 }
 0x47e   : > { %v3448_v57 = vpack.c.bf16 %v3416_v37, %v3416_v37  ;;  %v2975_v30 = vadd.f32 %v2974_v41, %v5252_v42  ;;  %v3381_v40 = vpop.f32.mrf.mxu1 }
 0x47f   : > { %v3089_v0 = vpop.f32.mrf.mxu0 }
 0x480   : > { %3481 = vst.msk [vmem:[%s5339_s26 + $0x58] sm:$0xf] %vm3458_vm14, %v3448_v57  ;;  %v3127_v28 = vadd.f32 %v3081_v6, %v2975_v30  ;;  %v5541_v57 = vld [vmem:[#allocation4_spill] sm:$0xff] }
 0x482   : > { %v3163_v34 = vadd.f32 %v5329_v24, %v3127_v28 }
 0x484   : > { %v3417_v63 = vadd.f32 %v3371_v18, %v3163_v34  ;;  %v5540_v18 = vld [vmem:[#allocation3_spill] sm:$0xff] }
 0x485   : > { %v2977_v39 = vpop.f32.mrf.mxu3 }
 0x486   : > { %v3449_v21 = vpack.c.bf16 %v3417_v63, %v3417_v63  ;;  %v2978_v60 = vadd.f32 %v2977_v39, %v5260_v1  ;;  %v3384_v4 = vpop.f32.mrf.mxu1 }
 0x488   : > { %3482 = vst.msk [vmem:[%s5339_s26 + $0x5c] sm:$0xf] %vm3458_vm14, %v3449_v21  ;;  %v3128_v29 = vadd.f32 %v3084_v45, %v2978_v60 }
 0x48a   : > { %v3164_v42 = vadd.f32 %v5329_v24, %v3128_v29 }
 0x48c   : > { %v3418_v11 = vadd.f32 %v3374_v27, %v3164_v42 }
 0x48d   : > { %v2979_v9 = vpop.f32.mrf.mxu3 }
 0x48e   : > { %v3450_v7 = vpack.c.bf16 %v3418_v11, %v3418_v11  ;;  %v2980_v19 = vadd.f32 %v2979_v9, %v5262_v61  ;;  %v3091_v61 = vpop.f32.mrf.mxu0  ;;  %v3386_v51 = vpop.f32.mrf.mxu1 }
 0x490   : > { %3483 = vst.msk [vmem:[%s5339_s26 + $0x60] sm:$0xf] %vm3458_vm14, %v3450_v7  ;;  %v3129_v8 = vadd.f32 %v3086_v54, %v2980_v19 }
 0x492   : > { %v3165_v1 = vadd.f32 %v5329_v24, %v3129_v8 }
 0x494   : > { %v3419_v47 = vadd.f32 %v3376_v50, %v3165_v1 }
 0x495   : > { %v2982_v59 = vpop.f32.mrf.mxu3 }
 0x496   : > { %v3451_v25 = vpack.c.bf16 %v3419_v47, %v3419_v47  ;;  %v2983_v16 = vadd.f32 %v2982_v59, %v5270_v49  ;;  %v3094_v53 = vpop.f32.mrf.mxu0  ;;  %v3389_v62 = vpop.f32.mrf.mxu1 }
 0x498   : > { %3484 = vst.msk [vmem:[%s5339_s26 + $0x64] sm:$0xf] %vm3458_vm14, %v3451_v25  ;;  %v3130_v5 = vadd.f32 %v3089_v0, %v2983_v16 }
 0x49a   : > { %v3166_v38 = vadd.f32 %v5329_v24, %v3130_v5 }
 0x49c   : > { %v3420_v31 = vadd.f32 %v3379_v55, %v3166_v38 }
 0x49d   : > { %v2984_v46 = vpop.f32.mrf.mxu3 }
 0x49e   : > { %v3452_v14 = vpack.c.bf16 %v3420_v31, %v3420_v31  ;;  %v2985_v52 = vadd.f32 %v2984_v46, %v5272_v2  ;;  %v3096_v35 = vpop.f32.mrf.mxu0  ;;  %v3391_v39 = vpop.f32.mrf.mxu1 }
 0x4a0   : > { %3485 = vst.msk [vmem:[%s5339_s26 + $0x68] sm:$0xf] %vm3458_vm14, %v3452_v14  ;;  %v3131_v56 = vadd.f32 %v3091_v61, %v2985_v52 }
 0x4a2   : > { %v3167_v17 = vadd.f32 %v5329_v24, %v3131_v56 }
 0x4a4   : > { %v3421_v49 = vadd.f32 %v3381_v40, %v3167_v17 }
 0x4a5   : > { %v2987_v12 = vpop.f32.mrf.mxu3 }
 0x4a6   : > { %v3453_v48 = vpack.c.bf16 %v3421_v49, %v3421_v49  ;;  %v2988_v44 = vadd.f32 %v2987_v12, %v5280_v33 }
 0x4a8   : > { %3486 = vst.msk [vmem:[%s5339_s26 + $0x6c] sm:$0xf] %vm3458_vm14, %v3453_v48  ;;  %v3132_v58 = vadd.f32 %v3094_v53, %v2988_v44 }
 0x4aa   : > { %v3168_v43 = vadd.f32 %v5329_v24, %v3132_v58 }
 0x4ac   : > { %v3422_v2 = vadd.f32 %v3384_v4, %v3168_v43 }
 0x4ad   : > { %v2989_v15 = vpop.f32.mrf.mxu3 }
 0x4ae   : > { %v3454_v23 = vpack.c.bf16 %v3422_v2, %v3422_v2  ;;  %v2990_v32 = vadd.f32 %v2989_v15, %v5539_v36 }
 0x4b0   : > { %3487 = vst.msk [vmem:[%s5339_s26 + $0x70] sm:$0xf] %vm3458_vm14, %v3454_v23  ;;  %v3133_v13 = vadd.f32 %v3096_v35, %v2990_v32 }
 0x4b2   : > { %v3169_v33 = vadd.f32 %v5329_v24, %v3133_v13 }
 0x4b4   : > { %v3423_v6 = vadd.f32 %v3386_v51, %v3169_v33 }
 0x4b5   : > { %v2992_v20 = vpop.f32.mrf.mxu3 }
 0x4b6   : > { %v3455_v22 = vpack.c.bf16 %v3423_v6, %v3423_v6  ;;  %v2993_v10 = vadd.f32 %v2992_v20, %v5540_v18 }
 0x4b8   : > { %3488 = vst.msk [vmem:[%s5339_s26 + $0x74] sm:$0xf] %vm3458_vm14, %v3455_v22 }
 0x4bd   : > { %v2994_v45 = vpop.f32.mrf.mxu3 }
 0x4be   : > { %v2995_v30 = vadd.f32 %v2994_v45, %v5541_v57 }
 0x4d7   : > { %v3099_v3 = vpop.f32.mrf.mxu0 }
 0x4d8   : > { %v3134_v26 = vadd.f32 %v3099_v3, %v2993_v10 }
 0x4da   : > { %v3170_v37 = vadd.f32 %v5329_v24, %v3134_v26 }
 0x4dc   : > { %v3424_v41 = vadd.f32 %v3389_v62, %v3170_v37 }
 0x4de   : > { %v3456_v27 = vpack.c.bf16 %v3424_v41, %v3424_v41 }
 0x4df   : > { %v3101_v28 = vpop.f32.mrf.mxu0 }
 0x4e0   : > { %3489 = vst.msk [vmem:[%s5339_s26 + $0x78] sm:$0xf] %vm3458_vm14, %v3456_v27  ;;  %v3135_v34 = vadd.f32 %v3101_v28, %v2995_v30 }
 0x4e2   : > { %v3171_v63 = vadd.f32 %v5329_v24, %v3135_v34 }
 0x4e4   : > { %v3425_v21 = vadd.f32 %v3391_v39, %v3171_v63 }
 0x4e6   : > { %v3457_v60 = vpack.c.bf16 %v3425_v21, %v3425_v21 }
 0x4e8   : > { %3490 = vst.msk [vmem:[%s5339_s26 + $0x7c] sm:$0xf] %vm3458_vm14, %v3457_v60 }
 0x4e9 PF: > { %s19_s11 = sadd.s32 1, %s3911_s11   ;;  %s5542_s30 = smov %s3907_s10 }
 0x4ea   : > { %p16_p5 = scmp.ge.s32.totalorder %s19_s11, 4   ;;  %s5543_s10 = smov %s5545_s12 }
 0x4ec   :  { %18 = sbr.rel (!%p16_p5) target bundleno = 2 (0x2), region = 91 }

</bundles_post_ra>
